<compile_context>
chip_gen: v6e
topology: v6e:2x2x1
jax: 0.10.0
libtpu: 0.0.40
codegen_flags: <defaults>
</compile_context>

<pallas_src>
import math
from functools import partial

import jax
import jax.numpy as jnp
from jax import lax
from jax.experimental import pallas as pl
from jax.experimental.pallas import tpu as pltpu

NEG_INF = -1e9        # finite "-inf" for padding / causal masks (no NaN rows)
HEAD_NEG = -1e30      # much more negative: kills cross-head score blocks
LN_EPS = 1e-5

_ENC_LAYER_KEYS = ("wqkv", "bqkv", "wo", "bo", "ln1w", "ln1b",
                   "w1", "b1", "w2", "b2", "ln2w", "ln2b")
_DEC_LAYER_KEYS = ("sa_wqkv", "sa_bqkv", "sa_wo", "sa_bo", "ln1w", "ln1b",
                   "ca_wq", "ca_bq", "ca_wkv", "ca_bkv", "ca_wo", "ca_bo",
                   "ln2w", "ln2b", "w1", "b1", "w2", "b2", "ln3w", "ln3b")


# --------------------------------------------------------------------------
# In-kernel helpers
# --------------------------------------------------------------------------

def _layernorm(x, g, b):
    mean = jnp.mean(x, axis=-1, keepdims=True)
    var = jnp.mean((x - mean) ** 2, axis=-1, keepdims=True)
    return (x - mean) * lax.rsqrt(var + LN_EPS) * g + b


def _mha(q2, k2, v2, bias, wo, bo, qs, ks, vs, ctxs, *, B, Tq, Tk, H, Dh):
    """All-head attention with a single batched matmul pair.

    q2: (B*Tq, E) f32 (1/sqrt(Dh) folded into Q projection); k2/v2: (B*Tk, E).
    bias: (B, H*Tq, H*Tk) additive mask; it already contains the
    head-block-diagonal mask (HEAD_NEG off-diagonal) + padding/causal terms.
    qs/ks/vs: VMEM scratch (B, H*T, Dh) f32; ctxs: VMEM scratch (B*Tq, E) f32.
    Returns the out-projected attention output, shape (B*Tq, E) f32.
    """
    E = H * Dh
    # head-split into head-major scratch layout: row index (within batch) = h*T + t
    for h in range(H):
        qs[:, h * Tq:(h + 1) * Tq, :] = q2[:, h * Dh:(h + 1) * Dh].reshape(B, Tq, Dh)
        ks[:, h * Tk:(h + 1) * Tk, :] = k2[:, h * Dh:(h + 1) * Dh].reshape(B, Tk, Dh)
        vs[:, h * Tk:(h + 1) * Tk, :] = v2[:, h * Dh:(h + 1) * Dh].reshape(B, Tk, Dh)

    qa = qs[...].astype(jnp.bfloat16)
    ka = ks[...].astype(jnp.bfloat16)
    va = vs[...].astype(jnp.bfloat16)

    s = jnp.einsum("bqd,bkd->bqk", qa, ka,
                   preferred_element_type=jnp.float32) + bias     # (B, H*Tq, H*Tk)
    m = jnp.max(s, axis=-1, keepdims=True)
    p = jnp.exp(s - m)
    p = p * pl.reciprocal(jnp.sum(p, axis=-1, keepdims=True), approx=True)
    ctx = jnp.einsum("bqk,bkd->bqd", p.astype(jnp.bfloat16), va,
                     preferred_element_type=jnp.float32)          # (B, H*Tq, Dh)

    # scatter heads back to the (B*Tq, E) concat layout, then ONE out-proj dot
    for h in range(H):
        ctxs[:, h * Dh:(h + 1) * Dh] = ctx[:, h * Tq:(h + 1) * Tq, :].reshape(B * Tq, Dh)
    return (jnp.dot(ctxs[...].astype(jnp.bfloat16), wo,
                    preferred_element_type=jnp.float32) + bo)


# --------------------------------------------------------------------------
# Fused stacked-layer Pallas kernels
# --------------------------------------------------------------------------

def _encoder_stack_kernel(x_ref, bias_ref,
                          wqkv_ref, bqkv_ref, wo_ref, bo_ref,
                          ln1w_ref, ln1b_ref,
                          w1_ref, b1_ref, w2_ref, b2_ref,
                          ln2w_ref, ln2b_ref,
                          o_ref,
                          qs, ks, vs, ctxs, *, B, S, H, Dh):
    E = H * Dh

    @pl.when(pl.program_id(0) == 0)
    def _():
        o_ref[...] = x_ref[...]          # seed the resident activation carry

    x = o_ref[...]                       # (B*S, E) f32

    qkv = (jnp.dot(x.astype(jnp.bfloat16), wqkv_ref[...],
                   preferred_element_type=jnp.float32) + bqkv_ref[...])
    attn = _mha(qkv[:, :E], qkv[:, E:2 * E], qkv[:, 2 * E:],
                bias_ref[...], wo_ref[...], bo_ref[...],
                qs, ks, vs, ctxs, B=B, Tq=S, Tk=S, H=H, Dh=Dh)
    x = _layernorm(x + attn, ln1w_ref[...], ln1b_ref[...])

    hid = jnp.maximum(jnp.dot(x.astype(jnp.bfloat16), w1_ref[...],
                              preferred_element_type=jnp.float32) + b1_ref[...], 0.0)
    ff = (jnp.dot(hid.astype(jnp.bfloat16), w2_ref[...],
                  preferred_element_type=jnp.float32) + b2_ref[...])
    x = _layernorm(x + ff, ln2w_ref[...], ln2b_ref[...])
    o_ref[...] = x


def _decoder_stack_kernel(y_ref, mem_ref, sbias_ref, cbias_ref,
                          sa_wqkv_ref, sa_bqkv_ref, sa_wo_ref, sa_bo_ref,
                          ln1w_ref, ln1b_ref,
                          ca_wq_ref, ca_bq_ref, ca_wkv_ref, ca_bkv_ref,
                          ca_wo_ref, ca_bo_ref,
                          ln2w_ref, ln2b_ref,
                          w1_ref, b1_ref, w2_ref, b2_ref,
                          ln3w_ref, ln3b_ref,
                          fcw_ref, fcb_ref,
                          o_ref,
                          carry, qs, ks_t, vs_t, ks_s, vs_s, ctxs,
                          *, B, T, S, H, Dh):
    E = H * Dh

    @pl.when(pl.program_id(0) == 0)
    def _():
        carry[...] = y_ref[...]

    y = carry[...]                       # (B*T, E) f32
    mem = mem_ref[...]                   # (B*S, E) f32

    # ---- masked causal self-attention ----
    qkv = (jnp.dot(y.astype(jnp.bfloat16), sa_wqkv_ref[...],
                   preferred_element_type=jnp.float32) + sa_bqkv_ref[...])
    sa = _mha(qkv[:, :E], qkv[:, E:2 * E], qkv[:, 2 * E:],
              sbias_ref[...], sa_wo_ref[...], sa_bo_ref[...],
              qs, ks_t, vs_t, ctxs, B=B, Tq=T, Tk=T, H=H, Dh=Dh)
    y = _layernorm(y + sa, ln1w_ref[...], ln1b_ref[...])

    # ---- cross-attention over encoder memory (no padding mask in reference) ----
    qc = (jnp.dot(y.astype(jnp.bfloat16), ca_wq_ref[...],
                  preferred_element_type=jnp.float32) + ca_bq_ref[...])
    kvc = (jnp.dot(mem.astype(jnp.bfloat16), ca_wkv_ref[...],
                   preferred_element_type=jnp.float32) + ca_bkv_ref[...])
    ca = _mha(qc, kvc[:, :E], kvc[:, E:],
              cbias_ref[...], ca_wo_ref[...], ca_bo_ref[...],
              qs, ks_s, vs_s, ctxs, B=B, Tq=T, Tk=S, H=H, Dh=Dh)
    y = _layernorm(y + ca, ln2w_ref[...], ln2b_ref[...])

    # ---- feed-forward ----
    hid = jnp.maximum(jnp.dot(y.astype(jnp.bfloat16), w1_ref[...],
                              preferred_element_type=jnp.float32) + b1_ref[...], 0.0)
    ff = (jnp.dot(hid.astype(jnp.bfloat16), w2_ref[...],
                  preferred_element_type=jnp.float32) + b2_ref[...])
    y = _layernorm(y + ff, ln3w_ref[...], ln3b_ref[...])
    carry[...] = y

    # ---- fc_out fused into the last layer step (lane-dense padded vocab) ----
    @pl.when(pl.program_id(0) == pl.num_programs(0) - 1)
    def _():
        o_ref[...] = (jnp.dot(carry[...].astype(jnp.bfloat16), fcw_ref[...],
                              preferred_element_type=jnp.float32) + fcb_ref[...])


def _bottleneck_kernel(x_ref, w1_ref, b1_ref, w2_ref, b2_ref, w3_ref, b3_ref, o_ref):
    # ff1 (Linear+ReLU) then ff2 (Linear+ReLU+Linear), fused
    x = x_ref[...]
    h = jnp.maximum(jnp.dot(x.astype(jnp.bfloat16), w1_ref[...],
                            preferred_element_type=jnp.float32) + b1_ref[...], 0.0)
    h = jnp.maximum(jnp.dot(h.astype(jnp.bfloat16), w2_ref[...],
                            preferred_element_type=jnp.float32) + b2_ref[...], 0.0)
    o_ref[...] = (jnp.dot(h.astype(jnp.bfloat16), w3_ref[...],
                          preferred_element_type=jnp.float32) + b3_ref[...])


# --------------------------------------------------------------------------
# pallas_call wrappers
# --------------------------------------------------------------------------

def _const_spec(a):
    zeros = (0,) * a.ndim
    return pl.BlockSpec(a.shape, lambda l, _z=zeros: _z)


def _layer_spec(a):
    tail = (0,) * (a.ndim - 1)
    return pl.BlockSpec((None,) + a.shape[1:], lambda l, _t=tail: (l,) + _t)


def encoder_stack(x2, bias, prepped, *, B, S, H, L):
    E = x2.shape[1]
    Dh = E // H
    layer_args = [prepped["enc"][k] for k in _ENC_LAYER_KEYS]
    kern = partial(_encoder_stack_kernel, B=B, S=S, H=H, Dh=Dh)
    return pl.pallas_call(
        kern,
        grid=(L,),
        in_specs=[_const_spec(x2), _const_spec(bias)]
                 + [_layer_spec(a) for a in layer_args],
        out_specs=pl.BlockSpec((B * S, E), lambda l: (0, 0)),
        out_shape=jax.ShapeDtypeStruct((B * S, E), jnp.float32),
        scratch_shapes=[pltpu.VMEM((B, H * S, Dh), jnp.float32),
                        pltpu.VMEM((B, H * S, Dh), jnp.float32),
                        pltpu.VMEM((B, H * S, Dh), jnp.float32),
                        pltpu.VMEM((B * S, E), jnp.float32)],
        compiler_params=pltpu.CompilerParams(dimension_semantics=("arbitrary",)),
    )(x2, bias, *layer_args)


def decoder_stack(y2, mem2, self_bias, cross_bias, prepped, *, B, T, S, H, L):
    E = y2.shape[1]
    Dh = E // H
    Vp = prepped["fc_w"].shape[1]
    layer_args = [prepped["dec"][k] for k in _DEC_LAYER_KEYS]
    kern = partial(_decoder_stack_kernel, B=B, T=T, S=S, H=H, Dh=Dh)
    return pl.pallas_call(
        kern,
        grid=(L,),
        in_specs=[_const_spec(y2), _const_spec(mem2),
                  _const_spec(self_bias), _const_spec(cross_bias)]
                 + [_layer_spec(a) for a in layer_args]
                 + [_const_spec(prepped["fc_w"]), _const_spec(prepped["fc_b"])],
        out_specs=pl.BlockSpec((B * T, Vp), lambda l: (0, 0)),
        out_shape=jax.ShapeDtypeStruct((B * T, Vp), jnp.float32),
        scratch_shapes=[pltpu.VMEM((B * T, E), jnp.float32),       # activation carry
                        pltpu.VMEM((B, H * T, Dh), jnp.float32),   # q scratch
                        pltpu.VMEM((B, H * T, Dh), jnp.float32),   # k (self)
                        pltpu.VMEM((B, H * T, Dh), jnp.float32),   # v (self)
                        pltpu.VMEM((B, H * S, Dh), jnp.float32),   # k (cross)
                        pltpu.VMEM((B, H * S, Dh), jnp.float32),   # v (cross)
                        pltpu.VMEM((B * T, E), jnp.float32)],      # ctx scratch
        compiler_params=pltpu.CompilerParams(dimension_semantics=("arbitrary",)),
    )(y2, mem2, self_bias, cross_bias, *layer_args,
      prepped["fc_w"], prepped["fc_b"])


def bottleneck(x, prepped):
    return pl.pallas_call(
        _bottleneck_kernel,
        out_shape=jax.ShapeDtypeStruct(x.shape, jnp.float32),
    )(x, prepped["ff1_w"], prepped["ff1_b"], prepped["ff2_w1"], prepped["ff2_b1"],
      prepped["ff2_w2"], prepped["ff2_b2"])


# --------------------------------------------------------------------------
# Forward pass (batch-first internally; matches the PyTorch seq-first API)
# --------------------------------------------------------------------------

def _build_bias(kpm, Tq, Tk, H, *, causal):
    """(B, H*Tq, H*Tk) additive mask for the head-major score layout:
    entry [b, h*Tq+q, h'*Tk+k] = head-block mask + key padding (+ causal)."""
    B = kpm.shape[0]
    hh = jnp.where(jnp.eye(H, dtype=bool), 0.0, HEAD_NEG)            # (H, H)
    bias = jnp.zeros((B, H, Tq, H, Tk), jnp.float32)
    bias = bias + hh[None, :, None, :, None]
    bias = bias + kpm[:, None, None, None, :]
    if causal:
        cm = jnp.where(jnp.arange(Tk)[None, :] <= jnp.arange(Tq)[:, None],
                       0.0, NEG_INF).astype(jnp.float32)
        bias = bias + cm[None, None, :, None, :]
    return bias.reshape(B, H * Tq, H * Tk)


def transformer_forward(prepped, src, trg, cfg):
    S, B = src.shape
    T = trg.shape[0]
    E, H, V, L = cfg["embed_size"], cfg["heads"], cfg["trg_vocab_size"], cfg["num_layers"]

    src_bt = src.T                                               # (B, S)
    trg_bt = trg.T                                               # (B, T)

    # embeddings (plain-JAX gathers; tiny)
    x = prepped["src_word_emb"][src_bt] + prepped["src_pos_emb"][jnp.arange(S)][None]
    y = prepped["trg_word_emb"][trg_bt] + prepped["trg_pos_emb"][jnp.arange(T)][None]

    src_kpm = jnp.where(src_bt == cfg["src_pad_idx"], NEG_INF, 0.0).astype(jnp.float32)
    # NOTE: the reference calls make_src_mask(trg), i.e. compares against SRC pad idx.
    trg_kpm = jnp.where(trg_bt == cfg["src_pad_idx"], NEG_INF, 0.0).astype(jnp.float32)

    # masks built once, reused by every layer (hoisted out of the kernels)
    enc_bias = _build_bias(src_kpm, S, S, H, causal=False)
    self_bias = _build_bias(trg_kpm, T, T, H, causal=True)
    cross_bias = _build_bias(jnp.zeros((B, S), jnp.float32), T, S, H, causal=False)

    x2 = x.reshape(B * S, E).astype(jnp.float32)
    y2 = y.reshape(B * T, E).astype(jnp.float32)

    # encoder stack: one launch, weights streamed over the layer grid axis
    enc = encoder_stack(x2, enc_bias, prepped, B=B, S=S, H=H, L=L)

    # bottleneck; (B*S,E)<->(B,S*E) reshapes are free row-major views
    mem2 = bottleneck(enc.reshape(B, S * E), prepped).reshape(B * S, E)

    # decoder stack + fc_out: one launch
    logits_p = decoder_stack(y2, mem2, self_bias, cross_bias, prepped,
                             B=B, T=T, S=S, H=H, L=L)            # (B*T, Vp)

    logits = logits_p.reshape(B, T, -1)[:, :, :V].transpose(1, 0, 2)
    return logits                                                # (T, B, V)


# --------------------------------------------------------------------------
# Deterministic parameter init (PyTorch layout) + one-time kernel prep
# --------------------------------------------------------------------------

def _init_params(key, cfg):
    E = cfg["embed_size"]
    FF = cfg["forward_expansion"] * E
    MID = cfg["mid_embedding_size"]
    ML = cfg["max_length"]

    def nrm(k, shape):
        return 0.02 * jax.random.normal(k, shape, jnp.float32)

    keys = iter(jax.random.split(key, 256))

    def attn_params():
        return {
            "in_proj_w": nrm(next(keys), (3 * E, E)),
            "in_proj_b": jnp.zeros((3 * E,), jnp.float32),
            "out_proj_w": nrm(next(keys), (E, E)),
            "out_proj_b": jnp.zeros((E,), jnp.float32),
        }

    def enc_layer():
        return {
            "self_attn": attn_params(),
            "linear1_w": nrm(next(keys), (FF, E)),
            "linear1_b": jnp.zeros((FF,), jnp.float32),
            "linear2_w": nrm(next(keys), (E, FF)),
            "linear2_b": jnp.zeros((E,), jnp.float32),
            "norm1_w": jnp.ones((E,), jnp.float32),
            "norm1_b": jnp.zeros((E,), jnp.float32),
            "norm2_w": jnp.ones((E,), jnp.float32),
            "norm2_b": jnp.zeros((E,), jnp.float32),
        }

    def dec_layer():
        d = enc_layer()
        d["cross_attn"] = attn_params()
        d["norm3_w"] = jnp.ones((E,), jnp.float32)
        d["norm3_b"] = jnp.zeros((E,), jnp.float32)
        return d

    return {
        "src_word_emb": nrm(next(keys), (cfg["src_vocab_size"], E)),
        "src_pos_emb": nrm(next(keys), (ML, E)),
        "trg_word_emb": nrm(next(keys), (cfg["trg_vocab_size"], E)),
        "trg_pos_emb": nrm(next(keys), (ML, E)),
        "encoder_layers": [enc_layer() for _ in range(cfg["num_layers"])],
        "decoder_layers": [dec_layer() for _ in range(cfg["num_layers"])],
        "ff1_w": nrm(next(keys), (MID, ML * E)),
        "ff1_b": jnp.zeros((MID,), jnp.float32),
        "ff2_w1": nrm(next(keys), (MID, MID)),
        "ff2_b1": jnp.zeros((MID,), jnp.float32),
        "ff2_w2": nrm(next(keys), (ML * E, MID)),
        "ff2_b2": jnp.zeros((ML * E,), jnp.float32),
        "fc_out_w": nrm(next(keys), (cfg["trg_vocab_size"], E)),
        "fc_out_b": jnp.zeros((cfg["trg_vocab_size"],), jnp.float32),
    }


def _prepare_params(params, cfg):
    """One-time conversion (OUTSIDE jit): transpose weights to (K, N), fold the
    1/sqrt(Dh) scale into Q, cast matmul weights to bf16, reshape biases to
    (1, N), stack per-layer weights along a leading L axis for the streamed
    layer grid, and pad fc_out to a lane-dense width (multiple of 128)."""
    E = cfg["embed_size"]
    H = cfg["heads"]
    Dh = E // H
    V = cfg["trg_vocab_size"]
    scale = 1.0 / math.sqrt(Dh)
    bf = jnp.bfloat16

    def enc_layer(lp):
        a = lp["self_attn"]
        w = a["in_proj_w"].at[:E].multiply(scale)       # q rows scaled
        b = a["in_proj_b"].at[:E].multiply(scale)
        return dict(
            wqkv=w.T.astype(bf), bqkv=b.reshape(1, 3 * E),
            wo=a["out_proj_w"].T.astype(bf), bo=a["out_proj_b"].reshape(1, E),
            ln1w=lp["norm1_w"].reshape(1, E), ln1b=lp["norm1_b"].reshape(1, E),
            w1=lp["linear1_w"].T.astype(bf), b1=lp["linear1_b"].reshape(1, -1),
            w2=lp["linear2_w"].T.astype(bf), b2=lp["linear2_b"].reshape(1, -1),
            ln2w=lp["norm2_w"].reshape(1, E), ln2b=lp["norm2_b"].reshape(1, E),
        )

    def dec_layer(lp):
        sa = lp["self_attn"]
        ca = lp["cross_attn"]
        sw = sa["in_proj_w"].at[:E].multiply(scale)
        sb = sa["in_proj_b"].at[:E].multiply(scale)
        cw, cb = ca["in_proj_w"], ca["in_proj_b"]
        return dict(
            sa_wqkv=sw.T.astype(bf), sa_bqkv=sb.reshape(1, 3 * E),
            sa_wo=sa["out_proj_w"].T.astype(bf), sa_bo=sa["out_proj_b"].reshape(1, E),
            ln1w=lp["norm1_w"].reshape(1, E), ln1b=lp["norm1_b"].reshape(1, E),
            ca_wq=(cw[:E].T * scale).astype(bf), ca_bq=(cb[:E] * scale).reshape(1, E),
            ca_wkv=cw[E:].T.astype(bf), ca_bkv=cb[E:].reshape(1, 2 * E),
            ca_wo=ca["out_proj_w"].T.astype(bf), ca_bo=ca["out_proj_b"].reshape(1, E),
            ln2w=lp["norm2_w"].reshape(1, E), ln2b=lp["norm2_b"].reshape(1, E),
            w1=lp["linear1_w"].T.astype(bf), b1=lp["linear1_b"].reshape(1, -1),
            w2=lp["linear2_w"].T.astype(bf), b2=lp["linear2_b"].reshape(1, -1),
            ln3w=lp["norm3_w"].reshape(1, E), ln3b=lp["norm3_b"].reshape(1, E),
        )

    enc_list = [enc_layer(lp) for lp in params["encoder_layers"]]
    dec_list = [dec_layer(lp) for lp in params["decoder_layers"]]
    enc = {k: jnp.stack([d[k] for d in enc_list]) for k in _ENC_LAYER_KEYS}
    dec = {k: jnp.stack([d[k] for d in dec_list]) for k in _DEC_LAYER_KEYS}

    Vp = ((V + 127) // 128) * 128
    fc_w = jnp.zeros((E, Vp), jnp.float32).at[:, :V].set(params["fc_out_w"].T).astype(bf)
    fc_b = jnp.zeros((1, Vp), jnp.float32).at[:, :V].set(params["fc_out_b"][None, :])

    return dict(
        src_word_emb=params["src_word_emb"], src_pos_emb=params["src_pos_emb"],
        trg_word_emb=params["trg_word_emb"], trg_pos_emb=params["trg_pos_emb"],
        enc=enc, dec=dec,
        ff1_w=params["ff1_w"].T.astype(bf), ff1_b=params["ff1_b"].reshape(1, -1),
        ff2_w1=params["ff2_w1"].T.astype(bf), ff2_b1=params["ff2_b1"].reshape(1, -1),
        ff2_w2=params["ff2_w2"].T.astype(bf), ff2_b2=params["ff2_b2"].reshape(1, -1),
        fc_w=fc_w, fc_b=fc_b,
    )


# --------------------------------------------------------------------------
# Main
# --------------------------------------------------------------------------

if __name__ == "__main__":
    cfg = dict(
        src_vocab_size=37,
        trg_vocab_size=41,
        src_pad_idx=0,
        trg_pad_idx=0,
        embed_size=32,
        num_layers=2,
        forward_expansion=4,
        heads=4,
        max_length=8,          # forward() requires src_seq_length == max_length
        mid_embedding_size=64,
    )

    key = jax.random.PRNGKey(0)
    k_params, k_src, k_trg = jax.random.split(key, 3)
    params = _init_params(k_params, cfg)
    prepped = _prepare_params(params, cfg)   # one-time layout prep, outside jit

    S = cfg["max_length"]      # source sequence length
    T = 8                      # target sequence length
    B = 2                      # batch size

    # token ids in [1, vocab); the last position of each sequence is padding.
    src = jax.random.randint(k_src, (S, B), 1, cfg["src_vocab_size"], jnp.int32)
    trg = jax.random.randint(k_trg, (T, B), 1, cfg["trg_vocab_size"], jnp.int32)
    src = src.at[-1, :].set(cfg["src_pad_idx"])
    trg = trg.at[-1, :].set(cfg["trg_pad_idx"])

    fwd = jax.jit(partial(transformer_forward, cfg=cfg))
    out = jax.block_until_ready(fwd(prepped, src, trg))

    assert out.shape == (T, B, cfg["trg_vocab_size"])
    assert bool(jnp.all(jnp.isfinite(out)))
    print("KERNEL_OK")
</pallas_src>

<mosaic_0001>
module attributes {stable_mosaic.version = 11 : i64} {
  func.func @_encoder_stack_kernel(%arg0: i32, %arg1: memref<16x32xf32, #tpu.memory_space<vmem>>, %arg2: memref<2x32x32xf32, #tpu.memory_space<vmem>>, %arg3: memref<1x32x96xbf16, #tpu.memory_space<vmem>>, %arg4: memref<1x1x96xf32, #tpu.memory_space<vmem>>, %arg5: memref<1x32x32xbf16, #tpu.memory_space<vmem>>, %arg6: memref<1x1x32xf32, #tpu.memory_space<vmem>>, %arg7: memref<1x1x32xf32, #tpu.memory_space<vmem>>, %arg8: memref<1x1x32xf32, #tpu.memory_space<vmem>>, %arg9: memref<1x32x128xbf16, #tpu.memory_space<vmem>>, %arg10: memref<1x1x128xf32, #tpu.memory_space<vmem>>, %arg11: memref<1x128x32xbf16, #tpu.memory_space<vmem>>, %arg12: memref<1x1x32xf32, #tpu.memory_space<vmem>>, %arg13: memref<1x1x32xf32, #tpu.memory_space<vmem>>, %arg14: memref<1x1x32xf32, #tpu.memory_space<vmem>>, %arg15: memref<16x32xf32, #tpu.memory_space<vmem>>, %arg16: memref<2x32x8xf32, #tpu.memory_space<vmem>>, %arg17: memref<2x32x8xf32, #tpu.memory_space<vmem>>, %arg18: memref<2x32x8xf32, #tpu.memory_space<vmem>>, %arg19: memref<16x32xf32, #tpu.memory_space<vmem>>) attributes {dimension_semantics = [#tpu.dimension_semantics<arbitrary>], iteration_bounds = array<i64: 2>, scalar_prefetch = 0 : i64, scratch_operands = 4 : i64, tpu.core_type = #tpu.core_type<tc>, window_params = [{pipeline_mode = #tpu.pipeline_mode<synchronous>, transform_indices = @transform_0, window_bounds = array<i64: 16, 32>}, {pipeline_mode = #tpu.pipeline_mode<synchronous>, transform_indices = @transform_1, window_bounds = array<i64: 2, 32, 32>}, {transform_indices = @transform_2, window_bounds = array<i64: 1, 32, 96>}, {transform_indices = @transform_3, window_bounds = array<i64: 1, 1, 96>}, {transform_indices = @transform_4, window_bounds = array<i64: 1, 32, 32>}, {transform_indices = @transform_5, window_bounds = array<i64: 1, 1, 32>}, {transform_indices = @transform_6, window_bounds = array<i64: 1, 1, 32>}, {transform_indices = @transform_7, window_bounds = array<i64: 1, 1, 32>}, {transform_indices = @transform_8, window_bounds = array<i64: 1, 32, 128>}, {transform_indices = @transform_9, window_bounds = array<i64: 1, 1, 128>}, {transform_indices = @transform_10, window_bounds = array<i64: 1, 128, 32>}, {transform_indices = @transform_11, window_bounds = array<i64: 1, 1, 32>}, {transform_indices = @transform_12, window_bounds = array<i64: 1, 1, 32>}, {transform_indices = @transform_13, window_bounds = array<i64: 1, 1, 32>}, {pipeline_mode = #tpu.pipeline_mode<synchronous>, transform_indices = @transform_14, window_bounds = array<i64: 16, 32>}]} {
    %c0_i32 = arith.constant 0 : i32
    %0 = arith.cmpi eq, %arg0, %c0_i32 : i32
    %1 = arith.extui %0 : i1 to i32
    %c0_i32_0 = arith.constant 0 : i32
    %2 = arith.cmpi ne, %1, %c0_i32_0 : i32
    scf.if %2 {
      %c0_113 = arith.constant 0 : index
      %c0_114 = arith.constant 0 : index
      %166 = vector.load %arg1[%c0_113, %c0_114] : memref<16x32xf32, #tpu.memory_space<vmem>>, vector<16x32xf32>
      %c0_115 = arith.constant 0 : index
      %c0_116 = arith.constant 0 : index
      %167 = vector.load %arg15[%c0_115, %c0_116] : memref<16x32xf32, #tpu.memory_space<vmem>>, vector<16x32xf32>
      tpu.vector_store %arg15[%c0_115, %c0_116], %166 {strides = array<i32>} : memref<16x32xf32, #tpu.memory_space<vmem>>, vector<16x32xf32>,
    } else {
    }
    %c0 = arith.constant 0 : index
    %c0_1 = arith.constant 0 : index
    %3 = vector.load %arg15[%c0, %c0_1] : memref<16x32xf32, #tpu.memory_space<vmem>>, vector<16x32xf32>
    %4 = arith.truncf %3 : vector<16x32xf32> to vector<16x32xbf16>
    %c0_2 = arith.constant 0 : index
    %c0_3 = arith.constant 0 : index
    %c0_4 = arith.constant 0 : index
    %5 = vector.load %arg3[%c0_2, %c0_3, %c0_4] : memref<1x32x96xbf16, #tpu.memory_space<vmem>>, vector<1x32x96xbf16>
    %6 = vector.shape_cast %5 : vector<1x32x96xbf16> to vector<32x96xbf16>
    %cst = arith.constant dense<0.000000e+00> : vector<16x96xf32>
    %7 = tpu.matmul %4, %6, %cst {dimension_numbers = #tpu.dot_dimension_numbers<[1], [0], [0], [1], [0, 0, 1, 1], [], []>} : vector<16x32xbf16>, vector<32x96xbf16>, vector<16x96xf32> -> vector<16x96xf32>
    %c0_5 = arith.constant 0 : index
    %c0_6 = arith.constant 0 : index
    %c0_7 = arith.constant 0 : index
    %8 = vector.load %arg4[%c0_5, %c0_6, %c0_7] : memref<1x1x96xf32, #tpu.memory_space<vmem>>, vector<1x1x96xf32>
    %9 = vector.shape_cast %8 : vector<1x1x96xf32> to vector<1x96xf32>
    %10 = vector.broadcast %9 : vector<1x96xf32> to vector<16x96xf32>
    %11 = arith.addf %7, %10 : vector<16x96xf32>
    %12 = vector.extract_strided_slice %11 {offsets = [0, 0], sizes = [16, 32], strides = [1, 1]} : vector<16x96xf32> to vector<16x32xf32>
    %13 = vector.extract_strided_slice %11 {offsets = [0, 32], sizes = [16, 32], strides = [1, 1]} : vector<16x96xf32> to vector<16x32xf32>
    %14 = vector.extract_strided_slice %11 {offsets = [0, 64], sizes = [16, 32], strides = [1, 1]} : vector<16x96xf32> to vector<16x32xf32>
    %c0_8 = arith.constant 0 : index
    %c0_9 = arith.constant 0 : index
    %c0_10 = arith.constant 0 : index
    %15 = vector.load %arg2[%c0_8, %c0_9, %c0_10] : memref<2x32x32xf32, #tpu.memory_space<vmem>>, vector<2x32x32xf32>
    %c0_11 = arith.constant 0 : index
    %c0_12 = arith.constant 0 : index
    %c0_13 = arith.constant 0 : index
    %16 = vector.load %arg5[%c0_11, %c0_12, %c0_13] : memref<1x32x32xbf16, #tpu.memory_space<vmem>>, vector<1x32x32xbf16>
    %17 = vector.shape_cast %16 : vector<1x32x32xbf16> to vector<32x32xbf16>
    %c0_14 = arith.constant 0 : index
    %c0_15 = arith.constant 0 : index
    %c0_16 = arith.constant 0 : index
    %18 = vector.load %arg6[%c0_14, %c0_15, %c0_16] : memref<1x1x32xf32, #tpu.memory_space<vmem>>, vector<1x1x32xf32>
    %19 = vector.shape_cast %18 : vector<1x1x32xf32> to vector<1x32xf32>
    %20 = vector.extract_strided_slice %12 {offsets = [0, 0], sizes = [16, 8], strides = [1, 1]} : vector<16x32xf32> to vector<16x8xf32>
    %21 = vector.shape_cast %20 : vector<16x8xf32> to vector<2x8x8xf32>
    %c0_17 = arith.constant 0 : index
    %c0_18 = arith.constant 0 : index
    %c0_19 = arith.constant 0 : index
    %22 = vector.load %arg16[%c0_17, %c0_18, %c0_19] : memref<2x32x8xf32, #tpu.memory_space<vmem>>, vector<2x8x8xf32>
    tpu.vector_store %arg16[%c0_17, %c0_18, %c0_19], %21 {strides = array<i32>} : memref<2x32x8xf32, #tpu.memory_space<vmem>>, vector<2x8x8xf32>,
    %23 = vector.extract_strided_slice %13 {offsets = [0, 0], sizes = [16, 8], strides = [1, 1]} : vector<16x32xf32> to vector<16x8xf32>
    %24 = vector.shape_cast %23 : vector<16x8xf32> to vector<2x8x8xf32>
    %c0_20 = arith.constant 0 : index
    %c0_21 = arith.constant 0 : index
    %c0_22 = arith.constant 0 : index
    %25 = vector.load %arg17[%c0_20, %c0_21, %c0_22] : memref<2x32x8xf32, #tpu.memory_space<vmem>>, vector<2x8x8xf32>
    tpu.vector_store %arg17[%c0_20, %c0_21, %c0_22], %24 {strides = array<i32>} : memref<2x32x8xf32, #tpu.memory_space<vmem>>, vector<2x8x8xf32>,
    %26 = vector.extract_strided_slice %14 {offsets = [0, 0], sizes = [16, 8], strides = [1, 1]} : vector<16x32xf32> to vector<16x8xf32>
    %27 = vector.shape_cast %26 : vector<16x8xf32> to vector<2x8x8xf32>
    %c0_23 = arith.constant 0 : index
    %c0_24 = arith.constant 0 : index
    %c0_25 = arith.constant 0 : index
    %28 = vector.load %arg18[%c0_23, %c0_24, %c0_25] : memref<2x32x8xf32, #tpu.memory_space<vmem>>, vector<2x8x8xf32>
    tpu.vector_store %arg18[%c0_23, %c0_24, %c0_25], %27 {strides = array<i32>} : memref<2x32x8xf32, #tpu.memory_space<vmem>>, vector<2x8x8xf32>,
    %29 = vector.extract_strided_slice %12 {offsets = [0, 8], sizes = [16, 8], strides = [1, 1]} : vector<16x32xf32> to vector<16x8xf32>
    %30 = vector.shape_cast %29 : vector<16x8xf32> to vector<2x8x8xf32>
    %c0_26 = arith.constant 0 : index
    %c8 = arith.constant 8 : index
    %c0_27 = arith.constant 0 : index
    %31 = vector.load %arg16[%c0_26, %c8, %c0_27] : memref<2x32x8xf32, #tpu.memory_space<vmem>>, vector<2x8x8xf32>
    tpu.vector_store %arg16[%c0_26, %c8, %c0_27], %30 {strides = array<i32>} : memref<2x32x8xf32, #tpu.memory_space<vmem>>, vector<2x8x8xf32>,
    %32 = vector.extract_strided_slice %13 {offsets = [0, 8], sizes = [16, 8], strides = [1, 1]} : vector<16x32xf32> to vector<16x8xf32>
    %33 = vector.shape_cast %32 : vector<16x8xf32> to vector<2x8x8xf32>
    %c0_28 = arith.constant 0 : index
    %c8_29 = arith.constant 8 : index
    %c0_30 = arith.constant 0 : index
    %34 = vector.load %arg17[%c0_28, %c8_29, %c0_30] : memref<2x32x8xf32, #tpu.memory_space<vmem>>, vector<2x8x8xf32>
    tpu.vector_store %arg17[%c0_28, %c8_29, %c0_30], %33 {strides = array<i32>} : memref<2x32x8xf32, #tpu.memory_space<vmem>>, vector<2x8x8xf32>,
    %35 = vector.extract_strided_slice %14 {offsets = [0, 8], sizes = [16, 8], strides = [1, 1]} : vector<16x32xf32> to vector<16x8xf32>
    %36 = vector.shape_cast %35 : vector<16x8xf32> to vector<2x8x8xf32>
    %c0_31 = arith.constant 0 : index
    %c8_32 = arith.constant 8 : index
    %c0_33 = arith.constant 0 : index
    %37 = vector.load %arg18[%c0_31, %c8_32, %c0_33] : memref<2x32x8xf32, #tpu.memory_space<vmem>>, vector<2x8x8xf32>
    tpu.vector_store %arg18[%c0_31, %c8_32, %c0_33], %36 {strides = array<i32>} : memref<2x32x8xf32, #tpu.memory_space<vmem>>, vector<2x8x8xf32>,
    %38 = vector.extract_strided_slice %12 {offsets = [0, 16], sizes = [16, 8], strides = [1, 1]} : vector<16x32xf32> to vector<16x8xf32>
    %39 = vector.shape_cast %38 : vector<16x8xf32> to vector<2x8x8xf32>
    %c0_34 = arith.constant 0 : index
    %c16 = arith.constant 16 : index
    %c0_35 = arith.constant 0 : index
    %40 = vector.load %arg16[%c0_34, %c16, %c0_35] : memref<2x32x8xf32, #tpu.memory_space<vmem>>, vector<2x8x8xf32>
    tpu.vector_store %arg16[%c0_34, %c16, %c0_35], %39 {strides = array<i32>} : memref<2x32x8xf32, #tpu.memory_space<vmem>>, vector<2x8x8xf32>,
    %41 = vector.extract_strided_slice %13 {offsets = [0, 16], sizes = [16, 8], strides = [1, 1]} : vector<16x32xf32> to vector<16x8xf32>
    %42 = vector.shape_cast %41 : vector<16x8xf32> to vector<2x8x8xf32>
    %c0_36 = arith.constant 0 : index
    %c16_37 = arith.constant 16 : index
    %c0_38 = arith.constant 0 : index
    %43 = vector.load %arg17[%c0_36, %c16_37, %c0_38] : memref<2x32x8xf32, #tpu.memory_space<vmem>>, vector<2x8x8xf32>
    tpu.vector_store %arg17[%c0_36, %c16_37, %c0_38], %42 {strides = array<i32>} : memref<2x32x8xf32, #tpu.memory_space<vmem>>, vector<2x8x8xf32>,
    %44 = vector.extract_strided_slice %14 {offsets = [0, 16], sizes = [16, 8], strides = [1, 1]} : vector<16x32xf32> to vector<16x8xf32>
    %45 = vector.shape_cast %44 : vector<16x8xf32> to vector<2x8x8xf32>
    %c0_39 = arith.constant 0 : index
    %c16_40 = arith.constant 16 : index
    %c0_41 = arith.constant 0 : index
    %46 = vector.load %arg18[%c0_39, %c16_40, %c0_41] : memref<2x32x8xf32, #tpu.memory_space<vmem>>, vector<2x8x8xf32>
    tpu.vector_store %arg18[%c0_39, %c16_40, %c0_41], %45 {strides = array<i32>} : memref<2x32x8xf32, #tpu.memory_space<vmem>>, vector<2x8x8xf32>,
    %47 = vector.extract_strided_slice %12 {offsets = [0, 24], sizes = [16, 8], strides = [1, 1]} : vector<16x32xf32> to vector<16x8xf32>
    %48 = vector.shape_cast %47 : vector<16x8xf32> to vector<2x8x8xf32>
    %c0_42 = arith.constant 0 : index
    %c24 = arith.constant 24 : index
    %c0_43 = arith.constant 0 : index
    %49 = vector.load %arg16[%c0_42, %c24, %c0_43] : memref<2x32x8xf32, #tpu.memory_space<vmem>>, vector<2x8x8xf32>
    tpu.vector_store %arg16[%c0_42, %c24, %c0_43], %48 {strides = array<i32>} : memref<2x32x8xf32, #tpu.memory_space<vmem>>, vector<2x8x8xf32>,
    %50 = vector.extract_strided_slice %13 {offsets = [0, 24], sizes = [16, 8], strides = [1, 1]} : vector<16x32xf32> to vector<16x8xf32>
    %51 = vector.shape_cast %50 : vector<16x8xf32> to vector<2x8x8xf32>
    %c0_44 = arith.constant 0 : index
    %c24_45 = arith.constant 24 : index
    %c0_46 = arith.constant 0 : index
    %52 = vector.load %arg17[%c0_44, %c24_45, %c0_46] : memref<2x32x8xf32, #tpu.memory_space<vmem>>, vector<2x8x8xf32>
    tpu.vector_store %arg17[%c0_44, %c24_45, %c0_46], %51 {strides = array<i32>} : memref<2x32x8xf32, #tpu.memory_space<vmem>>, vector<2x8x8xf32>,
    %53 = vector.extract_strided_slice %14 {offsets = [0, 24], sizes = [16, 8], strides = [1, 1]} : vector<16x32xf32> to vector<16x8xf32>
    %54 = vector.shape_cast %53 : vector<16x8xf32> to vector<2x8x8xf32>
    %c0_47 = arith.constant 0 : index
    %c24_48 = arith.constant 24 : index
    %c0_49 = arith.constant 0 : index
    %55 = vector.load %arg18[%c0_47, %c24_48, %c0_49] : memref<2x32x8xf32, #tpu.memory_space<vmem>>, vector<2x8x8xf32>
    tpu.vector_store %arg18[%c0_47, %c24_48, %c0_49], %54 {strides = array<i32>} : memref<2x32x8xf32, #tpu.memory_space<vmem>>, vector<2x8x8xf32>,
    %c0_50 = arith.constant 0 : index
    %c0_51 = arith.constant 0 : index
    %c0_52 = arith.constant 0 : index
    %56 = vector.load %arg16[%c0_50, %c0_51, %c0_52] : memref<2x32x8xf32, #tpu.memory_space<vmem>>, vector<2x32x8xf32>
    %57 = arith.truncf %56 : vector<2x32x8xf32> to vector<2x32x8xbf16>
    %c0_53 = arith.constant 0 : index
    %c0_54 = arith.constant 0 : index
    %c0_55 = arith.constant 0 : index
    %58 = vector.load %arg17[%c0_53, %c0_54, %c0_55] : memref<2x32x8xf32, #tpu.memory_space<vmem>>, vector<2x32x8xf32>
    %59 = arith.truncf %58 : vector<2x32x8xf32> to vector<2x32x8xbf16>
    %c0_56 = arith.constant 0 : index
    %c0_57 = arith.constant 0 : index
    %c0_58 = arith.constant 0 : index
    %60 = vector.load %arg18[%c0_56, %c0_57, %c0_58] : memref<2x32x8xf32, #tpu.memory_space<vmem>>, vector<2x32x8xf32>
    %61 = arith.truncf %60 : vector<2x32x8xf32> to vector<2x32x8xbf16>
    "tpu.trace_start"() <{level = 10 : i32, message = "bqd,bkd->bqk"}> : () -> ()
    %cst_59 = arith.constant dense<0.000000e+00> : vector<2x32x32xf32>
    %62 = tpu.matmul %57, %59, %cst_59 {dimension_numbers = #tpu.dot_dimension_numbers<[2], [2], [1], [1], [0, 0, 0, 1, 1, 1], [0], [0]>} : vector<2x32x8xbf16>, vector<2x32x8xbf16>, vector<2x32x32xf32> -> vector<2x32x32xf32>
    "tpu.trace_stop"() : () -> ()
    %63 = arith.addf %62, %15 : vector<2x32x32xf32>
    %cst_60 = arith.constant dense<0xFF800000> : vector<2x32xf32>
    %64 = vector.multi_reduction <maximumf>, %63, %cst_60 [2] : vector<2x32x32xf32> to vector<2x32xf32>
    %65 = vector.shape_cast %64 : vector<2x32xf32> to vector<2x32x1xf32>
    %66 = vector.broadcast %65 : vector<2x32x1xf32> to vector<2x32x32xf32>
    %67 = arith.subf %63, %66 : vector<2x32x32xf32>
    %68 = math.exp %67 : vector<2x32x32xf32>
    %cst_61 = arith.constant dense<0.000000e+00> : vector<2x32xf32>
    %69 = vector.multi_reduction <add>, %68, %cst_61 [2] : vector<2x32x32xf32> to vector<2x32xf32>
    %70 = vector.shape_cast %69 : vector<2x32xf32> to vector<2x32x1xf32>
    %71 = tpu.reciprocal %70 {approx = true} : vector<2x32x1xf32> -> vector<2x32x1xf32>
    %72 = vector.broadcast %71 : vector<2x32x1xf32> to vector<2x32x32xf32>
    %73 = arith.mulf %68, %72 : vector<2x32x32xf32>
    %74 = arith.truncf %73 : vector<2x32x32xf32> to vector<2x32x32xbf16>
    "tpu.trace_start"() <{level = 10 : i32, message = "bqk,bkd->bqd"}> : () -> ()
    %cst_62 = arith.constant dense<0.000000e+00> : vector<2x32x8xf32>
    %75 = tpu.matmul %74, %61, %cst_62 {dimension_numbers = #tpu.dot_dimension_numbers<[2], [1], [1], [2], [0, 0, 0, 1, 1, 2], [0], [0]>} : vector<2x32x32xbf16>, vector<2x32x8xbf16>, vector<2x32x8xf32> -> vector<2x32x8xf32>
    "tpu.trace_stop"() : () -> ()
    %76 = vector.extract_strided_slice %75 {offsets = [0, 0, 0], sizes = [2, 8, 8], strides = [1, 1, 1]} : vector<2x32x8xf32> to vector<2x8x8xf32>
    %77 = vector.shape_cast %76 : vector<2x8x8xf32> to vector<16x8xf32>
    %c0_63 = arith.constant 0 : index
    %c0_64 = arith.constant 0 : index
    %78 = vector.load %arg19[%c0_63, %c0_64] : memref<16x32xf32, #tpu.memory_space<vmem>>, vector<16x8xf32>
    tpu.vector_store %arg19[%c0_63, %c0_64], %77 {strides = array<i32>} : memref<16x32xf32, #tpu.memory_space<vmem>>, vector<16x8xf32>,
    %79 = vector.extract_strided_slice %75 {offsets = [0, 8, 0], sizes = [2, 8, 8], strides = [1, 1, 1]} : vector<2x32x8xf32> to vector<2x8x8xf32>
    %80 = vector.shape_cast %79 : vector<2x8x8xf32> to vector<16x8xf32>
    %c0_65 = arith.constant 0 : index
    %c8_66 = arith.constant 8 : index
    %81 = vector.load %arg19[%c0_65, %c8_66] : memref<16x32xf32, #tpu.memory_space<vmem>>, vector<16x8xf32>
    tpu.vector_store %arg19[%c0_65, %c8_66], %80 {strides = array<i32>} : memref<16x32xf32, #tpu.memory_space<vmem>>, vector<16x8xf32>,
    %82 = vector.extract_strided_slice %75 {offsets = [0, 16, 0], sizes = [2, 8, 8], strides = [1, 1, 1]} : vector<2x32x8xf32> to vector<2x8x8xf32>
    %83 = vector.shape_cast %82 : vector<2x8x8xf32> to vector<16x8xf32>
    %c0_67 = arith.constant 0 : index
    %c16_68 = arith.constant 16 : index
    %84 = vector.load %arg19[%c0_67, %c16_68] : memref<16x32xf32, #tpu.memory_space<vmem>>, vector<16x8xf32>
    tpu.vector_store %arg19[%c0_67, %c16_68], %83 {strides = array<i32>} : memref<16x32xf32, #tpu.memory_space<vmem>>, vector<16x8xf32>,
    %85 = vector.extract_strided_slice %75 {offsets = [0, 24, 0], sizes = [2, 8, 8], strides = [1, 1, 1]} : vector<2x32x8xf32> to vector<2x8x8xf32>
    %86 = vector.shape_cast %85 : vector<2x8x8xf32> to vector<16x8xf32>
    %c0_69 = arith.constant 0 : index
    %c24_70 = arith.constant 24 : index
    %87 = vector.load %arg19[%c0_69, %c24_70] : memref<16x32xf32, #tpu.memory_space<vmem>>, vector<16x8xf32>
    tpu.vector_store %arg19[%c0_69, %c24_70], %86 {strides = array<i32>} : memref<16x32xf32, #tpu.memory_space<vmem>>, vector<16x8xf32>,
    %c0_71 = arith.constant 0 : index
    %c0_72 = arith.constant 0 : index
    %88 = vector.load %arg19[%c0_71, %c0_72] : memref<16x32xf32, #tpu.memory_space<vmem>>, vector<16x32xf32>
    %89 = arith.truncf %88 : vector<16x32xf32> to vector<16x32xbf16>
    %cst_73 = arith.constant dense<0.000000e+00> : vector<16x32xf32>
    %90 = tpu.matmul %89, %17, %cst_73 {dimension_numbers = #tpu.dot_dimension_numbers<[1], [0], [0], [1], [0, 0, 1, 1], [], []>} : vector<16x32xbf16>, vector<32x32xbf16>, vector<16x32xf32> -> vector<16x32xf32>
    %91 = vector.broadcast %19 : vector<1x32xf32> to vector<16x32xf32>
    %92 = arith.addf %90, %91 : vector<16x32xf32>
    %93 = arith.addf %3, %92 : vector<16x32xf32>
    %c0_74 = arith.constant 0 : index
    %c0_75 = arith.constant 0 : index
    %c0_76 = arith.constant 0 : index
    %94 = vector.load %arg7[%c0_74, %c0_75, %c0_76] : memref<1x1x32xf32, #tpu.memory_space<vmem>>, vector<1x1x32xf32>
    %95 = vector.shape_cast %94 : vector<1x1x32xf32> to vector<1x32xf32>
    %c0_77 = arith.constant 0 : index
    %c0_78 = arith.constant 0 : index
    %c0_79 = arith.constant 0 : index
    %96 = vector.load %arg8[%c0_77, %c0_78, %c0_79] : memref<1x1x32xf32, #tpu.memory_space<vmem>>, vector<1x1x32xf32>
    %97 = vector.shape_cast %96 : vector<1x1x32xf32> to vector<1x32xf32>
    %cst_80 = arith.constant dense<0.000000e+00> : vector<16xf32>
    %98 = vector.multi_reduction <add>, %93, %cst_80 [1] : vector<16x32xf32> to vector<16xf32>
    %99 = vector.shape_cast %98 : vector<16xf32> to vector<16x1xf32>
    %cst_81 = arith.constant 3.200000e+01 : f32
    %100 = vector.broadcast %cst_81 : f32 to vector<16x1xf32>
    %101 = arith.divf %99, %100 : vector<16x1xf32>
    %102 = vector.broadcast %101 : vector<16x1xf32> to vector<16x32xf32>
    %103 = arith.subf %93, %102 : vector<16x32xf32>
    %104 = arith.mulf %103, %103 : vector<16x32xf32>
    %cst_82 = arith.constant dense<0.000000e+00> : vector<16xf32>
    %105 = vector.multi_reduction <add>, %104, %cst_82 [1] : vector<16x32xf32> to vector<16xf32>
    %106 = vector.shape_cast %105 : vector<16xf32> to vector<16x1xf32>
    %cst_83 = arith.constant 3.200000e+01 : f32
    %107 = vector.broadcast %cst_83 : f32 to vector<16x1xf32>
    %108 = arith.divf %106, %107 : vector<16x1xf32>
    %109 = vector.broadcast %101 : vector<16x1xf32> to vector<16x32xf32>
    %110 = arith.subf %93, %109 : vector<16x32xf32>
    %cst_84 = arith.constant 9.99999974E-6 : f32
    %111 = vector.broadcast %cst_84 : f32 to vector<16x1xf32>
    %112 = arith.addf %108, %111 : vector<16x1xf32>
    %113 = math.rsqrt %112 : vector<16x1xf32>
    %114 = vector.broadcast %113 : vector<16x1xf32> to vector<16x32xf32>
    %115 = arith.mulf %110, %114 : vector<16x32xf32>
    %116 = vector.broadcast %95 : vector<1x32xf32> to vector<16x32xf32>
    %117 = arith.mulf %115, %116 : vector<16x32xf32>
    %118 = vector.broadcast %97 : vector<1x32xf32> to vector<16x32xf32>
    %119 = arith.addf %117, %118 : vector<16x32xf32>
    %120 = arith.truncf %119 : vector<16x32xf32> to vector<16x32xbf16>
    %c0_85 = arith.constant 0 : index
    %c0_86 = arith.constant 0 : index
    %c0_87 = arith.constant 0 : index
    %121 = vector.load %arg9[%c0_85, %c0_86, %c0_87] : memref<1x32x128xbf16, #tpu.memory_space<vmem>>, vector<1x32x128xbf16>
    %122 = vector.shape_cast %121 : vector<1x32x128xbf16> to vector<32x128xbf16>
    %cst_88 = arith.constant dense<0.000000e+00> : vector<16x128xf32>
    %123 = tpu.matmul %120, %122, %cst_88 {dimension_numbers = #tpu.dot_dimension_numbers<[1], [0], [0], [1], [0, 0, 1, 1], [], []>} : vector<16x32xbf16>, vector<32x128xbf16>, vector<16x128xf32> -> vector<16x128xf32>
    %c0_89 = arith.constant 0 : index
    %c0_90 = arith.constant 0 : index
    %c0_91 = arith.constant 0 : index
    %124 = vector.load %arg10[%c0_89, %c0_90, %c0_91] : memref<1x1x128xf32, #tpu.memory_space<vmem>>, vector<1x1x128xf32>
    %125 = vector.shape_cast %124 : vector<1x1x128xf32> to vector<1x128xf32>
    %126 = vector.broadcast %125 : vector<1x128xf32> to vector<16x128xf32>
    %127 = arith.addf %123, %126 : vector<16x128xf32>
    %cst_92 = arith.constant 0.000000e+00 : f32
    %128 = vector.broadcast %cst_92 : f32 to vector<16x128xf32>
    %129 = arith.maximumf %127, %128 : vector<16x128xf32>
    %130 = arith.truncf %129 : vector<16x128xf32> to vector<16x128xbf16>
    %c0_93 = arith.constant 0 : index
    %c0_94 = arith.constant 0 : index
    %c0_95 = arith.constant 0 : index
    %131 = vector.load %arg11[%c0_93, %c0_94, %c0_95] : memref<1x128x32xbf16, #tpu.memory_space<vmem>>, vector<1x128x32xbf16>
    %132 = vector.shape_cast %131 : vector<1x128x32xbf16> to vector<128x32xbf16>
    %cst_96 = arith.constant dense<0.000000e+00> : vector<16x32xf32>
    %133 = tpu.matmul %130, %132, %cst_96 {dimension_numbers = #tpu.dot_dimension_numbers<[1], [0], [0], [1], [0, 0, 1, 1], [], []>} : vector<16x128xbf16>, vector<128x32xbf16>, vector<16x32xf32> -> vector<16x32xf32>
    %c0_97 = arith.constant 0 : index
    %c0_98 = arith.constant 0 : index
    %c0_99 = arith.constant 0 : index
    %134 = vector.load %arg12[%c0_97, %c0_98, %c0_99] : memref<1x1x32xf32, #tpu.memory_space<vmem>>, vector<1x1x32xf32>
    %135 = vector.shape_cast %134 : vector<1x1x32xf32> to vector<1x32xf32>
    %136 = vector.broadcast %135 : vector<1x32xf32> to vector<16x32xf32>
    %137 = arith.addf %133, %136 : vector<16x32xf32>
    %138 = arith.addf %119, %137 : vector<16x32xf32>
    %c0_100 = arith.constant 0 : index
    %c0_101 = arith.constant 0 : index
    %c0_102 = arith.constant 0 : index
    %139 = vector.load %arg13[%c0_100, %c0_101, %c0_102] : memref<1x1x32xf32, #tpu.memory_space<vmem>>, vector<1x1x32xf32>
    %140 = vector.shape_cast %139 : vector<1x1x32xf32> to vector<1x32xf32>
    %c0_103 = arith.constant 0 : index
    %c0_104 = arith.constant 0 : index
    %c0_105 = arith.constant 0 : index
    %141 = vector.load %arg14[%c0_103, %c0_104, %c0_105] : memref<1x1x32xf32, #tpu.memory_space<vmem>>, vector<1x1x32xf32>
    %142 = vector.shape_cast %141 : vector<1x1x32xf32> to vector<1x32xf32>
    %cst_106 = arith.constant dense<0.000000e+00> : vector<16xf32>
    %143 = vector.multi_reduction <add>, %138, %cst_106 [1] : vector<16x32xf32> to vector<16xf32>
    %144 = vector.shape_cast %143 : vector<16xf32> to vector<16x1xf32>
    %cst_107 = arith.constant 3.200000e+01 : f32
    %145 = vector.broadcast %cst_107 : f32 to vector<16x1xf32>
    %146 = arith.divf %144, %145 : vector<16x1xf32>
    %147 = vector.broadcast %146 : vector<16x1xf32> to vector<16x32xf32>
    %148 = arith.subf %138, %147 : vector<16x32xf32>
    %149 = arith.mulf %148, %148 : vector<16x32xf32>
    %cst_108 = arith.constant dense<0.000000e+00> : vector<16xf32>
    %150 = vector.multi_reduction <add>, %149, %cst_108 [1] : vector<16x32xf32> to vector<16xf32>
    %151 = vector.shape_cast %150 : vector<16xf32> to vector<16x1xf32>
    %cst_109 = arith.constant 3.200000e+01 : f32
    %152 = vector.broadcast %cst_109 : f32 to vector<16x1xf32>
    %153 = arith.divf %151, %152 : vector<16x1xf32>
    %154 = vector.broadcast %146 : vector<16x1xf32> to vector<16x32xf32>
    %155 = arith.subf %138, %154 : vector<16x32xf32>
    %cst_110 = arith.constant 9.99999974E-6 : f32
    %156 = vector.broadcast %cst_110 : f32 to vector<16x1xf32>
    %157 = arith.addf %153, %156 : vector<16x1xf32>
    %158 = math.rsqrt %157 : vector<16x1xf32>
    %159 = vector.broadcast %158 : vector<16x1xf32> to vector<16x32xf32>
    %160 = arith.mulf %155, %159 : vector<16x32xf32>
    %161 = vector.broadcast %140 : vector<1x32xf32> to vector<16x32xf32>
    %162 = arith.mulf %160, %161 : vector<16x32xf32>
    %163 = vector.broadcast %142 : vector<1x32xf32> to vector<16x32xf32>
    %164 = arith.addf %162, %163 : vector<16x32xf32>
    %c0_111 = arith.constant 0 : index
    %c0_112 = arith.constant 0 : index
    %165 = vector.load %arg15[%c0_111, %c0_112] : memref<16x32xf32, #tpu.memory_space<vmem>>, vector<16x32xf32>
    tpu.vector_store %arg15[%c0_111, %c0_112], %164 {strides = array<i32>} : memref<16x32xf32, #tpu.memory_space<vmem>>, vector<16x32xf32>,
    return
  }
  func.func @transform_0(%arg0: i32) -> (i32, i32) {
    %c0_i32 = arith.constant 0 : i32
    %c0_i32_0 = arith.constant 0 : i32
    %c0_i32_1 = arith.constant 0 : i32
    return %c0_i32, %c0_i32_0 : i32, i32
  }
  func.func @transform_1(%arg0: i32) -> (i32, i32, i32) {
    %c0_i32 = arith.constant 0 : i32
    %c0_i32_0 = arith.constant 0 : i32
    %c0_i32_1 = arith.constant 0 : i32
    %c0_i32_2 = arith.constant 0 : i32
    return %c0_i32, %c0_i32_0, %c0_i32_1 : i32, i32, i32
  }
  func.func @transform_2(%arg0: i32) -> (i32, i32, i32) {
    %c0_i32 = arith.constant 0 : i32
    %c0_i32_0 = arith.constant 0 : i32
    %c0_i32_1 = arith.constant 0 : i32
    return %arg0, %c0_i32, %c0_i32_0 : i32, i32, i32
  }
  func.func @transform_3(%arg0: i32) -> (i32, i32, i32) {
    %c0_i32 = arith.constant 0 : i32
    %c0_i32_0 = arith.constant 0 : i32
    %c0_i32_1 = arith.constant 0 : i32
    return %arg0, %c0_i32, %c0_i32_0 : i32, i32, i32
  }
  func.func @transform_4(%arg0: i32) -> (i32, i32, i32) {
    %c0_i32 = arith.constant 0 : i32
    %c0_i32_0 = arith.constant 0 : i32
    %c0_i32_1 = arith.constant 0 : i32
    return %arg0, %c0_i32, %c0_i32_0 : i32, i32, i32
  }
  func.func @transform_5(%arg0: i32) -> (i32, i32, i32) {
    %c0_i32 = arith.constant 0 : i32
    %c0_i32_0 = arith.constant 0 : i32
    %c0_i32_1 = arith.constant 0 : i32
    return %arg0, %c0_i32, %c0_i32_0 : i32, i32, i32
  }
  func.func @transform_6(%arg0: i32) -> (i32, i32, i32) {
    %c0_i32 = arith.constant 0 : i32
    %c0_i32_0 = arith.constant 0 : i32
    %c0_i32_1 = arith.constant 0 : i32
    return %arg0, %c0_i32, %c0_i32_0 : i32, i32, i32
  }
  func.func @transform_7(%arg0: i32) -> (i32, i32, i32) {
    %c0_i32 = arith.constant 0 : i32
    %c0_i32_0 = arith.constant 0 : i32
    %c0_i32_1 = arith.constant 0 : i32
    return %arg0, %c0_i32, %c0_i32_0 : i32, i32, i32
  }
  func.func @transform_8(%arg0: i32) -> (i32, i32, i32) {
    %c0_i32 = arith.constant 0 : i32
    %c0_i32_0 = arith.constant 0 : i32
    %c0_i32_1 = arith.constant 0 : i32
    return %arg0, %c0_i32, %c0_i32_0 : i32, i32, i32
  }
  func.func @transform_9(%arg0: i32) -> (i32, i32, i32) {
    %c0_i32 = arith.constant 0 : i32
    %c0_i32_0 = arith.constant 0 : i32
    %c0_i32_1 = arith.constant 0 : i32
    return %arg0, %c0_i32, %c0_i32_0 : i32, i32, i32
  }
  func.func @transform_10(%arg0: i32) -> (i32, i32, i32) {
    %c0_i32 = arith.constant 0 : i32
    %c0_i32_0 = arith.constant 0 : i32
    %c0_i32_1 = arith.constant 0 : i32
    return %arg0, %c0_i32, %c0_i32_0 : i32, i32, i32
  }
  func.func @transform_11(%arg0: i32) -> (i32, i32, i32) {
    %c0_i32 = arith.constant 0 : i32
    %c0_i32_0 = arith.constant 0 : i32
    %c0_i32_1 = arith.constant 0 : i32
    return %arg0, %c0_i32, %c0_i32_0 : i32, i32, i32
  }
  func.func @transform_12(%arg0: i32) -> (i32, i32, i32) {
    %c0_i32 = arith.constant 0 : i32
    %c0_i32_0 = arith.constant 0 : i32
    %c0_i32_1 = arith.constant 0 : i32
    return %arg0, %c0_i32, %c0_i32_0 : i32, i32, i32
  }
  func.func @transform_13(%arg0: i32) -> (i32, i32, i32) {
    %c0_i32 = arith.constant 0 : i32
    %c0_i32_0 = arith.constant 0 : i32
    %c0_i32_1 = arith.constant 0 : i32
    return %arg0, %c0_i32, %c0_i32_0 : i32, i32, i32
  }
  func.func @transform_14(%arg0: i32) -> (i32, i32) {
    %c0_i32 = arith.constant 0 : i32
    %c0_i32_0 = arith.constant 0 : i32
    %c0_i32_1 = arith.constant 0 : i32
    return %c0_i32, %c0_i32_0 : i32, i32
  }
}

module attributes {stable_mosaic.version = 11 : i64} {
  func.func @_bottleneck_kernel(%arg0: memref<2x256xf32, #tpu.memory_space<vmem>>, %arg1: memref<256x64xbf16, #tpu.memory_space<vmem>>, %arg2: memref<1x64xf32, #tpu.memory_space<vmem>>, %arg3: memref<64x64xbf16, #tpu.memory_space<vmem>>, %arg4: memref<1x64xf32, #tpu.memory_space<vmem>>, %arg5: memref<64x256xbf16, #tpu.memory_space<vmem>>, %arg6: memref<1x256xf32, #tpu.memory_space<vmem>>, %arg7: memref<2x256xf32, #tpu.memory_space<vmem>>) attributes {dimension_semantics = [], scalar_prefetch = 0 : i64, scratch_operands = 0 : i64, tpu.core_type = #tpu.core_type<tc>} {
    %c0 = arith.constant 0 : index
    %c0_0 = arith.constant 0 : index
    %0 = vector.load %arg0[%c0, %c0_0] : memref<2x256xf32, #tpu.memory_space<vmem>>, vector<2x256xf32>
    %1 = arith.truncf %0 : vector<2x256xf32> to vector<2x256xbf16>
    %c0_1 = arith.constant 0 : index
    %c0_2 = arith.constant 0 : index
    %2 = vector.load %arg1[%c0_1, %c0_2] : memref<256x64xbf16, #tpu.memory_space<vmem>>, vector<256x64xbf16>
    %cst = arith.constant dense<0.000000e+00> : vector<2x64xf32>
    %3 = tpu.matmul %1, %2, %cst {dimension_numbers = #tpu.dot_dimension_numbers<[1], [0], [0], [1], [0, 0, 1, 1], [], []>} : vector<2x256xbf16>, vector<256x64xbf16>, vector<2x64xf32> -> vector<2x64xf32>
    %c0_3 = arith.constant 0 : index
    %c0_4 = arith.constant 0 : index
    %4 = vector.load %arg2[%c0_3, %c0_4] : memref<1x64xf32, #tpu.memory_space<vmem>>, vector<1x64xf32>
    %5 = vector.broadcast %4 : vector<1x64xf32> to vector<2x64xf32>
    %6 = arith.addf %3, %5 : vector<2x64xf32>
    %cst_5 = arith.constant 0.000000e+00 : f32
    %7 = vector.broadcast %cst_5 : f32 to vector<2x64xf32>
    %8 = arith.maximumf %6, %7 : vector<2x64xf32>
    %9 = arith.truncf %8 : vector<2x64xf32> to vector<2x64xbf16>
    %c0_6 = arith.constant 0 : index
    %c0_7 = arith.constant 0 : index
    %10 = vector.load %arg3[%c0_6, %c0_7] : memref<64x64xbf16, #tpu.memory_space<vmem>>, vector<64x64xbf16>
    %cst_8 = arith.constant dense<0.000000e+00> : vector<2x64xf32>
    %11 = tpu.matmul %9, %10, %cst_8 {dimension_numbers = #tpu.dot_dimension_numbers<[1], [0], [0], [1], [0, 0, 1, 1], [], []>} : vector<2x64xbf16>, vector<64x64xbf16>, vector<2x64xf32> -> vector<2x64xf32>
    %c0_9 = arith.constant 0 : index
    %c0_10 = arith.constant 0 : index
    %12 = vector.load %arg4[%c0_9, %c0_10] : memref<1x64xf32, #tpu.memory_space<vmem>>, vector<1x64xf32>
    %13 = vector.broadcast %12 : vector<1x64xf32> to vector<2x64xf32>
    %14 = arith.addf %11, %13 : vector<2x64xf32>
    %cst_11 = arith.constant 0.000000e+00 : f32
    %15 = vector.broadcast %cst_11 : f32 to vector<2x64xf32>
    %16 = arith.maximumf %14, %15 : vector<2x64xf32>
    %17 = arith.truncf %16 : vector<2x64xf32> to vector<2x64xbf16>
    %c0_12 = arith.constant 0 : index
    %c0_13 = arith.constant 0 : index
    %18 = vector.load %arg5[%c0_12, %c0_13] : memref<64x256xbf16, #tpu.memory_space<vmem>>, vector<64x256xbf16>
    %cst_14 = arith.constant dense<0.000000e+00> : vector<2x256xf32>
    %19 = tpu.matmul %17, %18, %cst_14 {dimension_numbers = #tpu.dot_dimension_numbers<[1], [0], [0], [1], [0, 0, 1, 1], [], []>} : vector<2x64xbf16>, vector<64x256xbf16>, vector<2x256xf32> -> vector<2x256xf32>
    %c0_15 = arith.constant 0 : index
    %c0_16 = arith.constant 0 : index
    %20 = vector.load %arg6[%c0_15, %c0_16] : memref<1x256xf32, #tpu.memory_space<vmem>>, vector<1x256xf32>
    %21 = vector.broadcast %20 : vector<1x256xf32> to vector<2x256xf32>
    %22 = arith.addf %19, %21 : vector<2x256xf32>
    %c0_17 = arith.constant 0 : index
    %c0_18 = arith.constant 0 : index
    %23 = vector.load %arg7[%c0_17, %c0_18] : memref<2x256xf32, #tpu.memory_space<vmem>>, vector<2x256xf32>
    tpu.vector_store %arg7[%c0_17, %c0_18], %22 {strides = array<i32>} : memref<2x256xf32, #tpu.memory_space<vmem>>, vector<2x256xf32>,
    return
  }
}

module attributes {stable_mosaic.version = 11 : i64} {
  func.func @_decoder_stack_kernel(%arg0: i32, %arg1: memref<16x32xf32, #tpu.memory_space<vmem>>, %arg2: memref<16x32xf32, #tpu.memory_space<vmem>>, %arg3: memref<2x32x32xf32, #tpu.memory_space<vmem>>, %arg4: memref<2x32x32xf32, #tpu.memory_space<vmem>>, %arg5: memref<1x32x96xbf16, #tpu.memory_space<vmem>>, %arg6: memref<1x1x96xf32, #tpu.memory_space<vmem>>, %arg7: memref<1x32x32xbf16, #tpu.memory_space<vmem>>, %arg8: memref<1x1x32xf32, #tpu.memory_space<vmem>>, %arg9: memref<1x1x32xf32, #tpu.memory_space<vmem>>, %arg10: memref<1x1x32xf32, #tpu.memory_space<vmem>>, %arg11: memref<1x32x32xbf16, #tpu.memory_space<vmem>>, %arg12: memref<1x1x32xf32, #tpu.memory_space<vmem>>, %arg13: memref<1x32x64xbf16, #tpu.memory_space<vmem>>, %arg14: memref<1x1x64xf32, #tpu.memory_space<vmem>>, %arg15: memref<1x32x32xbf16, #tpu.memory_space<vmem>>, %arg16: memref<1x1x32xf32, #tpu.memory_space<vmem>>, %arg17: memref<1x1x32xf32, #tpu.memory_space<vmem>>, %arg18: memref<1x1x32xf32, #tpu.memory_space<vmem>>, %arg19: memref<1x32x128xbf16, #tpu.memory_space<vmem>>, %arg20: memref<1x1x128xf32, #tpu.memory_space<vmem>>, %arg21: memref<1x128x32xbf16, #tpu.memory_space<vmem>>, %arg22: memref<1x1x32xf32, #tpu.memory_space<vmem>>, %arg23: memref<1x1x32xf32, #tpu.memory_space<vmem>>, %arg24: memref<1x1x32xf32, #tpu.memory_space<vmem>>, %arg25: memref<32x128xbf16, #tpu.memory_space<vmem>>, %arg26: memref<1x128xf32, #tpu.memory_space<vmem>>, %arg27: memref<16x128xf32, #tpu.memory_space<vmem>>, %arg28: memref<16x32xf32, #tpu.memory_space<vmem>>, %arg29: memref<2x32x8xf32, #tpu.memory_space<vmem>>, %arg30: memref<2x32x8xf32, #tpu.memory_space<vmem>>, %arg31: memref<2x32x8xf32, #tpu.memory_space<vmem>>, %arg32: memref<2x32x8xf32, #tpu.memory_space<vmem>>, %arg33: memref<2x32x8xf32, #tpu.memory_space<vmem>>, %arg34: memref<16x32xf32, #tpu.memory_space<vmem>>) attributes {dimension_semantics = [#tpu.dimension_semantics<arbitrary>], iteration_bounds = array<i64: 2>, scalar_prefetch = 0 : i64, scratch_operands = 7 : i64, tpu.core_type = #tpu.core_type<tc>, window_params = [{pipeline_mode = #tpu.pipeline_mode<synchronous>, transform_indices = @transform_0, window_bounds = array<i64: 16, 32>}, {pipeline_mode = #tpu.pipeline_mode<synchronous>, transform_indices = @transform_1, window_bounds = array<i64: 16, 32>}, {pipeline_mode = #tpu.pipeline_mode<synchronous>, transform_indices = @transform_2, window_bounds = array<i64: 2, 32, 32>}, {pipeline_mode = #tpu.pipeline_mode<synchronous>, transform_indices = @transform_3, window_bounds = array<i64: 2, 32, 32>}, {transform_indices = @transform_4, window_bounds = array<i64: 1, 32, 96>}, {transform_indices = @transform_5, window_bounds = array<i64: 1, 1, 96>}, {transform_indices = @transform_6, window_bounds = array<i64: 1, 32, 32>}, {transform_indices = @transform_7, window_bounds = array<i64: 1, 1, 32>}, {transform_indices = @transform_8, window_bounds = array<i64: 1, 1, 32>}, {transform_indices = @transform_9, window_bounds = array<i64: 1, 1, 32>}, {transform_indices = @transform_10, window_bounds = array<i64: 1, 32, 32>}, {transform_indices = @transform_11, window_bounds = array<i64: 1, 1, 32>}, {transform_indices = @transform_12, window_bounds = array<i64: 1, 32, 64>}, {transform_indices = @transform_13, window_bounds = array<i64: 1, 1, 64>}, {transform_indices = @transform_14, window_bounds = array<i64: 1, 32, 32>}, {transform_indices = @transform_15, window_bounds = array<i64: 1, 1, 32>}, {transform_indices = @transform_16, window_bounds = array<i64: 1, 1, 32>}, {transform_indices = @transform_17, window_bounds = array<i64: 1, 1, 32>}, {transform_indices = @transform_18, window_bounds = array<i64: 1, 32, 128>}, {transform_indices = @transform_19, window_bounds = array<i64: 1, 1, 128>}, {transform_indices = @transform_20, window_bounds = array<i64: 1, 128, 32>}, {transform_indices = @transform_21, window_bounds = array<i64: 1, 1, 32>}, {transform_indices = @transform_22, window_bounds = array<i64: 1, 1, 32>}, {transform_indices = @transform_23, window_bounds = array<i64: 1, 1, 32>}, {pipeline_mode = #tpu.pipeline_mode<synchronous>, transform_indices = @transform_24, window_bounds = array<i64: 32, 128>}, {pipeline_mode = #tpu.pipeline_mode<synchronous>, transform_indices = @transform_25, window_bounds = array<i64: 1, 128>}, {pipeline_mode = #tpu.pipeline_mode<synchronous>, transform_indices = @transform_26, window_bounds = array<i64: 16, 128>}]} {
    %c0_i32 = arith.constant 0 : i32
    %0 = arith.cmpi eq, %arg0, %c0_i32 : i32
    %1 = arith.extui %0 : i1 to i32
    %c0_i32_0 = arith.constant 0 : i32
    %2 = arith.cmpi ne, %1, %c0_i32_0 : i32
    scf.if %2 {
      %c0_210 = arith.constant 0 : index
      %c0_211 = arith.constant 0 : index
      %293 = vector.load %arg1[%c0_210, %c0_211] : memref<16x32xf32, #tpu.memory_space<vmem>>, vector<16x32xf32>
      %c0_212 = arith.constant 0 : index
      %c0_213 = arith.constant 0 : index
      %294 = vector.load %arg28[%c0_212, %c0_213] : memref<16x32xf32, #tpu.memory_space<vmem>>, vector<16x32xf32>
      tpu.vector_store %arg28[%c0_212, %c0_213], %293 {strides = array<i32>} : memref<16x32xf32, #tpu.memory_space<vmem>>, vector<16x32xf32>,
    } else {
    }
    %c0 = arith.constant 0 : index
    %c0_1 = arith.constant 0 : index
    %3 = vector.load %arg28[%c0, %c0_1] : memref<16x32xf32, #tpu.memory_space<vmem>>, vector<16x32xf32>
    %c0_2 = arith.constant 0 : index
    %c0_3 = arith.constant 0 : index
    %4 = vector.load %arg2[%c0_2, %c0_3] : memref<16x32xf32, #tpu.memory_space<vmem>>, vector<16x32xf32>
    %5 = arith.truncf %3 : vector<16x32xf32> to vector<16x32xbf16>
    %c0_4 = arith.constant 0 : index
    %c0_5 = arith.constant 0 : index
    %c0_6 = arith.constant 0 : index
    %6 = vector.load %arg5[%c0_4, %c0_5, %c0_6] : memref<1x32x96xbf16, #tpu.memory_space<vmem>>, vector<1x32x96xbf16>
    %7 = vector.shape_cast %6 : vector<1x32x96xbf16> to vector<32x96xbf16>
    %cst = arith.constant dense<0.000000e+00> : vector<16x96xf32>
    %8 = tpu.matmul %5, %7, %cst {dimension_numbers = #tpu.dot_dimension_numbers<[1], [0], [0], [1], [0, 0, 1, 1], [], []>} : vector<16x32xbf16>, vector<32x96xbf16>, vector<16x96xf32> -> vector<16x96xf32>
    %c0_7 = arith.constant 0 : index
    %c0_8 = arith.constant 0 : index
    %c0_9 = arith.constant 0 : index
    %9 = vector.load %arg6[%c0_7, %c0_8, %c0_9] : memref<1x1x96xf32, #tpu.memory_space<vmem>>, vector<1x1x96xf32>
    %10 = vector.shape_cast %9 : vector<1x1x96xf32> to vector<1x96xf32>
    %11 = vector.broadcast %10 : vector<1x96xf32> to vector<16x96xf32>
    %12 = arith.addf %8, %11 : vector<16x96xf32>
    %13 = vector.extract_strided_slice %12 {offsets = [0, 0], sizes = [16, 32], strides = [1, 1]} : vector<16x96xf32> to vector<16x32xf32>
    %14 = vector.extract_strided_slice %12 {offsets = [0, 32], sizes = [16, 32], strides = [1, 1]} : vector<16x96xf32> to vector<16x32xf32>
    %15 = vector.extract_strided_slice %12 {offsets = [0, 64], sizes = [16, 32], strides = [1, 1]} : vector<16x96xf32> to vector<16x32xf32>
    %c0_10 = arith.constant 0 : index
    %c0_11 = arith.constant 0 : index
    %c0_12 = arith.constant 0 : index
    %16 = vector.load %arg3[%c0_10, %c0_11, %c0_12] : memref<2x32x32xf32, #tpu.memory_space<vmem>>, vector<2x32x32xf32>
    %c0_13 = arith.constant 0 : index
    %c0_14 = arith.constant 0 : index
    %c0_15 = arith.constant 0 : index
    %17 = vector.load %arg7[%c0_13, %c0_14, %c0_15] : memref<1x32x32xbf16, #tpu.memory_space<vmem>>, vector<1x32x32xbf16>
    %18 = vector.shape_cast %17 : vector<1x32x32xbf16> to vector<32x32xbf16>
    %c0_16 = arith.constant 0 : index
    %c0_17 = arith.constant 0 : index
    %c0_18 = arith.constant 0 : index
    %19 = vector.load %arg8[%c0_16, %c0_17, %c0_18] : memref<1x1x32xf32, #tpu.memory_space<vmem>>, vector<1x1x32xf32>
    %20 = vector.shape_cast %19 : vector<1x1x32xf32> to vector<1x32xf32>
    %21 = vector.extract_strided_slice %13 {offsets = [0, 0], sizes = [16, 8], strides = [1, 1]} : vector<16x32xf32> to vector<16x8xf32>
    %22 = vector.shape_cast %21 : vector<16x8xf32> to vector<2x8x8xf32>
    %c0_19 = arith.constant 0 : index
    %c0_20 = arith.constant 0 : index
    %c0_21 = arith.constant 0 : index
    %23 = vector.load %arg29[%c0_19, %c0_20, %c0_21] : memref<2x32x8xf32, #tpu.memory_space<vmem>>, vector<2x8x8xf32>
    tpu.vector_store %arg29[%c0_19, %c0_20, %c0_21], %22 {strides = array<i32>} : memref<2x32x8xf32, #tpu.memory_space<vmem>>, vector<2x8x8xf32>,
    %24 = vector.extract_strided_slice %14 {offsets = [0, 0], sizes = [16, 8], strides = [1, 1]} : vector<16x32xf32> to vector<16x8xf32>
    %25 = vector.shape_cast %24 : vector<16x8xf32> to vector<2x8x8xf32>
    %c0_22 = arith.constant 0 : index
    %c0_23 = arith.constant 0 : index
    %c0_24 = arith.constant 0 : index
    %26 = vector.load %arg30[%c0_22, %c0_23, %c0_24] : memref<2x32x8xf32, #tpu.memory_space<vmem>>, vector<2x8x8xf32>
    tpu.vector_store %arg30[%c0_22, %c0_23, %c0_24], %25 {strides = array<i32>} : memref<2x32x8xf32, #tpu.memory_space<vmem>>, vector<2x8x8xf32>,
    %27 = vector.extract_strided_slice %15 {offsets = [0, 0], sizes = [16, 8], strides = [1, 1]} : vector<16x32xf32> to vector<16x8xf32>
    %28 = vector.shape_cast %27 : vector<16x8xf32> to vector<2x8x8xf32>
    %c0_25 = arith.constant 0 : index
    %c0_26 = arith.constant 0 : index
    %c0_27 = arith.constant 0 : index
    %29 = vector.load %arg31[%c0_25, %c0_26, %c0_27] : memref<2x32x8xf32, #tpu.memory_space<vmem>>, vector<2x8x8xf32>
    tpu.vector_store %arg31[%c0_25, %c0_26, %c0_27], %28 {strides = array<i32>} : memref<2x32x8xf32, #tpu.memory_space<vmem>>, vector<2x8x8xf32>,
    %30 = vector.extract_strided_slice %13 {offsets = [0, 8], sizes = [16, 8], strides = [1, 1]} : vector<16x32xf32> to vector<16x8xf32>
    %31 = vector.shape_cast %30 : vector<16x8xf32> to vector<2x8x8xf32>
    %c0_28 = arith.constant 0 : index
    %c8 = arith.constant 8 : index
    %c0_29 = arith.constant 0 : index
    %32 = vector.load %arg29[%c0_28, %c8, %c0_29] : memref<2x32x8xf32, #tpu.memory_space<vmem>>, vector<2x8x8xf32>
    tpu.vector_store %arg29[%c0_28, %c8, %c0_29], %31 {strides = array<i32>} : memref<2x32x8xf32, #tpu.memory_space<vmem>>, vector<2x8x8xf32>,
    %33 = vector.extract_strided_slice %14 {offsets = [0, 8], sizes = [16, 8], strides = [1, 1]} : vector<16x32xf32> to vector<16x8xf32>
    %34 = vector.shape_cast %33 : vector<16x8xf32> to vector<2x8x8xf32>
    %c0_30 = arith.constant 0 : index
    %c8_31 = arith.constant 8 : index
    %c0_32 = arith.constant 0 : index
    %35 = vector.load %arg30[%c0_30, %c8_31, %c0_32] : memref<2x32x8xf32, #tpu.memory_space<vmem>>, vector<2x8x8xf32>
    tpu.vector_store %arg30[%c0_30, %c8_31, %c0_32], %34 {strides = array<i32>} : memref<2x32x8xf32, #tpu.memory_space<vmem>>, vector<2x8x8xf32>,
    %36 = vector.extract_strided_slice %15 {offsets = [0, 8], sizes = [16, 8], strides = [1, 1]} : vector<16x32xf32> to vector<16x8xf32>
    %37 = vector.shape_cast %36 : vector<16x8xf32> to vector<2x8x8xf32>
    %c0_33 = arith.constant 0 : index
    %c8_34 = arith.constant 8 : index
    %c0_35 = arith.constant 0 : index
    %38 = vector.load %arg31[%c0_33, %c8_34, %c0_35] : memref<2x32x8xf32, #tpu.memory_space<vmem>>, vector<2x8x8xf32>
    tpu.vector_store %arg31[%c0_33, %c8_34, %c0_35], %37 {strides = array<i32>} : memref<2x32x8xf32, #tpu.memory_space<vmem>>, vector<2x8x8xf32>,
    %39 = vector.extract_strided_slice %13 {offsets = [0, 16], sizes = [16, 8], strides = [1, 1]} : vector<16x32xf32> to vector<16x8xf32>
    %40 = vector.shape_cast %39 : vector<16x8xf32> to vector<2x8x8xf32>
    %c0_36 = arith.constant 0 : index
    %c16 = arith.constant 16 : index
    %c0_37 = arith.constant 0 : index
    %41 = vector.load %arg29[%c0_36, %c16, %c0_37] : memref<2x32x8xf32, #tpu.memory_space<vmem>>, vector<2x8x8xf32>
    tpu.vector_store %arg29[%c0_36, %c16, %c0_37], %40 {strides = array<i32>} : memref<2x32x8xf32, #tpu.memory_space<vmem>>, vector<2x8x8xf32>,
    %42 = vector.extract_strided_slice %14 {offsets = [0, 16], sizes = [16, 8], strides = [1, 1]} : vector<16x32xf32> to vector<16x8xf32>
    %43 = vector.shape_cast %42 : vector<16x8xf32> to vector<2x8x8xf32>
    %c0_38 = arith.constant 0 : index
    %c16_39 = arith.constant 16 : index
    %c0_40 = arith.constant 0 : index
    %44 = vector.load %arg30[%c0_38, %c16_39, %c0_40] : memref<2x32x8xf32, #tpu.memory_space<vmem>>, vector<2x8x8xf32>
    tpu.vector_store %arg30[%c0_38, %c16_39, %c0_40], %43 {strides = array<i32>} : memref<2x32x8xf32, #tpu.memory_space<vmem>>, vector<2x8x8xf32>,
    %45 = vector.extract_strided_slice %15 {offsets = [0, 16], sizes = [16, 8], strides = [1, 1]} : vector<16x32xf32> to vector<16x8xf32>
    %46 = vector.shape_cast %45 : vector<16x8xf32> to vector<2x8x8xf32>
    %c0_41 = arith.constant 0 : index
    %c16_42 = arith.constant 16 : index
    %c0_43 = arith.constant 0 : index
    %47 = vector.load %arg31[%c0_41, %c16_42, %c0_43] : memref<2x32x8xf32, #tpu.memory_space<vmem>>, vector<2x8x8xf32>
    tpu.vector_store %arg31[%c0_41, %c16_42, %c0_43], %46 {strides = array<i32>} : memref<2x32x8xf32, #tpu.memory_space<vmem>>, vector<2x8x8xf32>,
    %48 = vector.extract_strided_slice %13 {offsets = [0, 24], sizes = [16, 8], strides = [1, 1]} : vector<16x32xf32> to vector<16x8xf32>
    %49 = vector.shape_cast %48 : vector<16x8xf32> to vector<2x8x8xf32>
    %c0_44 = arith.constant 0 : index
    %c24 = arith.constant 24 : index
    %c0_45 = arith.constant 0 : index
    %50 = vector.load %arg29[%c0_44, %c24, %c0_45] : memref<2x32x8xf32, #tpu.memory_space<vmem>>, vector<2x8x8xf32>
    tpu.vector_store %arg29[%c0_44, %c24, %c0_45], %49 {strides = array<i32>} : memref<2x32x8xf32, #tpu.memory_space<vmem>>, vector<2x8x8xf32>,
    %51 = vector.extract_strided_slice %14 {offsets = [0, 24], sizes = [16, 8], strides = [1, 1]} : vector<16x32xf32> to vector<16x8xf32>
    %52 = vector.shape_cast %51 : vector<16x8xf32> to vector<2x8x8xf32>
    %c0_46 = arith.constant 0 : index
    %c24_47 = arith.constant 24 : index
    %c0_48 = arith.constant 0 : index
    %53 = vector.load %arg30[%c0_46, %c24_47, %c0_48] : memref<2x32x8xf32, #tpu.memory_space<vmem>>, vector<2x8x8xf32>
    tpu.vector_store %arg30[%c0_46, %c24_47, %c0_48], %52 {strides = array<i32>} : memref<2x32x8xf32, #tpu.memory_space<vmem>>, vector<2x8x8xf32>,
    %54 = vector.extract_strided_slice %15 {offsets = [0, 24], sizes = [16, 8], strides = [1, 1]} : vector<16x32xf32> to vector<16x8xf32>
    %55 = vector.shape_cast %54 : vector<16x8xf32> to vector<2x8x8xf32>
    %c0_49 = arith.constant 0 : index
    %c24_50 = arith.constant 24 : index
    %c0_51 = arith.constant 0 : index
    %56 = vector.load %arg31[%c0_49, %c24_50, %c0_51] : memref<2x32x8xf32, #tpu.memory_space<vmem>>, vector<2x8x8xf32>
    tpu.vector_store %arg31[%c0_49, %c24_50, %c0_51], %55 {strides = array<i32>} : memref<2x32x8xf32, #tpu.memory_space<vmem>>, vector<2x8x8xf32>,
    %c0_52 = arith.constant 0 : index
    %c0_53 = arith.constant 0 : index
    %c0_54 = arith.constant 0 : index
    %57 = vector.load %arg29[%c0_52, %c0_53, %c0_54] : memref<2x32x8xf32, #tpu.memory_space<vmem>>, vector<2x32x8xf32>
    %58 = arith.truncf %57 : vector<2x32x8xf32> to vector<2x32x8xbf16>
    %c0_55 = arith.constant 0 : index
    %c0_56 = arith.constant 0 : index
    %c0_57 = arith.constant 0 : index
    %59 = vector.load %arg30[%c0_55, %c0_56, %c0_57] : memref<2x32x8xf32, #tpu.memory_space<vmem>>, vector<2x32x8xf32>
    %60 = arith.truncf %59 : vector<2x32x8xf32> to vector<2x32x8xbf16>
    %c0_58 = arith.constant 0 : index
    %c0_59 = arith.constant 0 : index
    %c0_60 = arith.constant 0 : index
    %61 = vector.load %arg31[%c0_58, %c0_59, %c0_60] : memref<2x32x8xf32, #tpu.memory_space<vmem>>, vector<2x32x8xf32>
    %62 = arith.truncf %61 : vector<2x32x8xf32> to vector<2x32x8xbf16>
    "tpu.trace_start"() <{level = 10 : i32, message = "bqd,bkd->bqk"}> : () -> ()
    %cst_61 = arith.constant dense<0.000000e+00> : vector<2x32x32xf32>
    %63 = tpu.matmul %58, %60, %cst_61 {dimension_numbers = #tpu.dot_dimension_numbers<[2], [2], [1], [1], [0, 0, 0, 1, 1, 1], [0], [0]>} : vector<2x32x8xbf16>, vector<2x32x8xbf16>, vector<2x32x32xf32> -> vector<2x32x32xf32>
    "tpu.trace_stop"() : () -> ()
    %64 = arith.addf %63, %16 : vector<2x32x32xf32>
    %cst_62 = arith.constant dense<0xFF800000> : vector<2x32xf32>
    %65 = vector.multi_reduction <maximumf>, %64, %cst_62 [2] : vector<2x32x32xf32> to vector<2x32xf32>
    %66 = vector.shape_cast %65 : vector<2x32xf32> to vector<2x32x1xf32>
    %67 = vector.broadcast %66 : vector<2x32x1xf32> to vector<2x32x32xf32>
    %68 = arith.subf %64, %67 : vector<2x32x32xf32>
    %69 = math.exp %68 : vector<2x32x32xf32>
    %cst_63 = arith.constant dense<0.000000e+00> : vector<2x32xf32>
    %70 = vector.multi_reduction <add>, %69, %cst_63 [2] : vector<2x32x32xf32> to vector<2x32xf32>
    %71 = vector.shape_cast %70 : vector<2x32xf32> to vector<2x32x1xf32>
    %72 = tpu.reciprocal %71 {approx = true} : vector<2x32x1xf32> -> vector<2x32x1xf32>
    %73 = vector.broadcast %72 : vector<2x32x1xf32> to vector<2x32x32xf32>
    %74 = arith.mulf %69, %73 : vector<2x32x32xf32>
    %75 = arith.truncf %74 : vector<2x32x32xf32> to vector<2x32x32xbf16>
    "tpu.trace_start"() <{level = 10 : i32, message = "bqk,bkd->bqd"}> : () -> ()
    %cst_64 = arith.constant dense<0.000000e+00> : vector<2x32x8xf32>
    %76 = tpu.matmul %75, %62, %cst_64 {dimension_numbers = #tpu.dot_dimension_numbers<[2], [1], [1], [2], [0, 0, 0, 1, 1, 2], [0], [0]>} : vector<2x32x32xbf16>, vector<2x32x8xbf16>, vector<2x32x8xf32> -> vector<2x32x8xf32>
    "tpu.trace_stop"() : () -> ()
    %77 = vector.extract_strided_slice %76 {offsets = [0, 0, 0], sizes = [2, 8, 8], strides = [1, 1, 1]} : vector<2x32x8xf32> to vector<2x8x8xf32>
    %78 = vector.shape_cast %77 : vector<2x8x8xf32> to vector<16x8xf32>
    %c0_65 = arith.constant 0 : index
    %c0_66 = arith.constant 0 : index
    %79 = vector.load %arg34[%c0_65, %c0_66] : memref<16x32xf32, #tpu.memory_space<vmem>>, vector<16x8xf32>
    tpu.vector_store %arg34[%c0_65, %c0_66], %78 {strides = array<i32>} : memref<16x32xf32, #tpu.memory_space<vmem>>, vector<16x8xf32>,
    %80 = vector.extract_strided_slice %76 {offsets = [0, 8, 0], sizes = [2, 8, 8], strides = [1, 1, 1]} : vector<2x32x8xf32> to vector<2x8x8xf32>
    %81 = vector.shape_cast %80 : vector<2x8x8xf32> to vector<16x8xf32>
    %c0_67 = arith.constant 0 : index
    %c8_68 = arith.constant 8 : index
    %82 = vector.load %arg34[%c0_67, %c8_68] : memref<16x32xf32, #tpu.memory_space<vmem>>, vector<16x8xf32>
    tpu.vector_store %arg34[%c0_67, %c8_68], %81 {strides = array<i32>} : memref<16x32xf32, #tpu.memory_space<vmem>>, vector<16x8xf32>,
    %83 = vector.extract_strided_slice %76 {offsets = [0, 16, 0], sizes = [2, 8, 8], strides = [1, 1, 1]} : vector<2x32x8xf32> to vector<2x8x8xf32>
    %84 = vector.shape_cast %83 : vector<2x8x8xf32> to vector<16x8xf32>
    %c0_69 = arith.constant 0 : index
    %c16_70 = arith.constant 16 : index
    %85 = vector.load %arg34[%c0_69, %c16_70] : memref<16x32xf32, #tpu.memory_space<vmem>>, vector<16x8xf32>
    tpu.vector_store %arg34[%c0_69, %c16_70], %84 {strides = array<i32>} : memref<16x32xf32, #tpu.memory_space<vmem>>, vector<16x8xf32>,
    %86 = vector.extract_strided_slice %76 {offsets = [0, 24, 0], sizes = [2, 8, 8], strides = [1, 1, 1]} : vector<2x32x8xf32> to vector<2x8x8xf32>
    %87 = vector.shape_cast %86 : vector<2x8x8xf32> to vector<16x8xf32>
    %c0_71 = arith.constant 0 : index
    %c24_72 = arith.constant 24 : index
    %88 = vector.load %arg34[%c0_71, %c24_72] : memref<16x32xf32, #tpu.memory_space<vmem>>, vector<16x8xf32>
    tpu.vector_store %arg34[%c0_71, %c24_72], %87 {strides = array<i32>} : memref<16x32xf32, #tpu.memory_space<vmem>>, vector<16x8xf32>,
    %c0_73 = arith.constant 0 : index
    %c0_74 = arith.constant 0 : index
    %89 = vector.load %arg34[%c0_73, %c0_74] : memref<16x32xf32, #tpu.memory_space<vmem>>, vector<16x32xf32>
    %90 = arith.truncf %89 : vector<16x32xf32> to vector<16x32xbf16>
    %cst_75 = arith.constant dense<0.000000e+00> : vector<16x32xf32>
    %91 = tpu.matmul %90, %18, %cst_75 {dimension_numbers = #tpu.dot_dimension_numbers<[1], [0], [0], [1], [0, 0, 1, 1], [], []>} : vector<16x32xbf16>, vector<32x32xbf16>, vector<16x32xf32> -> vector<16x32xf32>
    %92 = vector.broadcast %20 : vector<1x32xf32> to vector<16x32xf32>
    %93 = arith.addf %91, %92 : vector<16x32xf32>
    %94 = arith.addf %3, %93 : vector<16x32xf32>
    %c0_76 = arith.constant 0 : index
    %c0_77 = arith.constant 0 : index
    %c0_78 = arith.constant 0 : index
    %95 = vector.load %arg9[%c0_76, %c0_77, %c0_78] : memref<1x1x32xf32, #tpu.memory_space<vmem>>, vector<1x1x32xf32>
    %96 = vector.shape_cast %95 : vector<1x1x32xf32> to vector<1x32xf32>
    %c0_79 = arith.constant 0 : index
    %c0_80 = arith.constant 0 : index
    %c0_81 = arith.constant 0 : index
    %97 = vector.load %arg10[%c0_79, %c0_80, %c0_81] : memref<1x1x32xf32, #tpu.memory_space<vmem>>, vector<1x1x32xf32>
    %98 = vector.shape_cast %97 : vector<1x1x32xf32> to vector<1x32xf32>
    %cst_82 = arith.constant dense<0.000000e+00> : vector<16xf32>
    %99 = vector.multi_reduction <add>, %94, %cst_82 [1] : vector<16x32xf32> to vector<16xf32>
    %100 = vector.shape_cast %99 : vector<16xf32> to vector<16x1xf32>
    %cst_83 = arith.constant 3.200000e+01 : f32
    %101 = vector.broadcast %cst_83 : f32 to vector<16x1xf32>
    %102 = arith.divf %100, %101 : vector<16x1xf32>
    %103 = vector.broadcast %102 : vector<16x1xf32> to vector<16x32xf32>
    %104 = arith.subf %94, %103 : vector<16x32xf32>
    %105 = arith.mulf %104, %104 : vector<16x32xf32>
    %cst_84 = arith.constant dense<0.000000e+00> : vector<16xf32>
    %106 = vector.multi_reduction <add>, %105, %cst_84 [1] : vector<16x32xf32> to vector<16xf32>
    %107 = vector.shape_cast %106 : vector<16xf32> to vector<16x1xf32>
    %cst_85 = arith.constant 3.200000e+01 : f32
    %108 = vector.broadcast %cst_85 : f32 to vector<16x1xf32>
    %109 = arith.divf %107, %108 : vector<16x1xf32>
    %110 = vector.broadcast %102 : vector<16x1xf32> to vector<16x32xf32>
    %111 = arith.subf %94, %110 : vector<16x32xf32>
    %cst_86 = arith.constant 9.99999974E-6 : f32
    %112 = vector.broadcast %cst_86 : f32 to vector<16x1xf32>
    %113 = arith.addf %109, %112 : vector<16x1xf32>
    %114 = math.rsqrt %113 : vector<16x1xf32>
    %115 = vector.broadcast %114 : vector<16x1xf32> to vector<16x32xf32>
    %116 = arith.mulf %111, %115 : vector<16x32xf32>
    %117 = vector.broadcast %96 : vector<1x32xf32> to vector<16x32xf32>
    %118 = arith.mulf %116, %117 : vector<16x32xf32>
    %119 = vector.broadcast %98 : vector<1x32xf32> to vector<16x32xf32>
    %120 = arith.addf %118, %119 : vector<16x32xf32>
    %121 = arith.truncf %120 : vector<16x32xf32> to vector<16x32xbf16>
    %c0_87 = arith.constant 0 : index
    %c0_88 = arith.constant 0 : index
    %c0_89 = arith.constant 0 : index
    %122 = vector.load %arg11[%c0_87, %c0_88, %c0_89] : memref<1x32x32xbf16, #tpu.memory_space<vmem>>, vector<1x32x32xbf16>
    %123 = vector.shape_cast %122 : vector<1x32x32xbf16> to vector<32x32xbf16>
    %cst_90 = arith.constant dense<0.000000e+00> : vector<16x32xf32>
    %124 = tpu.matmul %121, %123, %cst_90 {dimension_numbers = #tpu.dot_dimension_numbers<[1], [0], [0], [1], [0, 0, 1, 1], [], []>} : vector<16x32xbf16>, vector<32x32xbf16>, vector<16x32xf32> -> vector<16x32xf32>
    %c0_91 = arith.constant 0 : index
    %c0_92 = arith.constant 0 : index
    %c0_93 = arith.constant 0 : index
    %125 = vector.load %arg12[%c0_91, %c0_92, %c0_93] : memref<1x1x32xf32, #tpu.memory_space<vmem>>, vector<1x1x32xf32>
    %126 = vector.shape_cast %125 : vector<1x1x32xf32> to vector<1x32xf32>
    %127 = vector.broadcast %126 : vector<1x32xf32> to vector<16x32xf32>
    %128 = arith.addf %124, %127 : vector<16x32xf32>
    %129 = arith.truncf %4 : vector<16x32xf32> to vector<16x32xbf16>
    %c0_94 = arith.constant 0 : index
    %c0_95 = arith.constant 0 : index
    %c0_96 = arith.constant 0 : index
    %130 = vector.load %arg13[%c0_94, %c0_95, %c0_96] : memref<1x32x64xbf16, #tpu.memory_space<vmem>>, vector<1x32x64xbf16>
    %131 = vector.shape_cast %130 : vector<1x32x64xbf16> to vector<32x64xbf16>
    %cst_97 = arith.constant dense<0.000000e+00> : vector<16x64xf32>
    %132 = tpu.matmul %129, %131, %cst_97 {dimension_numbers = #tpu.dot_dimension_numbers<[1], [0], [0], [1], [0, 0, 1, 1], [], []>} : vector<16x32xbf16>, vector<32x64xbf16>, vector<16x64xf32> -> vector<16x64xf32>
    %c0_98 = arith.constant 0 : index
    %c0_99 = arith.constant 0 : index
    %c0_100 = arith.constant 0 : index
    %133 = vector.load %arg14[%c0_98, %c0_99, %c0_100] : memref<1x1x64xf32, #tpu.memory_space<vmem>>, vector<1x1x64xf32>
    %134 = vector.shape_cast %133 : vector<1x1x64xf32> to vector<1x64xf32>
    %135 = vector.broadcast %134 : vector<1x64xf32> to vector<16x64xf32>
    %136 = arith.addf %132, %135 : vector<16x64xf32>
    %137 = vector.extract_strided_slice %136 {offsets = [0, 0], sizes = [16, 32], strides = [1, 1]} : vector<16x64xf32> to vector<16x32xf32>
    %138 = vector.extract_strided_slice %136 {offsets = [0, 32], sizes = [16, 32], strides = [1, 1]} : vector<16x64xf32> to vector<16x32xf32>
    %c0_101 = arith.constant 0 : index
    %c0_102 = arith.constant 0 : index
    %c0_103 = arith.constant 0 : index
    %139 = vector.load %arg4[%c0_101, %c0_102, %c0_103] : memref<2x32x32xf32, #tpu.memory_space<vmem>>, vector<2x32x32xf32>
    %c0_104 = arith.constant 0 : index
    %c0_105 = arith.constant 0 : index
    %c0_106 = arith.constant 0 : index
    %140 = vector.load %arg15[%c0_104, %c0_105, %c0_106] : memref<1x32x32xbf16, #tpu.memory_space<vmem>>, vector<1x32x32xbf16>
    %141 = vector.shape_cast %140 : vector<1x32x32xbf16> to vector<32x32xbf16>
    %c0_107 = arith.constant 0 : index
    %c0_108 = arith.constant 0 : index
    %c0_109 = arith.constant 0 : index
    %142 = vector.load %arg16[%c0_107, %c0_108, %c0_109] : memref<1x1x32xf32, #tpu.memory_space<vmem>>, vector<1x1x32xf32>
    %143 = vector.shape_cast %142 : vector<1x1x32xf32> to vector<1x32xf32>
    %144 = vector.extract_strided_slice %128 {offsets = [0, 0], sizes = [16, 8], strides = [1, 1]} : vector<16x32xf32> to vector<16x8xf32>
    %145 = vector.shape_cast %144 : vector<16x8xf32> to vector<2x8x8xf32>
    %c0_110 = arith.constant 0 : index
    %c0_111 = arith.constant 0 : index
    %c0_112 = arith.constant 0 : index
    %146 = vector.load %arg29[%c0_110, %c0_111, %c0_112] : memref<2x32x8xf32, #tpu.memory_space<vmem>>, vector<2x8x8xf32>
    tpu.vector_store %arg29[%c0_110, %c0_111, %c0_112], %145 {strides = array<i32>} : memref<2x32x8xf32, #tpu.memory_space<vmem>>, vector<2x8x8xf32>,
    %147 = vector.extract_strided_slice %137 {offsets = [0, 0], sizes = [16, 8], strides = [1, 1]} : vector<16x32xf32> to vector<16x8xf32>
    %148 = vector.shape_cast %147 : vector<16x8xf32> to vector<2x8x8xf32>
    %c0_113 = arith.constant 0 : index
    %c0_114 = arith.constant 0 : index
    %c0_115 = arith.constant 0 : index
    %149 = vector.load %arg32[%c0_113, %c0_114, %c0_115] : memref<2x32x8xf32, #tpu.memory_space<vmem>>, vector<2x8x8xf32>
    tpu.vector_store %arg32[%c0_113, %c0_114, %c0_115], %148 {strides = array<i32>} : memref<2x32x8xf32, #tpu.memory_space<vmem>>, vector<2x8x8xf32>,
    %150 = vector.extract_strided_slice %138 {offsets = [0, 0], sizes = [16, 8], strides = [1, 1]} : vector<16x32xf32> to vector<16x8xf32>
    %151 = vector.shape_cast %150 : vector<16x8xf32> to vector<2x8x8xf32>
    %c0_116 = arith.constant 0 : index
    %c0_117 = arith.constant 0 : index
    %c0_118 = arith.constant 0 : index
    %152 = vector.load %arg33[%c0_116, %c0_117, %c0_118] : memref<2x32x8xf32, #tpu.memory_space<vmem>>, vector<2x8x8xf32>
    tpu.vector_store %arg33[%c0_116, %c0_117, %c0_118], %151 {strides = array<i32>} : memref<2x32x8xf32, #tpu.memory_space<vmem>>, vector<2x8x8xf32>,
    %153 = vector.extract_strided_slice %128 {offsets = [0, 8], sizes = [16, 8], strides = [1, 1]} : vector<16x32xf32> to vector<16x8xf32>
    %154 = vector.shape_cast %153 : vector<16x8xf32> to vector<2x8x8xf32>
    %c0_119 = arith.constant 0 : index
    %c8_120 = arith.constant 8 : index
    %c0_121 = arith.constant 0 : index
    %155 = vector.load %arg29[%c0_119, %c8_120, %c0_121] : memref<2x32x8xf32, #tpu.memory_space<vmem>>, vector<2x8x8xf32>
    tpu.vector_store %arg29[%c0_119, %c8_120, %c0_121], %154 {strides = array<i32>} : memref<2x32x8xf32, #tpu.memory_space<vmem>>, vector<2x8x8xf32>,
    %156 = vector.extract_strided_slice %137 {offsets = [0, 8], sizes = [16, 8], strides = [1, 1]} : vector<16x32xf32> to vector<16x8xf32>
    %157 = vector.shape_cast %156 : vector<16x8xf32> to vector<2x8x8xf32>
    %c0_122 = arith.constant 0 : index
    %c8_123 = arith.constant 8 : index
    %c0_124 = arith.constant 0 : index
    %158 = vector.load %arg32[%c0_122, %c8_123, %c0_124] : memref<2x32x8xf32, #tpu.memory_space<vmem>>, vector<2x8x8xf32>
    tpu.vector_store %arg32[%c0_122, %c8_123, %c0_124], %157 {strides = array<i32>} : memref<2x32x8xf32, #tpu.memory_space<vmem>>, vector<2x8x8xf32>,
    %159 = vector.extract_strided_slice %138 {offsets = [0, 8], sizes = [16, 8], strides = [1, 1]} : vector<16x32xf32> to vector<16x8xf32>
    %160 = vector.shape_cast %159 : vector<16x8xf32> to vector<2x8x8xf32>
    %c0_125 = arith.constant 0 : index
    %c8_126 = arith.constant 8 : index
    %c0_127 = arith.constant 0 : index
    %161 = vector.load %arg33[%c0_125, %c8_126, %c0_127] : memref<2x32x8xf32, #tpu.memory_space<vmem>>, vector<2x8x8xf32>
    tpu.vector_store %arg33[%c0_125, %c8_126, %c0_127], %160 {strides = array<i32>} : memref<2x32x8xf32, #tpu.memory_space<vmem>>, vector<2x8x8xf32>,
    %162 = vector.extract_strided_slice %128 {offsets = [0, 16], sizes = [16, 8], strides = [1, 1]} : vector<16x32xf32> to vector<16x8xf32>
    %163 = vector.shape_cast %162 : vector<16x8xf32> to vector<2x8x8xf32>
    %c0_128 = arith.constant 0 : index
    %c16_129 = arith.constant 16 : index
    %c0_130 = arith.constant 0 : index
    %164 = vector.load %arg29[%c0_128, %c16_129, %c0_130] : memref<2x32x8xf32, #tpu.memory_space<vmem>>, vector<2x8x8xf32>
    tpu.vector_store %arg29[%c0_128, %c16_129, %c0_130], %163 {strides = array<i32>} : memref<2x32x8xf32, #tpu.memory_space<vmem>>, vector<2x8x8xf32>,
    %165 = vector.extract_strided_slice %137 {offsets = [0, 16], sizes = [16, 8], strides = [1, 1]} : vector<16x32xf32> to vector<16x8xf32>
    %166 = vector.shape_cast %165 : vector<16x8xf32> to vector<2x8x8xf32>
    %c0_131 = arith.constant 0 : index
    %c16_132 = arith.constant 16 : index
    %c0_133 = arith.constant 0 : index
    %167 = vector.load %arg32[%c0_131, %c16_132, %c0_133] : memref<2x32x8xf32, #tpu.memory_space<vmem>>, vector<2x8x8xf32>
    tpu.vector_store %arg32[%c0_131, %c16_132, %c0_133], %166 {strides = array<i32>} : memref<2x32x8xf32, #tpu.memory_space<vmem>>, vector<2x8x8xf32>,
    %168 = vector.extract_strided_slice %138 {offsets = [0, 16], sizes = [16, 8], strides = [1, 1]} : vector<16x32xf32> to vector<16x8xf32>
    %169 = vector.shape_cast %168 : vector<16x8xf32> to vector<2x8x8xf32>
    %c0_134 = arith.constant 0 : index
    %c16_135 = arith.constant 16 : index
    %c0_136 = arith.constant 0 : index
    %170 = vector.load %arg33[%c0_134, %c16_135, %c0_136] : memref<2x32x8xf32, #tpu.memory_space<vmem>>, vector<2x8x8xf32>
    tpu.vector_store %arg33[%c0_134, %c16_135, %c0_136], %169 {strides = array<i32>} : memref<2x32x8xf32, #tpu.memory_space<vmem>>, vector<2x8x8xf32>,
    %171 = vector.extract_strided_slice %128 {offsets = [0, 24], sizes = [16, 8], strides = [1, 1]} : vector<16x32xf32> to vector<16x8xf32>
    %172 = vector.shape_cast %171 : vector<16x8xf32> to vector<2x8x8xf32>
    %c0_137 = arith.constant 0 : index
    %c24_138 = arith.constant 24 : index
    %c0_139 = arith.constant 0 : index
    %173 = vector.load %arg29[%c0_137, %c24_138, %c0_139] : memref<2x32x8xf32, #tpu.memory_space<vmem>>, vector<2x8x8xf32>
    tpu.vector_store %arg29[%c0_137, %c24_138, %c0_139], %172 {strides = array<i32>} : memref<2x32x8xf32, #tpu.memory_space<vmem>>, vector<2x8x8xf32>,
    %174 = vector.extract_strided_slice %137 {offsets = [0, 24], sizes = [16, 8], strides = [1, 1]} : vector<16x32xf32> to vector<16x8xf32>
    %175 = vector.shape_cast %174 : vector<16x8xf32> to vector<2x8x8xf32>
    %c0_140 = arith.constant 0 : index
    %c24_141 = arith.constant 24 : index
    %c0_142 = arith.constant 0 : index
    %176 = vector.load %arg32[%c0_140, %c24_141, %c0_142] : memref<2x32x8xf32, #tpu.memory_space<vmem>>, vector<2x8x8xf32>
    tpu.vector_store %arg32[%c0_140, %c24_141, %c0_142], %175 {strides = array<i32>} : memref<2x32x8xf32, #tpu.memory_space<vmem>>, vector<2x8x8xf32>,
    %177 = vector.extract_strided_slice %138 {offsets = [0, 24], sizes = [16, 8], strides = [1, 1]} : vector<16x32xf32> to vector<16x8xf32>
    %178 = vector.shape_cast %177 : vector<16x8xf32> to vector<2x8x8xf32>
    %c0_143 = arith.constant 0 : index
    %c24_144 = arith.constant 24 : index
    %c0_145 = arith.constant 0 : index
    %179 = vector.load %arg33[%c0_143, %c24_144, %c0_145] : memref<2x32x8xf32, #tpu.memory_space<vmem>>, vector<2x8x8xf32>
    tpu.vector_store %arg33[%c0_143, %c24_144, %c0_145], %178 {strides = array<i32>} : memref<2x32x8xf32, #tpu.memory_space<vmem>>, vector<2x8x8xf32>,
    %c0_146 = arith.constant 0 : index
    %c0_147 = arith.constant 0 : index
    %c0_148 = arith.constant 0 : index
    %180 = vector.load %arg29[%c0_146, %c0_147, %c0_148] : memref<2x32x8xf32, #tpu.memory_space<vmem>>, vector<2x32x8xf32>
    %181 = arith.truncf %180 : vector<2x32x8xf32> to vector<2x32x8xbf16>
    %c0_149 = arith.constant 0 : index
    %c0_150 = arith.constant 0 : index
    %c0_151 = arith.constant 0 : index
    %182 = vector.load %arg32[%c0_149, %c0_150, %c0_151] : memref<2x32x8xf32, #tpu.memory_space<vmem>>, vector<2x32x8xf32>
    %183 = arith.truncf %182 : vector<2x32x8xf32> to vector<2x32x8xbf16>
    %c0_152 = arith.constant 0 : index
    %c0_153 = arith.constant 0 : index
    %c0_154 = arith.constant 0 : index
    %184 = vector.load %arg33[%c0_152, %c0_153, %c0_154] : memref<2x32x8xf32, #tpu.memory_space<vmem>>, vector<2x32x8xf32>
    %185 = arith.truncf %184 : vector<2x32x8xf32> to vector<2x32x8xbf16>
    "tpu.trace_start"() <{level = 10 : i32, message = "bqd,bkd->bqk"}> : () -> ()
    %cst_155 = arith.constant dense<0.000000e+00> : vector<2x32x32xf32>
    %186 = tpu.matmul %181, %183, %cst_155 {dimension_numbers = #tpu.dot_dimension_numbers<[2], [2], [1], [1], [0, 0, 0, 1, 1, 1], [0], [0]>} : vector<2x32x8xbf16>, vector<2x32x8xbf16>, vector<2x32x32xf32> -> vector<2x32x32xf32>
    "tpu.trace_stop"() : () -> ()
    %187 = arith.addf %186, %139 : vector<2x32x32xf32>
    %cst_156 = arith.constant dense<0xFF800000> : vector<2x32xf32>
    %188 = vector.multi_reduction <maximumf>, %187, %cst_156 [2] : vector<2x32x32xf32> to vector<2x32xf32>
    %189 = vector.shape_cast %188 : vector<2x32xf32> to vector<2x32x1xf32>
    %190 = vector.broadcast %189 : vector<2x32x1xf32> to vector<2x32x32xf32>
    %191 = arith.subf %187, %190 : vector<2x32x32xf32>
    %192 = math.exp %191 : vector<2x32x32xf32>
    %cst_157 = arith.constant dense<0.000000e+00> : vector<2x32xf32>
    %193 = vector.multi_reduction <add>, %192, %cst_157 [2] : vector<2x32x32xf32> to vector<2x32xf32>
    %194 = vector.shape_cast %193 : vector<2x32xf32> to vector<2x32x1xf32>
    %195 = tpu.reciprocal %194 {approx = true} : vector<2x32x1xf32> -> vector<2x32x1xf32>
    %196 = vector.broadcast %195 : vector<2x32x1xf32> to vector<2x32x32xf32>
    %197 = arith.mulf %192, %196 : vector<2x32x32xf32>
    %198 = arith.truncf %197 : vector<2x32x32xf32> to vector<2x32x32xbf16>
    "tpu.trace_start"() <{level = 10 : i32, message = "bqk,bkd->bqd"}> : () -> ()
    %cst_158 = arith.constant dense<0.000000e+00> : vector<2x32x8xf32>
    %199 = tpu.matmul %198, %185, %cst_158 {dimension_numbers = #tpu.dot_dimension_numbers<[2], [1], [1], [2], [0, 0, 0, 1, 1, 2], [0], [0]>} : vector<2x32x32xbf16>, vector<2x32x8xbf16>, vector<2x32x8xf32> -> vector<2x32x8xf32>
    "tpu.trace_stop"() : () -> ()
    %200 = vector.extract_strided_slice %199 {offsets = [0, 0, 0], sizes = [2, 8, 8], strides = [1, 1, 1]} : vector<2x32x8xf32> to vector<2x8x8xf32>
    %201 = vector.shape_cast %200 : vector<2x8x8xf32> to vector<16x8xf32>
    %c0_159 = arith.constant 0 : index
    %c0_160 = arith.constant 0 : index
    %202 = vector.load %arg34[%c0_159, %c0_160] : memref<16x32xf32, #tpu.memory_space<vmem>>, vector<16x8xf32>
    tpu.vector_store %arg34[%c0_159, %c0_160], %201 {strides = array<i32>} : memref<16x32xf32, #tpu.memory_space<vmem>>, vector<16x8xf32>,
    %203 = vector.extract_strided_slice %199 {offsets = [0, 8, 0], sizes = [2, 8, 8], strides = [1, 1, 1]} : vector<2x32x8xf32> to vector<2x8x8xf32>
    %204 = vector.shape_cast %203 : vector<2x8x8xf32> to vector<16x8xf32>
    %c0_161 = arith.constant 0 : index
    %c8_162 = arith.constant 8 : index
    %205 = vector.load %arg34[%c0_161, %c8_162] : memref<16x32xf32, #tpu.memory_space<vmem>>, vector<16x8xf32>
    tpu.vector_store %arg34[%c0_161, %c8_162], %204 {strides = array<i32>} : memref<16x32xf32, #tpu.memory_space<vmem>>, vector<16x8xf32>,
    %206 = vector.extract_strided_slice %199 {offsets = [0, 16, 0], sizes = [2, 8, 8], strides = [1, 1, 1]} : vector<2x32x8xf32> to vector<2x8x8xf32>
    %207 = vector.shape_cast %206 : vector<2x8x8xf32> to vector<16x8xf32>
    %c0_163 = arith.constant 0 : index
    %c16_164 = arith.constant 16 : index
    %208 = vector.load %arg34[%c0_163, %c16_164] : memref<16x32xf32, #tpu.memory_space<vmem>>, vector<16x8xf32>
    tpu.vector_store %arg34[%c0_163, %c16_164], %207 {strides = array<i32>} : memref<16x32xf32, #tpu.memory_space<vmem>>, vector<16x8xf32>,
    %209 = vector.extract_strided_slice %199 {offsets = [0, 24, 0], sizes = [2, 8, 8], strides = [1, 1, 1]} : vector<2x32x8xf32> to vector<2x8x8xf32>
    %210 = vector.shape_cast %209 : vector<2x8x8xf32> to vector<16x8xf32>
    %c0_165 = arith.constant 0 : index
    %c24_166 = arith.constant 24 : index
    %211 = vector.load %arg34[%c0_165, %c24_166] : memref<16x32xf32, #tpu.memory_space<vmem>>, vector<16x8xf32>
    tpu.vector_store %arg34[%c0_165, %c24_166], %210 {strides = array<i32>} : memref<16x32xf32, #tpu.memory_space<vmem>>, vector<16x8xf32>,
    %c0_167 = arith.constant 0 : index
    %c0_168 = arith.constant 0 : index
    %212 = vector.load %arg34[%c0_167, %c0_168] : memref<16x32xf32, #tpu.memory_space<vmem>>, vector<16x32xf32>
    %213 = arith.truncf %212 : vector<16x32xf32> to vector<16x32xbf16>
    %cst_169 = arith.constant dense<0.000000e+00> : vector<16x32xf32>
    %214 = tpu.matmul %213, %141, %cst_169 {dimension_numbers = #tpu.dot_dimension_numbers<[1], [0], [0], [1], [0, 0, 1, 1], [], []>} : vector<16x32xbf16>, vector<32x32xbf16>, vector<16x32xf32> -> vector<16x32xf32>
    %215 = vector.broadcast %143 : vector<1x32xf32> to vector<16x32xf32>
    %216 = arith.addf %214, %215 : vector<16x32xf32>
    %217 = arith.addf %120, %216 : vector<16x32xf32>
    %c0_170 = arith.constant 0 : index
    %c0_171 = arith.constant 0 : index
    %c0_172 = arith.constant 0 : index
    %218 = vector.load %arg17[%c0_170, %c0_171, %c0_172] : memref<1x1x32xf32, #tpu.memory_space<vmem>>, vector<1x1x32xf32>
    %219 = vector.shape_cast %218 : vector<1x1x32xf32> to vector<1x32xf32>
    %c0_173 = arith.constant 0 : index
    %c0_174 = arith.constant 0 : index
    %c0_175 = arith.constant 0 : index
    %220 = vector.load %arg18[%c0_173, %c0_174, %c0_175] : memref<1x1x32xf32, #tpu.memory_space<vmem>>, vector<1x1x32xf32>
    %221 = vector.shape_cast %220 : vector<1x1x32xf32> to vector<1x32xf32>
    %cst_176 = arith.constant dense<0.000000e+00> : vector<16xf32>
    %222 = vector.multi_reduction <add>, %217, %cst_176 [1] : vector<16x32xf32> to vector<16xf32>
    %223 = vector.shape_cast %222 : vector<16xf32> to vector<16x1xf32>
    %cst_177 = arith.constant 3.200000e+01 : f32
    %224 = vector.broadcast %cst_177 : f32 to vector<16x1xf32>
    %225 = arith.divf %223, %224 : vector<16x1xf32>
    %226 = vector.broadcast %225 : vector<16x1xf32> to vector<16x32xf32>
    %227 = arith.subf %217, %226 : vector<16x32xf32>
    %228 = arith.mulf %227, %227 : vector<16x32xf32>
    %cst_178 = arith.constant dense<0.000000e+00> : vector<16xf32>
    %229 = vector.multi_reduction <add>, %228, %cst_178 [1] : vector<16x32xf32> to vector<16xf32>
    %230 = vector.shape_cast %229 : vector<16xf32> to vector<16x1xf32>
    %cst_179 = arith.constant 3.200000e+01 : f32
    %231 = vector.broadcast %cst_179 : f32 to vector<16x1xf32>
    %232 = arith.divf %230, %231 : vector<16x1xf32>
    %233 = vector.broadcast %225 : vector<16x1xf32> to vector<16x32xf32>
    %234 = arith.subf %217, %233 : vector<16x32xf32>
    %cst_180 = arith.constant 9.99999974E-6 : f32
    %235 = vector.broadcast %cst_180 : f32 to vector<16x1xf32>
    %236 = arith.addf %232, %235 : vector<16x1xf32>
    %237 = math.rsqrt %236 : vector<16x1xf32>
    %238 = vector.broadcast %237 : vector<16x1xf32> to vector<16x32xf32>
    %239 = arith.mulf %234, %238 : vector<16x32xf32>
    %240 = vector.broadcast %219 : vector<1x32xf32> to vector<16x32xf32>
    %241 = arith.mulf %239, %240 : vector<16x32xf32>
    %242 = vector.broadcast %221 : vector<1x32xf32> to vector<16x32xf32>
    %243 = arith.addf %241, %242 : vector<16x32xf32>
    %244 = arith.truncf %243 : vector<16x32xf32> to vector<16x32xbf16>
    %c0_181 = arith.constant 0 : index
    %c0_182 = arith.constant 0 : index
    %c0_183 = arith.constant 0 : index
    %245 = vector.load %arg19[%c0_181, %c0_182, %c0_183] : memref<1x32x128xbf16, #tpu.memory_space<vmem>>, vector<1x32x128xbf16>
    %246 = vector.shape_cast %245 : vector<1x32x128xbf16> to vector<32x128xbf16>
    %cst_184 = arith.constant dense<0.000000e+00> : vector<16x128xf32>
    %247 = tpu.matmul %244, %246, %cst_184 {dimension_numbers = #tpu.dot_dimension_numbers<[1], [0], [0], [1], [0, 0, 1, 1], [], []>} : vector<16x32xbf16>, vector<32x128xbf16>, vector<16x128xf32> -> vector<16x128xf32>
    %c0_185 = arith.constant 0 : index
    %c0_186 = arith.constant 0 : index
    %c0_187 = arith.constant 0 : index
    %248 = vector.load %arg20[%c0_185, %c0_186, %c0_187] : memref<1x1x128xf32, #tpu.memory_space<vmem>>, vector<1x1x128xf32>
    %249 = vector.shape_cast %248 : vector<1x1x128xf32> to vector<1x128xf32>
    %250 = vector.broadcast %249 : vector<1x128xf32> to vector<16x128xf32>
    %251 = arith.addf %247, %250 : vector<16x128xf32>
    %cst_188 = arith.constant 0.000000e+00 : f32
    %252 = vector.broadcast %cst_188 : f32 to vector<16x128xf32>
    %253 = arith.maximumf %251, %252 : vector<16x128xf32>
    %254 = arith.truncf %253 : vector<16x128xf32> to vector<16x128xbf16>
    %c0_189 = arith.constant 0 : index
    %c0_190 = arith.constant 0 : index
    %c0_191 = arith.constant 0 : index
    %255 = vector.load %arg21[%c0_189, %c0_190, %c0_191] : memref<1x128x32xbf16, #tpu.memory_space<vmem>>, vector<1x128x32xbf16>
    %256 = vector.shape_cast %255 : vector<1x128x32xbf16> to vector<128x32xbf16>
    %cst_192 = arith.constant dense<0.000000e+00> : vector<16x32xf32>
    %257 = tpu.matmul %254, %256, %cst_192 {dimension_numbers = #tpu.dot_dimension_numbers<[1], [0], [0], [1], [0, 0, 1, 1], [], []>} : vector<16x128xbf16>, vector<128x32xbf16>, vector<16x32xf32> -> vector<16x32xf32>
    %c0_193 = arith.constant 0 : index
    %c0_194 = arith.constant 0 : index
    %c0_195 = arith.constant 0 : index
    %258 = vector.load %arg22[%c0_193, %c0_194, %c0_195] : memref<1x1x32xf32, #tpu.memory_space<vmem>>, vector<1x1x32xf32>
    %259 = vector.shape_cast %258 : vector<1x1x32xf32> to vector<1x32xf32>
    %260 = vector.broadcast %259 : vector<1x32xf32> to vector<16x32xf32>
    %261 = arith.addf %257, %260 : vector<16x32xf32>
    %262 = arith.addf %243, %261 : vector<16x32xf32>
    %c0_196 = arith.constant 0 : index
    %c0_197 = arith.constant 0 : index
    %c0_198 = arith.constant 0 : index
    %263 = vector.load %arg23[%c0_196, %c0_197, %c0_198] : memref<1x1x32xf32, #tpu.memory_space<vmem>>, vector<1x1x32xf32>
    %264 = vector.shape_cast %263 : vector<1x1x32xf32> to vector<1x32xf32>
    %c0_199 = arith.constant 0 : index
    %c0_200 = arith.constant 0 : index
    %c0_201 = arith.constant 0 : index
    %265 = vector.load %arg24[%c0_199, %c0_200, %c0_201] : memref<1x1x32xf32, #tpu.memory_space<vmem>>, vector<1x1x32xf32>
    %266 = vector.shape_cast %265 : vector<1x1x32xf32> to vector<1x32xf32>
    %cst_202 = arith.constant dense<0.000000e+00> : vector<16xf32>
    %267 = vector.multi_reduction <add>, %262, %cst_202 [1] : vector<16x32xf32> to vector<16xf32>
    %268 = vector.shape_cast %267 : vector<16xf32> to vector<16x1xf32>
    %cst_203 = arith.constant 3.200000e+01 : f32
    %269 = vector.broadcast %cst_203 : f32 to vector<16x1xf32>
    %270 = arith.divf %268, %269 : vector<16x1xf32>
    %271 = vector.broadcast %270 : vector<16x1xf32> to vector<16x32xf32>
    %272 = arith.subf %262, %271 : vector<16x32xf32>
    %273 = arith.mulf %272, %272 : vector<16x32xf32>
    %cst_204 = arith.constant dense<0.000000e+00> : vector<16xf32>
    %274 = vector.multi_reduction <add>, %273, %cst_204 [1] : vector<16x32xf32> to vector<16xf32>
    %275 = vector.shape_cast %274 : vector<16xf32> to vector<16x1xf32>
    %cst_205 = arith.constant 3.200000e+01 : f32
    %276 = vector.broadcast %cst_205 : f32 to vector<16x1xf32>
    %277 = arith.divf %275, %276 : vector<16x1xf32>
    %278 = vector.broadcast %270 : vector<16x1xf32> to vector<16x32xf32>
    %279 = arith.subf %262, %278 : vector<16x32xf32>
    %cst_206 = arith.constant 9.99999974E-6 : f32
    %280 = vector.broadcast %cst_206 : f32 to vector<16x1xf32>
    %281 = arith.addf %277, %280 : vector<16x1xf32>
    %282 = math.rsqrt %281 : vector<16x1xf32>
    %283 = vector.broadcast %282 : vector<16x1xf32> to vector<16x32xf32>
    %284 = arith.mulf %279, %283 : vector<16x32xf32>
    %285 = vector.broadcast %264 : vector<1x32xf32> to vector<16x32xf32>
    %286 = arith.mulf %284, %285 : vector<16x32xf32>
    %287 = vector.broadcast %266 : vector<1x32xf32> to vector<16x32xf32>
    %288 = arith.addf %286, %287 : vector<16x32xf32>
    %c0_207 = arith.constant 0 : index
    %c0_208 = arith.constant 0 : index
    %289 = vector.load %arg28[%c0_207, %c0_208] : memref<16x32xf32, #tpu.memory_space<vmem>>, vector<16x32xf32>
    tpu.vector_store %arg28[%c0_207, %c0_208], %288 {strides = array<i32>} : memref<16x32xf32, #tpu.memory_space<vmem>>, vector<16x32xf32>,
    %c1_i32 = arith.constant 1 : i32
    %290 = arith.cmpi eq, %arg0, %c1_i32 : i32
    %291 = arith.extui %290 : i1 to i32
    %c0_i32_209 = arith.constant 0 : i32
    %292 = arith.cmpi ne, %291, %c0_i32_209 : i32
    scf.if %292 {
      %c0_210 = arith.constant 0 : index
      %c0_211 = arith.constant 0 : index
      %293 = vector.load %arg28[%c0_210, %c0_211] : memref<16x32xf32, #tpu.memory_space<vmem>>, vector<16x32xf32>
      %294 = arith.truncf %293 : vector<16x32xf32> to vector<16x32xbf16>
      %c0_212 = arith.constant 0 : index
      %c0_213 = arith.constant 0 : index
      %295 = vector.load %arg25[%c0_212, %c0_213] : memref<32x128xbf16, #tpu.memory_space<vmem>>, vector<32x128xbf16>
      %cst_214 = arith.constant dense<0.000000e+00> : vector<16x128xf32>
      %296 = tpu.matmul %294, %295, %cst_214 {dimension_numbers = #tpu.dot_dimension_numbers<[1], [0], [0], [1], [0, 0, 1, 1], [], []>} : vector<16x32xbf16>, vector<32x128xbf16>, vector<16x128xf32> -> vector<16x128xf32>
      %c0_215 = arith.constant 0 : index
      %c0_216 = arith.constant 0 : index
      %297 = vector.load %arg26[%c0_215, %c0_216] : memref<1x128xf32, #tpu.memory_space<vmem>>, vector<1x128xf32>
      %298 = vector.broadcast %297 : vector<1x128xf32> to vector<16x128xf32>
      %299 = arith.addf %296, %298 : vector<16x128xf32>
      %c0_217 = arith.constant 0 : index
      %c0_218 = arith.constant 0 : index
      %300 = vector.load %arg27[%c0_217, %c0_218] : memref<16x128xf32, #tpu.memory_space<vmem>>, vector<16x128xf32>
      tpu.vector_store %arg27[%c0_217, %c0_218], %299 {strides = array<i32>} : memref<16x128xf32, #tpu.memory_space<vmem>>, vector<16x128xf32>,
    } else {
    }
    return
  }
  func.func @transform_0(%arg0: i32) -> (i32, i32) {
    %c0_i32 = arith.constant 0 : i32
    %c0_i32_0 = arith.constant 0 : i32
    %c0_i32_1 = arith.constant 0 : i32
    return %c0_i32, %c0_i32_0 : i32, i32
  }
  func.func @transform_1(%arg0: i32) -> (i32, i32) {
    %c0_i32 = arith.constant 0 : i32
    %c0_i32_0 = arith.constant 0 : i32
    %c0_i32_1 = arith.constant 0 : i32
    return %c0_i32, %c0_i32_0 : i32, i32
  }
  func.func @transform_2(%arg0: i32) -> (i32, i32, i32) {
    %c0_i32 = arith.constant 0 : i32
    %c0_i32_0 = arith.constant 0 : i32
    %c0_i32_1 = arith.constant 0 : i32
    %c0_i32_2 = arith.constant 0 : i32
    return %c0_i32, %c0_i32_0, %c0_i32_1 : i32, i32, i32
  }
  func.func @transform_3(%arg0: i32) -> (i32, i32, i32) {
    %c0_i32 = arith.constant 0 : i32
    %c0_i32_0 = arith.constant 0 : i32
    %c0_i32_1 = arith.constant 0 : i32
    %c0_i32_2 = arith.constant 0 : i32
    return %c0_i32, %c0_i32_0, %c0_i32_1 : i32, i32, i32
  }
  func.func @transform_4(%arg0: i32) -> (i32, i32, i32) {
    %c0_i32 = arith.constant 0 : i32
    %c0_i32_0 = arith.constant 0 : i32
    %c0_i32_1 = arith.constant 0 : i32
    return %arg0, %c0_i32, %c0_i32_0 : i32, i32, i32
  }
  func.func @transform_5(%arg0: i32) -> (i32, i32, i32) {
    %c0_i32 = arith.constant 0 : i32
    %c0_i32_0 = arith.constant 0 : i32
    %c0_i32_1 = arith.constant 0 : i32
    return %arg0, %c0_i32, %c0_i32_0 : i32, i32, i32
  }
  func.func @transform_6(%arg0: i32) -> (i32, i32, i32) {
    %c0_i32 = arith.constant 0 : i32
    %c0_i32_0 = arith.constant 0 : i32
    %c0_i32_1 = arith.constant 0 : i32
    return %arg0, %c0_i32, %c0_i32_0 : i32, i32, i32
  }
  func.func @transform_7(%arg0: i32) -> (i32, i32, i32) {
    %c0_i32 = arith.constant 0 : i32
    %c0_i32_0 = arith.constant 0 : i32
    %c0_i32_1 = arith.constant 0 : i32
    return %arg0, %c0_i32, %c0_i32_0 : i32, i32, i32
  }
  func.func @transform_8(%arg0: i32) -> (i32, i32, i32) {
    %c0_i32 = arith.constant 0 : i32
    %c0_i32_0 = arith.constant 0 : i32
    %c0_i32_1 = arith.constant 0 : i32
    return %arg0, %c0_i32, %c0_i32_0 : i32, i32, i32
  }
  func.func @transform_9(%arg0: i32) -> (i32, i32, i32) {
    %c0_i32 = arith.constant 0 : i32
    %c0_i32_0 = arith.constant 0 : i32
    %c0_i32_1 = arith.constant 0 : i32
    return %arg0, %c0_i32, %c0_i32_0 : i32, i32, i32
  }
  func.func @transform_10(%arg0: i32) -> (i32, i32, i32) {
    %c0_i32 = arith.constant 0 : i32
    %c0_i32_0 = arith.constant 0 : i32
    %c0_i32_1 = arith.constant 0 : i32
    return %arg0, %c0_i32, %c0_i32_0 : i32, i32, i32
  }
  func.func @transform_11(%arg0: i32) -> (i32, i32, i32) {
    %c0_i32 = arith.constant 0 : i32
    %c0_i32_0 = arith.constant 0 : i32
    %c0_i32_1 = arith.constant 0 : i32
    return %arg0, %c0_i32, %c0_i32_0 : i32, i32, i32
  }
  func.func @transform_12(%arg0: i32) -> (i32, i32, i32) {
    %c0_i32 = arith.constant 0 : i32
    %c0_i32_0 = arith.constant 0 : i32
    %c0_i32_1 = arith.constant 0 : i32
    return %arg0, %c0_i32, %c0_i32_0 : i32, i32, i32
  }
  func.func @transform_13(%arg0: i32) -> (i32, i32, i32) {
    %c0_i32 = arith.constant 0 : i32
    %c0_i32_0 = arith.constant 0 : i32
    %c0_i32_1 = arith.constant 0 : i32
    return %arg0, %c0_i32, %c0_i32_0 : i32, i32, i32
  }
  func.func @transform_14(%arg0: i32) -> (i32, i32, i32) {
    %c0_i32 = arith.constant 0 : i32
    %c0_i32_0 = arith.constant 0 : i32
    %c0_i32_1 = arith.constant 0 : i32
    return %arg0, %c0_i32, %c0_i32_0 : i32, i32, i32
  }
  func.func @transform_15(%arg0: i32) -> (i32, i32, i32) {
    %c0_i32 = arith.constant 0 : i32
    %c0_i32_0 = arith.constant 0 : i32
    %c0_i32_1 = arith.constant 0 : i32
    return %arg0, %c0_i32, %c0_i32_0 : i32, i32, i32
  }
  func.func @transform_16(%arg0: i32) -> (i32, i32, i32) {
    %c0_i32 = arith.constant 0 : i32
    %c0_i32_0 = arith.constant 0 : i32
    %c0_i32_1 = arith.constant 0 : i32
    return %arg0, %c0_i32, %c0_i32_0 : i32, i32, i32
  }
  func.func @transform_17(%arg0: i32) -> (i32, i32, i32) {
    %c0_i32 = arith.constant 0 : i32
    %c0_i32_0 = arith.constant 0 : i32
    %c0_i32_1 = arith.constant 0 : i32
    return %arg0, %c0_i32, %c0_i32_0 : i32, i32, i32
  }
  func.func @transform_18(%arg0: i32) -> (i32, i32, i32) {
    %c0_i32 = arith.constant 0 : i32
    %c0_i32_0 = arith.constant 0 : i32
    %c0_i32_1 = arith.constant 0 : i32
    return %arg0, %c0_i32, %c0_i32_0 : i32, i32, i32
  }
  func.func @transform_19(%arg0: i32) -> (i32, i32, i32) {
    %c0_i32 = arith.constant 0 : i32
    %c0_i32_0 = arith.constant 0 : i32
    %c0_i32_1 = arith.constant 0 : i32
    return %arg0, %c0_i32, %c0_i32_0 : i32, i32, i32
  }
  func.func @transform_20(%arg0: i32) -> (i32, i32, i32) {
    %c0_i32 = arith.constant 0 : i32
    %c0_i32_0 = arith.constant 0 : i32
    %c0_i32_1 = arith.constant 0 : i32
    return %arg0, %c0_i32, %c0_i32_0 : i32, i32, i32
  }
  func.func @transform_21(%arg0: i32) -> (i32, i32, i32) {
    %c0_i32 = arith.constant 0 : i32
    %c0_i32_0 = arith.constant 0 : i32
    %c0_i32_1 = arith.constant 0 : i32
    return %arg0, %c0_i32, %c0_i32_0 : i32, i32, i32
  }
  func.func @transform_22(%arg0: i32) -> (i32, i32, i32) {
    %c0_i32 = arith.constant 0 : i32
    %c0_i32_0 = arith.constant 0 : i32
    %c0_i32_1 = arith.constant 0 : i32
    return %arg0, %c0_i32, %c0_i32_0 : i32, i32, i32
  }
  func.func @transform_23(%arg0: i32) -> (i32, i32, i32) {
    %c0_i32 = arith.constant 0 : i32
    %c0_i32_0 = arith.constant 0 : i32
    %c0_i32_1 = arith.constant 0 : i32
    return %arg0, %c0_i32, %c0_i32_0 : i32, i32, i32
  }
  func.func @transform_24(%arg0: i32) -> (i32, i32) {
    %c0_i32 = arith.constant 0 : i32
    %c0_i32_0 = arith.constant 0 : i32
    %c0_i32_1 = arith.constant 0 : i32
    return %c0_i32, %c0_i32_0 : i32, i32
  }
  func.func @transform_25(%arg0: i32) -> (i32, i32) {
    %c0_i32 = arith.constant 0 : i32
    %c0_i32_0 = arith.constant 0 : i32
    %c0_i32_1 = arith.constant 0 : i32
    return %c0_i32, %c0_i32_0 : i32, i32
  }
  func.func @transform_26(%arg0: i32) -> (i32, i32) {
    %c0_i32 = arith.constant 0 : i32
    %c0_i32_0 = arith.constant 0 : i32
    %c0_i32_1 = arith.constant 0 : i32
    return %c0_i32, %c0_i32_0 : i32, i32
  }
}

</mosaic_0001>

<bundles_post_ra>
// kernel: transformer_forward.4
= control target key start
LH: loop header
LB: loop body
LE: loop exit
PB: predicated region body
PF: predicated region fallthrough
CT: control target
= control target key end

     0   :  { %v531_v1 = vmov 0.0   ;;  %vm532_vm0 = vmmov 0   ;;  %vm257_vm1 = vcmask 523264   ;;  %v533_v42 = vmov 0   ;;  %s675_s1 = inlined_call_operand.vmem [shape: bf16[256,64], index: 1, kind: input, shape index: {}]   ;;  %s676_s0 = inlined_call_operand.vmem [shape: f32[2,256], index: 0, kind: input, shape index: {}]   ;;  %s677_s3 = inlined_call_operand.vmem [shape: bf16[64,64], index: 3, kind: input, shape index: {}]   ;;  %s678_s5 = inlined_call_operand.vmem [shape: bf16[64,256], index: 5, kind: input, shape index: {}]   ;;  %s679_s2 = inlined_call_operand.vmem [shape: f32[1,64], index: 2, kind: input, shape index: {}]   ;;  %s680_s4 = inlined_call_operand.vmem [shape: f32[1,64], index: 4, kind: input, shape index: {}]   ;;  %s681_s6 = inlined_call_operand.vmem [shape: f32[1,256], index: 6, kind: input, shape index: {}]   ;;  %s682_s7 = inlined_call_operand.vmem [shape: f32[2,256], index: 7, kind: output, shape index: {}]  }
   0x1   :  { %v499_v0 = vld [vmem:[%s675_s1 + $0x78] sm:$0xff]   ;;  %484 = vmatprep.subr.bf16.mxu1 %v531_v1  ;;  %v501_v3 = vld [vmem:[%s675_s1 + $0x70] sm:$0xff]   ;;  %v503_v5 = vld [vmem:[%s675_s1 + $0x68] sm:$0xff]   ;;  %492 = vmatprep.mubr.msk.bf16.mxu1 %vm532_vm0, %v531_v1  ;;  %v313_v51 = vlaneseq }
   0x2   :  { %v500_v2 = vld [vmem:[%s675_s1 + $0x38] sm:$0xff]   ;;  %457 = vmatprep.subr.bf16.mxu0 %v499_v0  ;;  %v502_v4 = vld [vmem:[%s675_s1 + $0x30] sm:$0xff]   ;;  %v504_v6 = vld [vmem:[%s675_s1 + $0x28] sm:$0xff]  }
   0x3   :  { %458 = vmatpush3.bf16.msra.mxu0 %v500_v2  ;;  %v505_v7 = vld [vmem:[%s675_s1 + $0x60] sm:$0xff]   ;;  %v507_v9 = vld [vmem:[%s675_s1 + $0x58] sm:$0xff]   ;;  %v509_v11 = vld [vmem:[%s675_s1 + $0x50] sm:$0xff]   ;;  %v314_v52 = vshrl.u32 %v313_v51, 7 }
   0x4   :  { %459 = vmatprep.subr.bf16.mxu0 %v501_v3  ;;  %v506_v8 = vld [vmem:[%s675_s1 + $0x20] sm:$0xff]   ;;  %v508_v10 = vld [vmem:[%s675_s1 + $0x18] sm:$0xff]   ;;  %v510_v15 = vld [vmem:[%s675_s1 + $0x10] sm:$0xff]  }
   0x5   :  { %v423_v12 = vld.sshfl [vmem:[%s676_s0] sm:$0x33 pattern:$0x76325410]  ;;  %v515_v14 = vld [vmem:[%s677_s3 + $0x18] sm:$0xff]   ;;  %v511_v17 = vld [vmem:[%s675_s1 + $0x48] sm:$0xff]  }
   0x6   :  { %v36_v13 = vcombine.high %v423_v12, %v423_v12  ;;  %485 = vmatpush3.bf16.msra.mxu1 %v515_v14  ;;  %v512_v18 = vld [vmem:[%s675_s1 + $0x8] sm:$0xff]   ;;  %v513_v19 = vld [vmem:[%s675_s1 + $0x40] sm:$0xff]   ;;  %v39_v21 = vpack.c.bf16 %v423_v12, %v423_v12  ;;  %v516_v22 = vld [vmem:[%s677_s3 + $0x10] sm:$0xff]   ;;  %v315_v53 = vsub.s32 0, %v314_v52  ;;  %v319_v54 = vsub.s32 1, %v314_v52 }
   0x7   :  { %460 = vmatpush3.bf16.msra.mxu0 %v502_v4  ;;  %486 = vmatprep.subr.bf16.mxu1 %v531_v1  ;;  %v514_v20 = vld [vmem:[%s675_s1] sm:$0xff]   ;;  %v517_v23 = vld [vmem:[%s677_s3 + $0x8] sm:$0xff]   ;;  %v521_v25 = vld [vmem:[%s678_s5 + $0x34] ss:$8 sps:$4 sm:$0xff]  }
   0x8   :  { %461 = vmatprep.subr.bf16.mxu0 %v503_v5  ;;  %v40_v16 = vpack.c.bf16 %v36_v13, %v36_v13  ;;  %v518_v24 = vld [vmem:[%s677_s3] sm:$0xff]   ;;  %v519_v34 = vld [vmem:[%s678_s5 + $0x30] ss:$8 sps:$4 sm:$0xff]   ;;  %v527_v38 = vld [vmem:[%s678_s5 + $0x14] ss:$8 sps:$4 sm:$0xff]  }
   0x9   :  { %v424_v27 = vld [vmem:[%s679_s2] ss:$0 sm:$0xff]  ;;  %v524_v36 = vld [vmem:[%s678_s5 + $0x24] ss:$8 sps:$4 sm:$0xff]   ;;  %v525_v39 = vld [vmem:[%s678_s5 + $0x10] ss:$8 sps:$4 sm:$0xff]  }
   0xa   :  { %208 = vmatprep.mubr.bf16.mxu0 %v40_v16  ;;  %487 = vmatpush3.bf16.msra.mxu1 %v516_v22  ;;  %v522_v37 = vld [vmem:[%s678_s5 + $0x20] ss:$8 sps:$4 sm:$0xff]   ;;  %v530_v40 = vld [vmem:[%s678_s5 + $0x4] ss:$8 sps:$4 sm:$0xff]  }
   0xb   :  { %462 = vmatpush3.bf16.msra.mxu0 %v504_v6  ;;  %488 = vmatprep.subr.bf16.mxu1 %v531_v1  ;;  %v528_v41 = vld [vmem:[%s678_s5] ss:$8 sps:$4 sm:$0xff]  }
   0xc   :  { %463 = vmatprep.subr.bf16.mxu0 %v505_v7  ;;  %v441_v43 = vld [vmem:[%s680_s4] ss:$0 sm:$0xff] }
   0xd   :  { %v311_v55 = vld [vmem:[%s681_s6] sm:$0x3] }
   0xe   :  { %489 = vmatpush3.bf16.msra.mxu1 %v517_v23  ;;  %v316_v56 = vrot.slane %v311_v55, %v315_v53  ;;  %v320_v57 = vrot.slane %v311_v55, %v319_v54 }
   0xf   :  { %464 = vmatpush3.bf16.msra.mxu0 %v506_v8  ;;  %490 = vmatprep.subr.bf16.mxu1 %v531_v1 }
  0x10   :  { %465 = vmatprep.subr.bf16.mxu0 %v507_v9 }
  0x12   :  { %491 = vmatpush3.bf16.msra.mxu1 %v518_v24 }
  0x13   :  { %466 = vmatpush3.bf16.msra.mxu0 %v508_v10  ;;  %374 = vmatprep.subr.bf16.mxu1 %v521_v25 }
  0x14   :  { %467 = vmatprep.subr.bf16.mxu0 %v509_v11 }
  0x17   :  { %468 = vmatpush3.bf16.msra.mxu0 %v510_v15 }
  0x18   :  { %469 = vmatprep.subr.bf16.mxu0 %v511_v17 }
  0x1b   :  { %470 = vmatpush3.bf16.msra.mxu0 %v512_v18 }
  0x1c   :  { %471 = vmatprep.subr.bf16.mxu0 %v513_v19 }
  0x1f   :  { %472 = vmatpush3.bf16.msra.mxu0 %v514_v20 }
  0x22   :  { %209 = vmatmul.mubr.bf16.vlgmr.msra.gmra.mxu0 %v39_v21 }
  0xe2   :  { %v473_v26 = vpop.f32.mrf.mxu0 }
  0xe4   :  { %v474_v28 = vpop.f32.mrf.mxu0 }
  0xe5   :  { %v475_v29 = vadd.f32 %v474_v28, %v473_v26 }
  0xe6   :  { %v476_v30 = vpop.f32.mrf.mxu0 }
  0xe7   :  { %v211_v31 = vadd.f32 %v475_v29, %v424_v27 }
  0xe8   :  { %v477_v32 = vpop.f32.mrf.mxu0 }
  0xe9   :  { %v216_v33 = vmax.f32 %v211_v31, 0.0 }
  0xeb   :  { %v217_v35 = vpack.c.bf16 %v216_v33, %v216_v33 }
  0xed   :  { %493 = vmatmul.mubr.msk.bf16.vlgmr.msra.gmra.mxu1 %vm257_vm1, %v217_v35 }
  0xee   :  { %375 = vmatpush1.bf16.msra.mxu1 %v519_v34  ;;  %398 = vmatprep.mubr.bf16.mxu1 %v533_v42 }
  0xef   :  { %376 = vmatprep.subr.bf16.mxu1 %v524_v36 }
  0xf2   :  { %377 = vmatpush1.bf16.msra.mxu1 %v522_v37 }
  0xf3   :  { %378 = vmatprep.subr.bf16.mxu1 %v527_v38 }
  0xf6   :  { %379 = vmatpush1.bf16.msra.mxu1 %v525_v39 }
  0xf7   :  { %380 = vmatprep.subr.bf16.mxu1 %v530_v40 }
  0xfa   :  { %381 = vmatpush1.bf16.msra.mxu1 %v528_v41 }
 0x1ad   :  { %v295_v44 = vpop.f32.mrf.mxu1 }
 0x1ae   :  { %v296_v45 = vadd.f32 %v441_v43, %v295_v44 }
 0x1af   :  { %v494_v46 = vpop.f32.mrf.mxu1 }
 0x1b0   :  { %v301_v47 = vmax.f32 %v296_v45, 0.0 }
 0x1b1   :  { %v298_v48 = vpop.f32.mrf.mxu1 }
 0x1b2   :  { %v302_v49 = vpack.c.bf16 %v301_v47, %v301_v47 }
 0x1b3   :  { %v495_v50 = vpop.f32.mrf.mxu1 }
 0x1b4   :  { %455 = vmatmul.mubr.msk.bf16.vlgmr.msra.gmra.mxu1 %vm257_vm1, %v302_v49 }
 0x274   :  { %v400_v58 = vpop.f32.mrf.mxu1 }
 0x275   :  { %v401_v60 = vadd.f32 %v400_v58, %v316_v56 }
 0x276   :  { %v402_v59 = vpop.f32.mrf.mxu1 }
 0x277   :  { %v403_v61 = vadd.f32 %v402_v59, %v320_v57 }
 0x278   :  { %v404_v62 = vpop.f32.mrf.mxu1 }
 0x279   :  { %v409_v63 = vcombine.low %v401_v60, %v403_v61 }
 0x27a   :  { %v405_v0 = vpop.f32.mrf.mxu1 }
 0x27b   :  { %456 = vst.sshfl [vmem:[%s682_s7] sm:$0x33 pattern:$0x76325410] %v409_v63 }

// kernel: transformer_forward.3
= control target key start
LH: loop header
LB: loop body
LE: loop exit
PB: predicated region body
PF: predicated region fallthrough
CT: control target
= control target key end

     0   :  { %s2029_s29 = smov 0   ;;  %s2343_s0 = inlined_call_operand.vmem [shape: f32[16,32], index: 0, kind: input, shape index: {}]   ;;  %s2344_s1 = inlined_call_operand.vmem [shape: f32[2,32,32], index: 1, kind: input, shape index: {}]   ;;  %s2345_s2 = inlined_call_operand.vmem [shape: bf16[2,32,96], index: 2, kind: input, shape index: {}]   ;;  %s2346_s3 = inlined_call_operand.vmem [shape: f32[2,1,96], index: 3, kind: input, shape index: {}]   ;;  %s2347_s4 = inlined_call_operand.vmem [shape: bf16[2,32,32], index: 4, kind: input, shape index: {}]   ;;  %s2348_s5 = inlined_call_operand.vmem [shape: f32[2,1,32], index: 5, kind: input, shape index: {}]   ;;  %s2349_s6 = inlined_call_operand.vmem [shape: f32[2,1,32], index: 6, kind: input, shape index: {}]   ;;  %s2350_s7 = inlined_call_operand.vmem [shape: f32[2,1,32], index: 7, kind: input, shape index: {}]   ;;  %s2351_s8 = inlined_call_operand.vmem [shape: bf16[2,32,128], index: 8, kind: input, shape index: {}]   ;;  %s2352_s9 = inlined_call_operand.vmem [shape: f32[2,1,128], index: 9, kind: input, shape index: {}]   ;;  %s2353_s10 = inlined_call_operand.vmem [shape: bf16[2,128,32], index: 10, kind: input, shape index: {}]   ;;  %s2354_s11 = inlined_call_operand.vmem [shape: f32[2,1,32], index: 11, kind: input, shape index: {}]   ;;  %s2355_s12 = inlined_call_operand.vmem [shape: f32[2,1,32], index: 12, kind: input, shape index: {}]   ;;  %s2356_s13 = inlined_call_operand.vmem [shape: f32[2,1,32], index: 13, kind: input, shape index: {}]   ;;  %s2357_s14 = inlined_call_operand.vmem [shape: f32[16,32], index: 14, kind: output, shape index: {}]  }
   0x1   :  { %2363 = sst [smem:[#allocation7_spill]] %s2343_s0 }
   0x2   :  { %2364 = sst [smem:[#allocation8_spill]] %s2344_s1 }
   0x3   :  { %2365 = sst [smem:[#allocation9_spill]] %s2345_s2 }
   0x4   :  { %2366 = sst [smem:[#allocation10_spill]] %s2347_s4 }
   0x5   :  { %2367 = sst [smem:[#allocation11_spill]] %s2357_s14 }
   0x6 LB: > { %2368 = sst [smem:[#allocation6_spill]] %s1936_s29  ;;  %s1686_s30 = sadd.s32 4294967295, %s1936_s29   ;;  %s1936_s29 = sphi %s2029_s29, %s24_s29  }
   0x7   : > { %p1689_p0 = scmp.ge.s32.totalorder %s1936_s29, 1  ;;  %p501_p1 = scmp.lt.s32.totalorder %s1936_s29, 3 }
   0x9   : > { %p502_p2 = pnand %p1689_p0, %p501_p1 }
   0xa   : > { %p581_p3 = scmp.lt.s32.totalorder (!%p502_p2), %s1686_s30, 1  ;;  %s2369_s2 = sld [smem:[#allocation9_spill]] (!%p502_p2) }
   0xb   : > { %505 = sbr.rel (%p502_p2) target bundleno = 2472 (0x9a8), region = 76  ;;  %s2370_s4 = sld [smem:[#allocation10_spill]] (!%p502_p2) }
   0xc   : > { %p1698_p4 = scmp.ne.s32.totalorder (!%p502_p2), %s1686_s30, 0 }
  0x10   : > { %s2037_s15 = scalar_select %p581_p3, %s1686_s30, 1 }
  0x11   : > { %s2372_s29 = sld [smem:[#allocation11_spill]] (!%p1698_p4) }
  0x12   : > { %s1734_s16 = sshll.u32 %s2037_s15, 4  ;;  %s618_s0 = scalar_lea.vmem %s2354_s11, %s2037_s15 }
  0x13   : > { %s585_s22 = scalar_lea.vmem %s2369_s2, %s1734_s16  ;;  %s2050_s25 = scalar_lea.vmem %s2370_s4, %s1734_s16 }
  0x14   : > { %s2067_s21 = scalar_lea.vmem %s2351_s8, %s1734_s16  ;;  %s1737_s4 = sshll.u32 %s2037_s15, 6 }
  0x15   : > { %s2077_s28 = scalar_lea.vmem %s2353_s10, %s1737_s4  ;;  %s621_s19 = scalar_lea.vmem %s2355_s12, %s2037_s15 }
  0x16   : > { %s624_s14 = scalar_lea.vmem %s2356_s13, %s2037_s15  ;;  %629 = sbr.rel (%p1698_p4) target bundleno = 31 (0x1f), region = 80 }
  0x17   : > { %s2371_s2 = sld [smem:[#allocation7_spill]] (!%p1698_p4) }
  0x1b   : > { %vm632_vm0 = vcmask 261120  }
  0x1d   : > { %v630_v0 = vld [vmem:[%s2371_s2] sm:$0xff]  ;;  %v631_v1 = vld [vmem:[%s2371_s2 + $0x8] sm:$0xff] }
  0x1e   : > { %633 = vst.msk [vmem:[%s2372_s29] sm:$0xff] %vm632_vm0, %v630_v0  ;;  %634 = vst.msk [vmem:[%s2372_s29 + $0x8] sm:$0xff] %vm632_vm0, %v631_v1 }
  0x1f PF: > { %v1876_v2 = vld [vmem:[%s585_s22 + $0x8] sm:$0xff]   ;;  %v1938_v3 = vmov 0.0   ;;  %v1877_v4 = vld [vmem:[%s585_s22] sm:$0xff]   ;;  %vm1939_vm1 = vmmov 0   ;;  %s2373_s20 = sld [smem:[#allocation11_spill]]  ;;  %vm661_vm2 = vcmask 261120   ;;  %s2374_s26 = scalar_lea.vmem %s2346_s3, %s2037_s15 }
  0x20   : > { %1772 = vmatprep.subr.bf16.mxu0 %v1938_v3  ;;  %1776 = vmatprep.mubr.msk.bf16.mxu0 %vm1939_vm1, %v1938_v3  ;;  %v1699_v8 = vld [vmem:[%s2374_s26] ss:$0 sm:$0xff]  ;;  %vm719_vm3 = vcmask 64512   ;;  %s1940_s27 = smov 96   ;;  %s1941_s1 = smov 80   ;;  %vm1182_vm4 = vcmask 130112  }
  0x21   : > { %1773 = vmatpush3.bf16.msra.mxu0 %v1876_v2  ;;  %s1942_s29 = smov 88   ;;  %s1943_s18 = smov 72   ;;  %vm1193_vm5 = vcmask 195712   ;;  %vm1204_vm6 = vcmask 261312  }
  0x22   : > { %1774 = vmatprep.subr.bf16.mxu0 %v1938_v3  ;;  %s1944_s17 = smov 120   ;;  %s1945_s30 = smov 112  }
  0x23   : > { %s1946_s16 = smov 104   ;;  %s2375_s22 = sld [smem:[#allocation8_spill]] }
  0x24   : > { %s2376_s4 = scalar_lea.vmem %s2348_s5, %s2037_s15 }
  0x25   : > { %v2109_v5 = vld [vmem:[%s2373_s20] sm:$0xff]  ;;  %v2114_v6 = vld [vmem:[%s2373_s20 + $0x8] sm:$0xff]  ;;  %1775 = vmatpush3.bf16.msra.mxu0 %v1877_v4 }
  0x26   : > { %v637_v7 = vpack.c.bf16 %v2114_v6, %v2109_v5 }
  0x28   : > { %1777 = vmatmul.mubr.msk.bf16.vlgmr.msra.gmra.mxu0 %vm661_vm2, %v637_v7 }
  0x29   : > { %v708_v57 = vld [vmem:[%s2375_s22 + $0x10] sm:$0xff]  ;;  %v706_v59 = vld [vmem:[%s2375_s22] sm:$0xff]  ;;  %v709_v62 = vld [vmem:[%s2375_s22 + $0x18] sm:$0xff] }
  0x2a   : > { %v707_v2 = vld [vmem:[%s2375_s22 + $0x8] sm:$0xff] }
  0xe8   : > { %v699_v9 = vpop.f32.mrf.mxu0 }
  0xe9   : > { %v2125_v10 = vadd.f32 %v1699_v8, %v699_v9 }
  0xea   : > { %v1778_v11 = vpop.f32.mrf.mxu0 }
  0xeb   : > { %724 = vrot.lane.b32.xlu1 %v2125_v10, %s1940_s27  ;;  %772 = vrot.lane.b32.xlu0 %v2125_v10, %s1941_s1  ;;  %720 = vst.msk [vmem:[#allocation2] sm:$0xff] %vm719_vm3, %v2125_v10 }
  0xec   : > { %v702_v12 = vpop.f32.mrf.mxu0 }
  0xed   : > { %v2131_v13 = vadd.f32 %v1699_v8, %v702_v12 }
  0xee   : > { %v1779_v14 = vpop.f32.mrf.mxu0 }
  0xef   : > { %748 = vrot.lane.b32.xlu1 %v2125_v10, %s1942_s29  ;;  %796 = vrot.lane.b32.xlu0 %v2125_v10, %s1943_s18  ;;  %721 = vst.msk [vmem:[#allocation2 + $0x20] sm:$0xff] %vm719_vm3, %v2131_v13  ;;  %v712_v14 = vld [vmem:[%s2375_s22 + $0x30] sm:$0xff] }
  0xf2   : > { %v812_v32 = vld [vmem:[#allocation2] sm:$0xff] }
  0xf3   : > { %740 = vrot.lane.b32.xlu0 %v2125_v10, %s1944_s17  ;;  %774 = vrot.lane.b32.xlu1 %v2131_v13, %s1941_s1  ;;  %s1947_s1 = smov 48  }
  0xf6   : > { %v816_v44 = vld [vmem:[#allocation2 + $0x20] sm:$0xff] }
  0xf7   : > { %798 = vrot.lane.b32.xlu0 %v2131_v13, %s1943_s18  ;;  %764 = vrot.lane.b32.xlu1 %v2125_v10, %s1945_s30  ;;  %s1949_s18 = smov 64  }
  0xfb   : > { %788 = vrot.lane.b32.xlu0 %v2125_v10, %s1946_s16  ;;  %726 = vrot.lane.b32.xlu1 %v2131_v13, %s1940_s27  ;;  %s2377_s27 = scalar_lea.vmem %s2349_s6, %s2037_s15 }
  0xff   : > { %750 = vrot.lane.b32.xlu0 %v2131_v13, %s1942_s29  ;;  %742 = vrot.lane.b32.xlu1 %v2131_v13, %s1944_s17  ;;  %s1948_s29 = smov 40   ;;  %s1950_s17 = smov 56  }
 0x103   : > { %766 = vrot.lane.b32.xlu0 %v2131_v13, %s1945_s30  ;;  %790 = vrot.lane.b32.xlu1 %v2131_v13, %s1946_s16  ;;  %s1951_s30 = smov 16   ;;  %s1952_s16 = smov 8  }
 0x15d   : > { %v725_v15 = vpop.permute.xlu1 %724  ;;  %v773_v16 = vpop.permute.xlu0 %772 }
 0x15e   : > { %730 = vst.msk [vmem:[#allocation3] sm:$0xff] %vm719_vm3, %v725_v15  ;;  %778 = vst.msk [vmem:[#allocation3 + $0x10] sm:$0xff] %vm719_vm3, %v773_v16  ;;  %v710_v16 = vld [vmem:[%s2375_s22 + $0x20] sm:$0xff] }
 0x161   : > { %v749_v17 = vpop.permute.xlu1 %748  ;;  %v797_v18 = vpop.permute.xlu0 %796 }
 0x162   : > { %754 = vst.msk [vmem:[#allocation3 + $0x8] sm:$0xff] %vm719_vm3, %v749_v17  ;;  %802 = vst.msk [vmem:[#allocation3 + $0x18] sm:$0xff] %vm719_vm3, %v797_v18 }
 0x165   : > { %v741_v19 = vpop.permute.xlu0 %740  ;;  %v775_v20 = vpop.permute.xlu1 %774  ;;  %v826_v23 = vld [vmem:[#allocation3 + $0x10] sm:$0xff]  ;;  %v824_v27 = vld [vmem:[#allocation3] sm:$0xff] }
 0x166   : > { %746 = vst.msk [vmem:[#allocation2 + $0x8] sm:$0xff] %vm719_vm3, %v741_v19  ;;  %779 = vst.msk [vmem:[#allocation3 + $0x30] sm:$0xff] %vm719_vm3, %v775_v20 }
 0x169   : > { %v799_v21 = vpop.permute.xlu0 %798  ;;  %v765_v22 = vpop.permute.xlu1 %764  ;;  %v827_v24 = vld [vmem:[#allocation3 + $0x18] sm:$0xff]  ;;  %v825_v25 = vld [vmem:[#allocation3 + $0x8] sm:$0xff] }
 0x16a   : > { %803 = vst.msk [vmem:[#allocation3 + $0x38] sm:$0xff] %vm719_vm3, %v799_v21  ;;  %770 = vst.msk [vmem:[#allocation2 + $0x10] sm:$0xff] %vm719_vm3, %v765_v22  ;;  %v833_v26 = vpack.c.bf16 %v827_v24, %v826_v23  ;;  %v832_v29 = vpack.c.bf16 %v825_v25, %v824_v27  ;;  %v711_v22 = vld [vmem:[%s2375_s22 + $0x28] sm:$0xff]  ;;  %v713_v24 = vld [vmem:[%s2375_s22 + $0x38] sm:$0xff] }
 0x16c   : > { %1848 = vmatprep.subr.msk.bf16.mxu0 %vm719_vm3, %v833_v26  ;;  %v858_v28 = vsel %vm719_vm3, %v833_v26, 0  ;;  %v855_v39 = vsel %vm719_vm3, %v832_v29, 0 }
 0x16d   : > { %1781 = vmatpush3.bf16.xpose.msra.mxu0 %v858_v28  ;;  %v789_v30 = vpop.permute.xlu0 %788  ;;  %v727_v31 = vpop.permute.xlu1 %726  ;;  %v813_v33 = vld [vmem:[#allocation2 + $0x8] sm:$0xff]  ;;  %v830_v38 = vld [vmem:[#allocation3 + $0x30] sm:$0xff] }
 0x16e   : > { %794 = vst.msk [vmem:[#allocation2 + $0x18] sm:$0xff] %vm719_vm3, %v789_v30  ;;  %731 = vst.msk [vmem:[#allocation3 + $0x20] sm:$0xff] %vm719_vm3, %v727_v31  ;;  %1849 = vmatprep.subr.msk.bf16.mxu0 %vm719_vm3, %v832_v29  ;;  %v820_v34 = vpack.c.bf16 %v813_v33, %v812_v32 }
 0x170   : > { %1784 = vmatprep.mubr.msk.bf16.mxu0 %vm719_vm3, %v820_v34 }
 0x171   : > { %v751_v35 = vpop.permute.xlu0 %750  ;;  %v743_v36 = vpop.permute.xlu1 %742  ;;  %v831_v37 = vld [vmem:[#allocation3 + $0x38] sm:$0xff]  ;;  %v814_v45 = vld [vmem:[#allocation2 + $0x10] sm:$0xff] }
 0x172   : > { %755 = vst.msk [vmem:[#allocation3 + $0x28] sm:$0xff] %vm719_vm3, %v751_v35  ;;  %747 = vst.msk [vmem:[#allocation2 + $0x28] sm:$0xff] %vm719_vm3, %v743_v36  ;;  %v835_v40 = vpack.c.bf16 %v831_v37, %v830_v38 }
 0x174   : > { %v919_v51 = vsel %vm719_vm3, %v835_v40, 0 }
 0x175   : > { %1783 = vmatpush3.bf16.xpose.msra.mxu0 %v855_v39  ;;  %v767_v41 = vpop.permute.xlu0 %766  ;;  %v791_v42 = vpop.permute.xlu1 %790  ;;  %v815_v43 = vld [vmem:[#allocation2 + $0x18] sm:$0xff]  ;;  %v828_v50 = vld [vmem:[#allocation3 + $0x20] sm:$0xff] }
 0x176   : > { %771 = vst.msk [vmem:[#allocation2 + $0x30] sm:$0xff] %vm719_vm3, %v767_v41  ;;  %795 = vst.msk [vmem:[#allocation2 + $0x38] sm:$0xff] %vm719_vm3, %v791_v42  ;;  %1850 = vmatprep.subr.msk.bf16.mxu0 %vm719_vm3, %v835_v40  ;;  %v821_v48 = vpack.c.bf16 %v815_v43, %v814_v45 }
 0x179   : > { %v817_v46 = vld [vmem:[#allocation2 + $0x28] sm:$0xff] }
 0x17a   : > { %v829_v47 = vld [vmem:[#allocation3 + $0x28] sm:$0xff]  ;;  %v822_v49 = vpack.c.bf16 %v817_v46, %v816_v44 }
 0x17b   : > { %v834_v52 = vpack.c.bf16 %v829_v47, %v828_v50 }
 0x17c   : > { %1785 = vmatmul.mubr.msk.bf16.vlgmr.msra.gmra.mxu0 %vm719_vm3, %v821_v48 }
 0x17d   : > { %1789 = vmatpush3.bf16.xpose.msra.mxu0 %v919_v51  ;;  %1792 = vmatprep.mubr.msk.bf16.mxu0 %vm719_vm3, %v822_v49  ;;  %v916_v53 = vsel %vm719_vm3, %v834_v52, 0  ;;  %v818_v54 = vld [vmem:[#allocation2 + $0x30] sm:$0xff]  ;;  %v819_v55 = vld [vmem:[#allocation2 + $0x38] sm:$0xff] }
 0x17e   : > { %1851 = vmatprep.subr.msk.bf16.mxu0 %vm719_vm3, %v834_v52  ;;  %v823_v56 = vpack.c.bf16 %v819_v55, %v818_v54 }
 0x185   : > { %1791 = vmatpush3.bf16.xpose.msra.mxu0 %v916_v53 }
 0x18c   : > { %1793 = vmatmul.mubr.msk.bf16.vlgmr.msra.gmra.mxu0 %vm719_vm3, %v823_v56 }
 0x23c   : > { %v1786_v58 = vpop.f32.mrf.mxu0 }
 0x23d   : > { %v903_v60 = vadd.f32 %v1786_v58, %v708_v57 }
 0x23e   : > { %v894_v61 = vpop.f32.mrf.mxu0 }
 0x23f   : > { %v895_v63 = vadd.f32 %v894_v61, %v706_v59  ;;  %v976_v0 = vsel %vm661_vm2, %v903_v60, -inf }
 0x240   : > { %977 = vmax.xlane.f32.xlu1 %v976_v0  ;;  %v1787_v1 = vpop.f32.mrf.mxu0 }
 0x241   : > { %v906_v4 = vadd.f32 %v1787_v1, %v709_v62  ;;  %v970_v7 = vsel %vm661_vm2, %v895_v63, -inf }
 0x242   : > { %v897_v8 = vpop.f32.mrf.mxu0  ;;  %971 = vmax.xlane.f32.xlu0 %v970_v7 }
 0x243   : > { %v898_v9 = vadd.f32 %v897_v8, %v707_v2  ;;  %v979_v12 = vsel %vm661_vm2, %v906_v4, -inf }
 0x245   : > { %v973_v11 = vsel %vm661_vm2, %v898_v9, -inf }
 0x246   : > { %974 = vmax.xlane.f32.xlu1 %v973_v11  ;;  %980 = vmax.xlane.f32.xlu0 %v979_v12 }
 0x24c   : > { %v1794_v15 = vpop.f32.mrf.mxu0 }
 0x24d   : > { %v964_v17 = vadd.f32 %v1794_v15, %v712_v14 }
 0x24e   : > { %v955_v18 = vpop.f32.mrf.mxu0 }
 0x24f   : > { %v956_v19 = vadd.f32 %v955_v18, %v710_v16  ;;  %v988_v20 = vsel %vm661_vm2, %v964_v17, -inf }
 0x250   : > { %v1795_v21 = vpop.f32.mrf.mxu0  ;;  %989 = vmax.xlane.f32.xlu1 %v988_v20 }
 0x251   : > { %v982_v23 = vsel %vm661_vm2, %v956_v19, -inf  ;;  %v967_v27 = vadd.f32 %v1795_v21, %v713_v24 }
 0x252   : > { %v958_v25 = vpop.f32.mrf.mxu0  ;;  %983 = vmax.xlane.f32.xlu0 %v982_v23 }
 0x253   : > { %v959_v26 = vadd.f32 %v958_v25, %v711_v22  ;;  %v991_v29 = vsel %vm661_vm2, %v967_v27, -inf }
 0x255   : > { %v985_v28 = vsel %vm661_vm2, %v959_v26, -inf }
 0x256   : > { %986 = vmax.xlane.f32.xlu0 %v985_v28 }
 0x25a   : > { %992 = vmax.xlane.f32.xlu0 %v991_v29 }
 0x261   : > { %780 = vrot.lane.b32.xlu1 %v2125_v10, %s1947_s1 }
 0x265   : > { %804 = vrot.lane.b32.xlu1 %v2125_v10, %s1948_s29 }
 0x269   : > { %806 = vrot.lane.b32.xlu1 %v2131_v13, %s1948_s29 }
 0x26d   : > { %734 = vrot.lane.b32.xlu1 %v2131_v13, %s1949_s18 }
 0x270   : > { %782 = vrot.lane.b32.xlu0 %v2131_v13, %s1947_s1 }
 0x274   : > { %732 = vrot.lane.b32.xlu0 %v2125_v10, %s1949_s18  ;;  %s2378_s18 = scalar_lea.vmem %s2350_s7, %s2037_s15 }
 0x2c9   : > { %v978_v30 = vpop.xlane.xlu1 %977 }
 0x2ca   : > { %v996_v31 = vsub.f32 %v903_v60, %v978_v30 }
 0x2cb   : > { %v972_v32 = vpop.xlane.xlu0 %971 }
 0x2cc   : > { %v1006_v33 = vmul.f32 1.442695, %v996_v31  ;;  %v994_v34 = vsub.f32 %v895_v63, %v972_v32 }
 0x2ce   : > { %1890 = vpow2.f32 %v1006_v33  ;;  %v1002_v35 = vmul.f32 1.442695, %v994_v34 }
 0x2cf   : > { %v975_v36 = vpop.xlane.xlu1 %974  ;;  %v981_v37 = vpop.xlane.xlu0 %980 }
 0x2d0   : > { %1892 = vpow2.f32 %v1002_v35  ;;  %v995_v38 = vsub.f32 %v898_v9, %v975_v36  ;;  %v997_v39 = vsub.f32 %v906_v4, %v981_v37 }
 0x2d2   : > { %v1008_v40 = vmul.f32 1.442695, %v997_v39  ;;  %v1004_v41 = vmul.f32 1.442695, %v995_v38 }
 0x2d4   : > { %1894 = vpow2.f32 %v1008_v40 }
 0x2d5   : > { %1896 = vpow2.f32 %v1004_v41 }
 0x2d9   : > { %v990_v42 = vpop.xlane.xlu1 %989 }
 0x2da   : > { %v1000_v43 = vsub.f32 %v964_v17, %v990_v42 }
 0x2db   : > { %v2211_v44 = vpop.eup %1890  ;;  %v984_v45 = vpop.xlane.xlu0 %983 }
 0x2dc   : > { %v1014_v46 = vmul.f32 1.442695, %v1000_v43  ;;  %v998_v47 = vsub.f32 %v956_v19, %v984_v45  ;;  %v1024_v48 = vsel %vm661_vm2, %v2211_v44, 0.0 }
 0x2dd   : > { %v2215_v49 = vpop.eup %1892  ;;  %1025 = vadd.xlane.f32.xlu1 %v1024_v48  ;;  %v781_v50 = vpop.permute.xlu1 %780 }
 0x2de   : > { %1898 = vpow2.f32 %v1014_v46  ;;  %v1010_v51 = vmul.f32 1.442695, %v998_v47  ;;  %786 = vst.msk [vmem:[#allocation4 + $0x10] sm:$0xff] %vm719_vm3, %v781_v50  ;;  %v1018_v53 = vsel %vm661_vm2, %v2215_v49, 0.0 }
 0x2df   : > { %v987_v52 = vpop.xlane.xlu0 %986 }
 0x2e0   : > { %1900 = vpow2.f32 %v1010_v51  ;;  %v999_v56 = vsub.f32 %v959_v26, %v987_v52 }
 0x2e1   : > { %v805_v54 = vpop.permute.xlu1 %804  ;;  %1019 = vadd.xlane.f32.xlu1 %v1018_v53  ;;  %v2220_v55 = vpop.eup %1894 }
 0x2e2   : > { %810 = vst.msk [vmem:[#allocation4 + $0x18] sm:$0xff] %vm719_vm3, %v805_v54  ;;  %v1027_v57 = vsel %vm661_vm2, %v2220_v55, 0.0  ;;  %v1897_v59 = vpop.eup %1896  ;;  %v1012_v62 = vmul.f32 1.442695, %v999_v56 }
 0x2e3   : > { %v993_v58 = vpop.xlane.xlu0 %992  ;;  %1028 = vadd.xlane.f32.xlu0 %v1027_v57  ;;  %v1021_v0 = vsel %vm661_vm2, %v1897_v59, 0.0 }
 0x2e4   : > { %v1001_v60 = vsub.f32 %v967_v27, %v993_v58 }
 0x2e5   : > { %v807_v61 = vpop.permute.xlu1 %806  ;;  %v838_v4 = vld [vmem:[#allocation4 + $0x10] sm:$0xff] }
 0x2e6   : > { %v1016_v63 = vmul.f32 1.442695, %v1001_v60  ;;  %811 = vst.msk [vmem:[#allocation4 + $0x38] sm:$0xff] %vm719_vm3, %v807_v61  ;;  %v1879_v60 = vld [vmem:[%s2050_s25] sm:$0xff]  }
 0x2e7   : > { %v783_v1 = vpop.permute.xlu0 %782  ;;  %1022 = vadd.xlane.f32.xlu0 %v1021_v0 }
 0x2e8   : > { %1902 = vpow2.f32 %v1016_v63  ;;  %787 = vst.msk [vmem:[#allocation4 + $0x30] sm:$0xff] %vm719_vm3, %v783_v1 }
 0x2e9   : > { %v735_v2 = vpop.permute.xlu1 %734  ;;  %v839_v7 = vld [vmem:[#allocation4 + $0x18] sm:$0xff]  ;;  %1904 = vpow2.f32 %v1012_v62 }
 0x2ea   : > { %739 = vst.msk [vmem:[#allocation4 + $0x20] sm:$0xff] %vm719_vm3, %v735_v2  ;;  %v845_v8 = vpack.c.bf16 %v839_v7, %v838_v4 }
 0x2eb   : > { %v2229_v9 = vpop.eup %1898  ;;  %v733_v11 = vpop.permute.xlu0 %732 }
 0x2ec   : > { %738 = vst.msk [vmem:[#allocation4] sm:$0xff] %vm719_vm3, %v733_v11  ;;  %1796 = vmatprep.subr.bf16.mxu1 %v845_v8  ;;  %v1036_v12 = vsel %vm661_vm2, %v2229_v9, 0.0 }
 0x2ed   : > { %v2234_v14 = vpop.eup %1900  ;;  %1797 = vmatpush3.bf16.msra.mxu1 %v845_v8  ;;  %1037 = vadd.xlane.f32.xlu1 %v1036_v12  ;;  %v843_v16 = vld [vmem:[#allocation4 + $0x38] sm:$0xff] }
 0x2ee   : > { %v1030_v17 = vsel %vm661_vm2, %v2234_v14, 0.0 }
 0x2ef   : > { %v842_v15 = vld [vmem:[#allocation4 + $0x30] sm:$0xff] }
 0x2f0   : > { %v847_v18 = vpack.c.bf16 %v843_v16, %v842_v15 }
 0x2f1   : > { %1031 = vadd.xlane.f32.xlu1 %v1030_v17  ;;  %v840_v35 = vld [vmem:[#allocation4 + $0x20] sm:$0xff] }
 0x2f2   : > { %1804 = vmatprep.subr.bf16.mxu0 %v847_v18  ;;  %v1711_v17 = vld [vmem:[%s2376_s4] ss:$0 sm:$0xff] }
 0x2f3   : > { %1805 = vmatpush3.bf16.msra.mxu0 %v847_v18  ;;  %v836_v43 = vld [vmem:[#allocation4] sm:$0xff] }
 0x2f5   : > { %v1903_v19 = vpop.eup %1902 }
 0x2f6   : > { %v1039_v20 = vsel %vm661_vm2, %v1903_v19, 0.0  ;;  %v1905_v21 = vpop.eup %1904 }
 0x2f7   : > { %1040 = vadd.xlane.f32.xlu0 %v1039_v20  ;;  %v1033_v22 = vsel %vm661_vm2, %v1905_v21, 0.0 }
 0x2fb   : > { %1034 = vadd.xlane.f32.xlu0 %v1033_v22 }
 0x302   : > { %758 = vrot.lane.b32.xlu1 %v2131_v13, %s1950_s17 }
 0x311   : > { %756 = vrot.lane.b32.xlu0 %v2125_v10, %s1950_s17 }
 0x366   : > { %v1026_v23 = vpop.xlane.xlu1 %1025 }
 0x36a   : > { %v1020_v24 = vpop.xlane.xlu1 %1019 }
 0x36b   : > { %1906 = vrcp.f32 %v1020_v24 }
 0x36c   : > { %v1029_v25 = vpop.xlane.xlu0 %1028 }
 0x370   : > { %v1023_v26 = vpop.xlane.xlu0 %1022 }
 0x371   : > { %1908 = vrcp.f32 %v1023_v26 }
 0x372   : > { %1910 = vrcp.f32 %v1026_v23 }
 0x373   : > { %1912 = vrcp.f32 %v1029_v25 }
 0x376   : > { %v1038_v27 = vpop.xlane.xlu1 %1037 }
 0x378   : > { %v1907_v29 = vpop.eup %1906 }
 0x379   : > { %v1050_v33 = vmul.f32 %v1907_v29, %v2215_v49 }
 0x37a   : > { %v1032_v28 = vpop.xlane.xlu1 %1031 }
 0x37e   : > { %v759_v30 = vpop.permute.xlu1 %758  ;;  %v1909_v31 = vpop.eup %1908 }
 0x37f   : > { %763 = vst.msk [vmem:[#allocation4 + $0x28] sm:$0xff] %vm719_vm3, %v759_v30  ;;  %v1051_v13 = vmul.f32 %v1909_v31, %v1897_v59  ;;  %v1911_v39 = vpop.eup %1910 }
 0x380   : > { %v1041_v32 = vpop.xlane.xlu0 %1040  ;;  %v1913_v40 = vpop.eup %1912  ;;  %v1052_v51 = vmul.f32 %v1911_v39, %v2211_v44  ;;  %v1878_v44 = vld [vmem:[%s2050_s25 + $0x8] sm:$0xff]   ;;  %s1953_s25 = smov 24   ;;  %v1885_v39 = vld [vmem:[%s2077_s28 + $0x20] sm:$0xff]  }
 0x381   : > { %1914 = vrcp.f32 %v1041_v32  ;;  %v1058_v10 = vpack.c.bf16 %v1051_v13, %v1050_v33  ;;  %v1053_v48 = vmul.f32 %v1913_v40, %v2220_v55  ;;  %v1886_v40 = vld [vmem:[%s2077_s28 + $0x18] sm:$0xff]  }
 0x382   : > { %1916 = vrcp.f32 %v1032_v28 }
 0x383   : > { %1918 = vrcp.f32 %v1038_v27  ;;  %1800 = vmatprep.mubr.msk.bf16.mxu1 %vm661_vm2, %v1058_v10  ;;  %v1059_v56 = vpack.c.bf16 %v1053_v48, %v1052_v51 }
 0x384   : > { %v1035_v34 = vpop.xlane.xlu0 %1034 }
 0x385   : > { %1920 = vrcp.f32 %v1035_v34  ;;  %v1880_v34 = vld [vmem:[%s2067_s21 + $0x8] sm:$0xff]  }
 0x386   : > { %v841_v36 = vld [vmem:[#allocation4 + $0x28] sm:$0xff] }
 0x387   : > { %v846_v37 = vpack.c.bf16 %v841_v36, %v840_v35  ;;  %v1881_v35 = vld [vmem:[%s2067_s21] sm:$0xff]   ;;  %v1882_v36 = vld [vmem:[%s2077_s28 + $0x38] sm:$0xff]  }
 0x388   : > { %v757_v38 = vpop.permute.xlu0 %756 }
 0x389   : > { %762 = vst.msk [vmem:[#allocation4 + $0x8] sm:$0xff] %vm719_vm3, %v757_v38  ;;  %1806 = vmatprep.subr.bf16.mxu0 %v846_v37  ;;  %v1884_v38 = vld [vmem:[%s2077_s28 + $0x28] sm:$0xff]  }
 0x38a   : > { %1807 = vmatpush3.bf16.msra.mxu0 %v846_v37  ;;  %v1883_v37 = vld [vmem:[%s2077_s28 + $0x30] sm:$0xff]  }
 0x38b   : > { %1820 = vmatprep.subr.bf16.mxu0 %v1938_v3 }
 0x38e   : > { %v1915_v41 = vpop.eup %1914 }
 0x38f   : > { %v1917_v42 = vpop.eup %1916  ;;  %v1057_v50 = vmul.f32 %v1915_v41, %v1903_v19 }
 0x390   : > { %v837_v45 = vld [vmem:[#allocation4 + $0x8] sm:$0xff]  ;;  %v1919_v46 = vpop.eup %1918  ;;  %v1054_v52 = vmul.f32 %v1917_v42, %v2234_v14 }
 0x391   : > { %v844_v47 = vpack.c.bf16 %v837_v45, %v836_v43  ;;  %v1056_v54 = vmul.f32 %v1919_v46, %v2229_v9 }
 0x392   : > { %v1921_v49 = vpop.eup %1920 }
 0x393   : > { %1798 = vmatprep.subr.bf16.mxu1 %v844_v47  ;;  %v1055_v53 = vmul.f32 %v1921_v49, %v1905_v21  ;;  %v1061_v58 = vpack.c.bf16 %v1057_v50, %v1056_v54  ;;  %v1715_v50 = vld [vmem:[%s2377_s27] ss:$0 sm:$0xff] }
 0x394   : > { %1799 = vmatpush3.bf16.msra.mxu1 %v844_v47  ;;  %v1716_v54 = vld [vmem:[%s2378_s18] ss:$0 sm:$0xff] }
 0x395   : > { %v1060_v57 = vpack.c.bf16 %v1055_v53, %v1054_v52  ;;  %1812 = vmatprep.subr.bf16.mxu1 %v1938_v3 }
 0x397   : > { %1801 = vmatmul.mubr.msk.bf16.vlgmr.msra.gmra.mxu1 %vm661_vm2, %v1059_v56  ;;  %1808 = vmatprep.mubr.msk.bf16.mxu0 %vm661_vm2, %v1060_v57 }
 0x398   : > { %1809 = vmatmul.mubr.msk.bf16.vlgmr.msra.gmra.mxu0 %vm661_vm2, %v1061_v58  ;;  %1816 = vmatprep.mubr.msk.bf16.mxu1 %vm1939_vm1, %v1938_v3 }
 0x399   : > { %1824 = vmatprep.mubr.msk.bf16.mxu0 %vm1939_vm1, %v1938_v3  ;;  %1813 = vmatpush3.bf16.msra.mxu1 %v1878_v44 }
 0x39a   : > { %1814 = vmatprep.subr.bf16.mxu1 %v1938_v3  ;;  %1821 = vmatpush3.bf16.msra.mxu0 %v1880_v34 }
 0x39b   : > { %1822 = vmatprep.subr.bf16.mxu0 %v1938_v3 }
 0x39d   : > { %1815 = vmatpush3.bf16.msra.mxu1 %v1879_v60  ;;  %v1889_v60 = vld [vmem:[%s2077_s28] sm:$0xff]  }
 0x39e   : > { %1828 = vmatprep.subr.bf16.mxu1 %v1938_v3  ;;  %1823 = vmatpush3.bf16.msra.mxu0 %v1881_v35  ;;  %v1730_v35 = vld [vmem:[%s621_s19] ss:$0 sm:$0xff] }
 0x457   : > { %v1802_v55 = vpop.f32.mrf.mxu1 }
 0x458   : > { %v1810_v59 = vpop.f32.mrf.mxu0  ;;  %1187 = vrot.lane.b32.xlu0 %v1802_v55, %s1951_s30  ;;  %v1887_v55 = vld [vmem:[%s2077_s28 + $0x10] sm:$0xff]  }
 0x459   : > { %1189 = vrot.lane.b32.xlu1 %v1810_v59, %s1951_s30  ;;  %v1102_v61 = vpop.f32.mrf.mxu1  ;;  %v1888_v59 = vld [vmem:[%s2077_s28 + $0x8] sm:$0xff]  }
 0x45a   : > { %1172 = vst.msk [vmem:[#allocation5] sm:$0xff] %vm719_vm3, %v1102_v61  ;;  %v1157_v62 = vpop.f32.mrf.mxu0 }
 0x45b   : > { %1173 = vst.msk [vmem:[#allocation5 + $0x8] sm:$0xff] %vm719_vm3, %v1157_v62  ;;  %v1803_v63 = vpop.f32.mrf.mxu1 }
 0x45c   : > { %v1811_v0 = vpop.f32.mrf.mxu0 }
 0x45d   : > { %v1105_v1 = vpop.f32.mrf.mxu1 }
 0x45e   : > { %v1160_v2 = vpop.f32.mrf.mxu0  ;;  %1176 = vrot.lane.b32.xlu0 %v1105_v1, %s1952_s16 }
 0x45f   : > { %1178 = vrot.lane.b32.xlu1 %v1160_v2, %s1952_s16  ;;  %s2379_s16 = scalar_lea.vmem %s2352_s9, %s2037_s15 }
 0x460   : > { %v1717_v61 = vld [vmem:[%s2379_s16] ss:$0 sm:$0xff] }
 0x462   : > { %1198 = vrot.lane.b32.xlu0 %v1803_v63, %s1953_s25 }
 0x463   : > { %1200 = vrot.lane.b32.xlu1 %v1811_v0, %s1953_s25 }
 0x4ca   : > { %v1188_v4 = vpop.permute.xlu0 %1187 }
 0x4cb   : > { %v1190_v7 = vpop.permute.xlu1 %1189 }
 0x4d0   : > { %v1177_v8 = vpop.permute.xlu0 %1176 }
 0x4d1   : > { %1183 = vst.msk [vmem:[#allocation5] sm:$0xff] %vm1182_vm4, %v1177_v8  ;;  %v1179_v9 = vpop.permute.xlu1 %1178 }
 0x4d2   : > { %1184 = vst.msk [vmem:[#allocation5 + $0x8] sm:$0xff] %vm1182_vm4, %v1179_v9 }
 0x4d3   : > { %1194 = vst.msk [vmem:[#allocation5] sm:$0xff] %vm1193_vm5, %v1188_v4  ;;  %1195 = vst.msk [vmem:[#allocation5 + $0x8] sm:$0xff] %vm1193_vm5, %v1190_v7 }
 0x4d4   : > { %v1199_v11 = vpop.permute.xlu0 %1198 }
 0x4d5   : > { %1205 = vst.msk [vmem:[#allocation5] sm:$0xff] %vm1204_vm6, %v1199_v11  ;;  %v1201_v12 = vpop.permute.xlu1 %1200 }
 0x4d6   : > { %1206 = vst.msk [vmem:[#allocation5 + $0x8] sm:$0xff] %vm1204_vm6, %v1201_v12 }
 0x4dc   : > { %v1207_v14 = vld [vmem:[#allocation5] sm:$0xff] }
 0x4dd   : > { %v1208_v15 = vld [vmem:[#allocation5 + $0x8] sm:$0xff] }
 0x4de   : > { %v1209_v16 = vpack.c.bf16 %v1208_v15, %v1207_v14 }
 0x4e0   : > { %1817 = vmatmul.mubr.msk.bf16.vlgmr.msra.gmra.mxu1 %vm661_vm2, %v1209_v16 }
 0x4e1   : > { %1844 = vmatprep.mubr.msk.bf16.mxu1 %vm1939_vm1, %v1938_v3  ;;  %1829 = vmatpush3.bf16.msra.mxu1 %v1882_v36 }
 0x4e2   : > { %1830 = vmatprep.subr.bf16.mxu1 %v1938_v3 }
 0x4e5   : > { %1831 = vmatpush3.bf16.msra.mxu1 %v1883_v37  ;;  %v1731_v37 = vld [vmem:[%s624_s14] ss:$0 sm:$0xff] }
 0x4e6   : > { %1832 = vmatprep.subr.bf16.mxu1 %v1938_v3 }
 0x4e9   : > { %1833 = vmatpush3.bf16.msra.mxu1 %v1884_v38 }
 0x4ea   : > { %1834 = vmatprep.subr.bf16.mxu1 %v1938_v3 }
 0x4ed   : > { %1835 = vmatpush3.bf16.msra.mxu1 %v1885_v39 }
 0x4ee   : > { %1836 = vmatprep.subr.bf16.mxu1 %v1938_v3 }
 0x4f1   : > { %1837 = vmatpush3.bf16.msra.mxu1 %v1886_v40 }
 0x4f2   : > { %1838 = vmatprep.subr.bf16.mxu1 %v1938_v3 }
 0x4f5   : > { %1839 = vmatpush3.bf16.msra.mxu1 %v1887_v55 }
 0x4f6   : > { %1840 = vmatprep.subr.bf16.mxu1 %v1938_v3 }
 0x4f9   : > { %1841 = vmatpush3.bf16.msra.mxu1 %v1888_v59 }
 0x4fa   : > { %1842 = vmatprep.subr.bf16.mxu1 %v1938_v3  ;;  %v1721_v3 = vld [vmem:[%s618_s0] ss:$0 sm:$0xff] }
 0x4fd   : > { %1843 = vmatpush3.bf16.msra.mxu1 %v1889_v60 }
 0x5a0   : > { %v1265_v18 = vpop.f32.mrf.mxu1 }
 0x5a1   : > { %v1266_v19 = vadd.f32 %v1711_v17, %v1265_v18 }
 0x5a2   : > { %v1818_v20 = vpop.f32.mrf.mxu1 }
 0x5a3   : > { %v1272_v21 = vadd.f32 %v1266_v19, %v2109_v5 }
 0x5a4   : > { %v1268_v22 = vpop.f32.mrf.mxu1 }
 0x5a5   : > { %v1269_v23 = vadd.f32 %v1711_v17, %v1268_v22  ;;  %v1276_v24 = vsel %vm661_vm2, %v1272_v21, 0.0 }
 0x5a6   : > { %1277 = vadd.xlane.f32.xlu0 %v1276_v24  ;;  %v1819_v25 = vpop.f32.mrf.mxu1 }
 0x5a7   : > { %v1273_v26 = vadd.f32 %v1269_v23, %v2114_v6 }
 0x5a9   : > { %v1279_v27 = vsel %vm661_vm2, %v1273_v26, 0.0 }
 0x5aa   : > { %1280 = vadd.xlane.f32.xlu1 %v1279_v27 }
 0x62f   : > { %v1278_v28 = vpop.xlane.xlu0 %1277 }
 0x630   : > { %v1283_v29 = vmul.f32 0.03125, %v1278_v28 }
 0x632   : > { %v1285_v30 = vsub.f32 %v1272_v21, %v1283_v29 }
 0x633   : > { %v1281_v31 = vpop.xlane.xlu1 %1280 }
 0x634   : > { %v1284_v5 = vmul.f32 0.03125, %v1281_v31  ;;  %v1287_v32 = vmul.f32 %v1285_v30, %v1285_v30 }
 0x636   : > { %v1286_v33 = vsub.f32 %v1273_v26, %v1284_v5  ;;  %v1289_v13 = vsel %vm661_vm2, %v1287_v32, 0.0 }
 0x637   : > { %1290 = vadd.xlane.f32.xlu0 %v1289_v13 }
 0x638   : > { %v1288_v10 = vmul.f32 %v1286_v33, %v1286_v33 }
 0x63a   : > { %v1292_v6 = vsel %vm661_vm2, %v1288_v10, 0.0 }
 0x63b   : > { %1293 = vadd.xlane.f32.xlu0 %v1292_v6 }
 0x6c0   : > { %v1291_v41 = vpop.xlane.xlu0 %1290 }
 0x6c1   : > { %v1295_v42 = vmul.f32 0.03125, %v1291_v41 }
 0x6c3   : > { %v1297_v43 = vadd.f32 1e-05, %v1295_v42 }
 0x6c4   : > { %v1294_v45 = vpop.xlane.xlu0 %1293 }
 0x6c5   : > { %1922 = vrsqrt.f32 %v1297_v43  ;;  %v1296_v46 = vmul.f32 0.03125, %v1294_v45 }
 0x6c7   : > { %v1298_v47 = vadd.f32 1e-05, %v1296_v46 }
 0x6c9   : > { %1924 = vrsqrt.f32 %v1298_v47 }
 0x6d2   : > { %v1923_v48 = vpop.eup %1922 }
 0x6d3   : > { %v1301_v49 = vmul.f32 %v1923_v48, %v1285_v30 }
 0x6d5   : > { %v1309_v53 = vmul.f32 %v1715_v50, %v1301_v49 }
 0x6d6   : > { %v1925_v51 = vpop.eup %1924 }
 0x6d7   : > { %v1302_v52 = vmul.f32 %v1925_v51, %v1286_v33  ;;  %v1317_v57 = vadd.f32 %v1716_v54, %v1309_v53 }
 0x6d9   : > { %v1310_v56 = vmul.f32 %v1715_v50, %v1302_v52 }
 0x6db   : > { %v1318_v58 = vadd.f32 %v1716_v54, %v1310_v56 }
 0x6dd   : > { %v1319_v44 = vpack.c.bf16 %v1318_v58, %v1317_v57 }
 0x6df   : > { %1825 = vmatmul.mubr.msk.bf16.vlgmr.msra.gmra.mxu0 %vm661_vm2, %v1319_v44 }
 0x79f   : > { %v1380_v62 = vpop.f32.mrf.mxu0 }
 0x7a0   : > { %v1381_v0 = vadd.f32 %v1717_v61, %v1380_v62 }
 0x7a1   : > { %v1826_v63 = vpop.f32.mrf.mxu0 }
 0x7a2   : > { %v1387_v7 = vmax.f32 %v1381_v0, 0.0 }
 0x7a3   : > { %v1383_v1 = vpop.f32.mrf.mxu0 }
 0x7a4   : > { %v1384_v2 = vadd.f32 %v1717_v61, %v1383_v1 }
 0x7a5   : > { %v1827_v4 = vpop.f32.mrf.mxu0 }
 0x7a6   : > { %v1388_v8 = vmax.f32 %v1384_v2, 0.0 }
 0x7a8   : > { %v1389_v9 = vpack.c.bf16 %v1388_v8, %v1387_v7 }
 0x7aa   : > { %1845 = vmatmul.mubr.bf16.vlgmr.msra.gmra.mxu1 %v1389_v9 }
 0x86a   : > { %v1495_v11 = vpop.f32.mrf.mxu1 }
 0x86b   : > { %v1496_v12 = vadd.f32 %v1721_v3, %v1495_v11 }
 0x86c   : > { %v1846_v14 = vpop.f32.mrf.mxu1 }
 0x86d   : > { %v1502_v15 = vadd.f32 %v1496_v12, %v1317_v57 }
 0x86e   : > { %v1498_v16 = vpop.f32.mrf.mxu1 }
 0x86f   : > { %v1499_v17 = vadd.f32 %v1721_v3, %v1498_v16  ;;  %v1506_v18 = vsel %vm661_vm2, %v1502_v15, 0.0 }
 0x870   : > { %1507 = vadd.xlane.f32.xlu1 %v1506_v18  ;;  %v1847_v19 = vpop.f32.mrf.mxu1 }
 0x871   : > { %v1503_v20 = vadd.f32 %v1499_v17, %v1318_v58 }
 0x873   : > { %v1509_v21 = vsel %vm661_vm2, %v1503_v20, 0.0 }
 0x874   : > { %1510 = vadd.xlane.f32.xlu0 %v1509_v21 }
 0x8f9   : > { %v1508_v22 = vpop.xlane.xlu1 %1507 }
 0x8fa   : > { %v1512_v23 = vmul.f32 0.03125, %v1508_v22 }
 0x8fc   : > { %v1514_v24 = vsub.f32 %v1502_v15, %v1512_v23 }
 0x8fd   : > { %v1511_v25 = vpop.xlane.xlu0 %1510 }
 0x8fe   : > { %v1513_v26 = vmul.f32 0.03125, %v1511_v25  ;;  %v1516_v27 = vmul.f32 %v1514_v24, %v1514_v24 }
 0x900   : > { %v1515_v28 = vsub.f32 %v1503_v20, %v1513_v26  ;;  %v1518_v29 = vsel %vm661_vm2, %v1516_v27, 0.0 }
 0x901   : > { %1519 = vadd.xlane.f32.xlu1 %v1518_v29 }
 0x902   : > { %v1517_v30 = vmul.f32 %v1515_v28, %v1515_v28 }
 0x904   : > { %v1521_v31 = vsel %vm661_vm2, %v1517_v30, 0.0 }
 0x905   : > { %1522 = vadd.xlane.f32.xlu0 %v1521_v31 }
 0x98a   : > { %v1520_v5 = vpop.xlane.xlu1 %1519 }
 0x98b   : > { %v1524_v32 = vmul.f32 0.03125, %v1520_v5 }
 0x98d   : > { %v1526_v33 = vadd.f32 1e-05, %v1524_v32 }
 0x98e   : > { %v1523_v13 = vpop.xlane.xlu0 %1522 }
 0x98f   : > { %1926 = vrsqrt.f32 %v1526_v33  ;;  %v1525_v10 = vmul.f32 0.03125, %v1523_v13 }
 0x991   : > { %v1527_v6 = vadd.f32 1e-05, %v1525_v10 }
 0x993   : > { %1928 = vrsqrt.f32 %v1527_v6 }
 0x99c   : > { %v1927_v34 = vpop.eup %1926 }
 0x99d   : > { %v1530_v36 = vmul.f32 %v1927_v34, %v1514_v24 }
 0x99f   : > { %v1538_v38 = vmul.f32 %v1730_v35, %v1530_v36 }
 0x9a0   : > { %v1929_v39 = vpop.eup %1928 }
 0x9a1   : > { %v1546_v40 = vadd.f32 %v1731_v37, %v1538_v38  ;;  %v1531_v41 = vmul.f32 %v1929_v39, %v1515_v28 }
 0x9a3   : > { %1548 = vst.msk [vmem:[%s2373_s20] sm:$0xff] %vm661_vm2, %v1546_v40  ;;  %v1539_v42 = vmul.f32 %v1730_v35, %v1531_v41 }
 0x9a5   : > { %v1547_v43 = vadd.f32 %v1731_v37, %v1539_v42 }
 0x9a7   : > { %1549 = vst.msk [vmem:[%s2373_s20 + $0x8] sm:$0xff] %vm661_vm2, %v1547_v43 }
 0x9a8 PF: > { %s2380_s1 = sld [smem:[#allocation6_spill]] }
 0x9ae   : > { %s24_s29 = sadd.s32 1, %s2380_s1  }
 0x9af   : > { %p21_p5 = scmp.ge.s32.totalorder %s24_s29, 4  }
 0x9b1   :  { %23 = sbr.rel (!%p21_p5) target bundleno = 6 (0x6), region = 139 }

// kernel: transformer_forward.5
= control target key start
LH: loop header
LB: loop body
LE: loop exit
PB: predicated region body
PF: predicated region fallthrough
CT: control target
= control target key end

     0   :  { %s3622_s27 = smov 0   ;;  %s4223_s0 = inlined_call_operand.vmem [shape: f32[16,32], index: 0, kind: input, shape index: {}]   ;;  %s4224_s1 = inlined_call_operand.vmem [shape: f32[16,32], index: 1, kind: input, shape index: {}]   ;;  %s4225_s2 = inlined_call_operand.vmem [shape: f32[2,32,32], index: 2, kind: input, shape index: {}]   ;;  %s4226_s3 = inlined_call_operand.vmem [shape: f32[2,32,32], index: 3, kind: input, shape index: {}]   ;;  %s4227_s4 = inlined_call_operand.vmem [shape: bf16[2,32,96], index: 4, kind: input, shape index: {}]   ;;  %s4228_s5 = inlined_call_operand.vmem [shape: f32[2,1,96], index: 5, kind: input, shape index: {}]   ;;  %s4229_s6 = inlined_call_operand.vmem [shape: bf16[2,32,32], index: 6, kind: input, shape index: {}]   ;;  %s4230_s7 = inlined_call_operand.vmem [shape: f32[2,1,32], index: 7, kind: input, shape index: {}]   ;;  %s4231_s8 = inlined_call_operand.vmem [shape: f32[2,1,32], index: 8, kind: input, shape index: {}]   ;;  %s4232_s9 = inlined_call_operand.vmem [shape: f32[2,1,32], index: 9, kind: input, shape index: {}]   ;;  %s4233_s10 = inlined_call_operand.vmem [shape: bf16[2,32,32], index: 10, kind: input, shape index: {}]   ;;  %s4234_s11 = inlined_call_operand.vmem [shape: f32[2,1,32], index: 11, kind: input, shape index: {}]   ;;  %s4235_s12 = inlined_call_operand.vmem [shape: bf16[2,32,64], index: 12, kind: input, shape index: {}]   ;;  %s4236_s13 = inlined_call_operand.vmem [shape: f32[2,1,64], index: 13, kind: input, shape index: {}]   ;;  %s4237_s14 = inlined_call_operand.vmem [shape: bf16[2,32,32], index: 14, kind: input, shape index: {}]   ;;  %s4238_s15 = inlined_call_operand.vmem [shape: f32[2,1,32], index: 15, kind: input, shape index: {}]   ;;  %s4239_s16 = inlined_call_operand.vmem [shape: f32[2,1,32], index: 16, kind: input, shape index: {}]   ;;  %s4240_s17 = inlined_call_operand.vmem [shape: f32[2,1,32], index: 17, kind: input, shape index: {}]   ;;  %s4241_s18 = inlined_call_operand.vmem [shape: bf16[2,32,128], index: 18, kind: input, shape index: {}]   ;;  %s4242_s19 = inlined_call_operand.vmem [shape: f32[2,1,128], index: 19, kind: input, shape index: {}]   ;;  %s4243_s20 = inlined_call_operand.vmem [shape: bf16[2,128,32], index: 20, kind: input, shape index: {}]   ;;  %s4244_s21 = inlined_call_operand.vmem [shape: f32[2,1,32], index: 21, kind: input, shape index: {}]   ;;  %s4245_s22 = inlined_call_operand.vmem [shape: f32[2,1,32], index: 22, kind: input, shape index: {}]   ;;  %s4246_s23 = inlined_call_operand.vmem [shape: f32[2,1,32], index: 23, kind: input, shape index: {}]   ;;  %s4247_s24 = inlined_call_operand.vmem [shape: bf16[32,128], index: 24, kind: input, shape index: {}]   ;;  %s4248_s25 = inlined_call_operand.vmem [shape: f32[1,128], index: 25, kind: input, shape index: {}]   ;;  %s4249_s26 = inlined_call_operand.vmem [shape: f32[16,128], index: 26, kind: output, shape index: {}]  }
   0x1   :  { %4264 = sst [smem:[#allocation13_spill]] %s4223_s0 }
   0x2   :  { %4265 = sst [smem:[#allocation14_spill]] %s4224_s1 }
   0x3   :  { %4266 = sst [smem:[#allocation15_spill]] %s4225_s2 }
   0x4   :  { %4267 = sst [smem:[#allocation16_spill]] %s4226_s3 }
   0x5   :  { %4268 = sst [smem:[#allocation17_spill]] %s4227_s4 }
   0x6   :  { %4269 = sst [smem:[#allocation18_spill]] %s4228_s5 }
   0x7   :  { %4270 = sst [smem:[#allocation19_spill]] %s4229_s6 }
   0x8   :  { %4271 = sst [smem:[#allocation20_spill]] %s4230_s7 }
   0x9   :  { %4272 = sst [smem:[#allocation21_spill]] %s4231_s8 }
   0xa   :  { %4273 = sst [smem:[#allocation22_spill]] %s4232_s9 }
   0xb   :  { %4274 = sst [smem:[#allocation23_spill]] %s4233_s10 }
   0xc   :  { %4275 = sst [smem:[#allocation24_spill]] %s4235_s12 }
   0xd   :  { %4276 = sst [smem:[#allocation25_spill]] %s4237_s14 }
   0xe   :  { %4277 = sst [smem:[#allocation26_spill]] %s4241_s18 }
   0xf   :  { %4278 = sst [smem:[#allocation27_spill]] %s4245_s22 }
  0x10   :  { %4279 = sst [smem:[#allocation28_spill]] %s4246_s23 }
  0x11   :  { %4280 = sst [smem:[#allocation29_spill]] %s4247_s24 }
  0x12   :  { %4281 = sst [smem:[#allocation30_spill]] %s4248_s25 }
  0x13   :  { %4282 = sst [smem:[#allocation31_spill]] %s4249_s26 }
  0x14 LB: > { %4283 = sst [smem:[#allocation9_spill]] %s3467_s27  ;;  %s3628_s3 = sadd.s32 4294967295, %s3467_s27   ;;  %s3467_s27 = sphi %s3622_s27, %s36_s27  }
  0x15   : > { %4284 = sst [smem:[#allocation10_spill]] %s3628_s3  ;;  %p3042_p0 = scmp.ge.s32.totalorder %s3467_s27, 1 }
  0x16   : > { %p871_p1 = scmp.lt.s32.totalorder %s3467_s27, 3 }
  0x18   : > { %p872_p2 = pnand %p3042_p0, %p871_p1 }
  0x1a   : > { %875 = sbr.rel (%p872_p2) target bundleno = 4409 (0x1139), region = 124 }
  0x1f   : > { %p1005_p3 = scmp.lt.s32.totalorder %s3628_s3, 1  ;;  %s4286_s2 = sld [smem:[#allocation17_spill]] }
  0x20   : > { %s4288_s1 = sld [smem:[#allocation19_spill]] }
  0x21   : > { %s3634_s7 = scalar_select %p1005_p3, %s3628_s3, 1 }
  0x22   : > { %s4293_s10 = sld [smem:[#allocation23_spill]] }
  0x23   : > { %s3120_s28 = sshll.u32 %s3634_s7, 4  ;;  %s4294_s12 = sld [smem:[#allocation24_spill]] }
  0x24   : > { %s4295_s14 = sld [smem:[#allocation25_spill]] }
  0x25   : > { %s3644_s5 = scalar_lea.vmem %s4286_s2, %s3120_s28  ;;  %s4296_s18 = sld [smem:[#allocation26_spill]] }
  0x26   : > { %4287 = sst [smem:[#allocation11_spill]] %s3644_s5  ;;  %s3649_s27 = scalar_lea.vmem %s4288_s1, %s3120_s28 }
  0x27   : > { %4289 = sst [smem:[#allocation12_spill]] %s3649_s27 }
  0x28   : > { %s3666_s6 = scalar_lea.vmem %s4293_s10, %s3120_s28  ;;  %s4299_s9 = sld [smem:[#allocation10_spill]] }
  0x29   : > { %s3675_s23 = scalar_lea.vmem %s4294_s12, %s3120_s28  ;;  %s3126_s12 = sshll.u32 %s3634_s7, 6 }
  0x2a   : > { %s3684_s2 = scalar_lea.vmem %s4295_s14, %s3120_s28  ;;  %s3711_s10 = scalar_lea.vmem %s4243_s20, %s3126_s12 }
  0x2b   : > { %s3701_s4 = scalar_lea.vmem %s4296_s18, %s3120_s28 }
  0x2e   : > { %p3057_p4 = scmp.ne.s32.totalorder %s4299_s9, 0 }
  0x2f   : > { %s4300_s22 = sld [smem:[#allocation13_spill]] (!%p3057_p4) }
  0x30   : > { %1083 = sbr.rel (%p3057_p4) target bundleno = 55 (0x37), region = 128 }
  0x35   : > { %v1084_v0 = vld [vmem:[%s4300_s22] sm:$0xff]  ;;  %vm1086_vm0 = vcmask 261120   ;;  %v1085_v1 = vld [vmem:[%s4300_s22 + $0x8] sm:$0xff] }
  0x36   : > { %1087 = vst.msk [vmem:[#allocation2] sm:$0xff] %vm1086_vm0, %v1084_v0  ;;  %1088 = vst.msk [vmem:[#allocation2 + $0x8] sm:$0xff] %vm1086_vm0, %v1085_v1 }
  0x37 PF: > { %s4301_s29 = sld [smem:[#allocation11_spill]]  ;;  %v3469_v3 = vmov 0.0   ;;  %vm3470_vm1 = vmmov 0   ;;  %vm1117_vm2 = vcmask 261120   ;;  %vm1175_vm3 = vcmask 64512   ;;  %s3471_s1 = smov 96  }
  0x38   : > { %3189 = vmatprep.subr.bf16.mxu0 %v3469_v3  ;;  %3193 = vmatprep.mubr.msk.bf16.mxu0 %vm3470_vm1, %v3469_v3  ;;  %s4302_s0 = sld [smem:[#allocation18_spill]]  ;;  %s3472_s26 = smov 80   ;;  %vm1638_vm4 = vcmask 130112   ;;  %vm1649_vm5 = vcmask 195712   ;;  %vm1660_vm6 = vcmask 261312  }
  0x39   : > { %s3473_s28 = smov 88   ;;  %s3474_s8 = smov 72  }
  0x3a   : > { %s3475_s9 = smov 120   ;;  %s3476_s30 = smov 112  }
  0x3b   : > { %s3477_s12 = smov 104   ;;  %s4304_s14 = sld [smem:[#allocation15_spill]] }
  0x3c   : > { %s3478_s18 = smov 48   ;;  %s3479_s5 = smov 40  }
  0x3d   : > { %v3363_v2 = vld [vmem:[%s4301_s29 + $0x8] sm:$0xff]   ;;  %v3364_v4 = vld [vmem:[%s4301_s29] sm:$0xff]   ;;  %s3480_s29 = smov 64   ;;  %s3481_s24 = smov 56  }
  0x3e   : > { %3190 = vmatpush3.bf16.msra.mxu0 %v3363_v2  ;;  %v3737_v5 = vld [vmem:[#allocation2] sm:$0xff]  ;;  %v3739_v6 = vld [vmem:[#allocation2 + $0x8] sm:$0xff]  ;;  %s4303_s27 = scalar_lea.vmem %s4302_s0, %s3634_s7  ;;  %s4305_s3 = sld [smem:[#allocation12_spill]] }
  0x3f   : > { %3191 = vmatprep.subr.bf16.mxu0 %v3469_v3  ;;  %v1093_v7 = vpack.c.bf16 %v3739_v6, %v3737_v5  ;;  %v3058_v8 = vld [vmem:[%s4303_s27] ss:$0 sm:$0xff]  ;;  %s3482_s25 = smov 16   ;;  %s4262_s0 = smov 8  }
  0x40   : > { %s4260_s27 = smov 24  }
  0x41   : > { %v1164_v57 = vld [vmem:[%s4304_s14 + $0x10] sm:$0xff]  ;;  %v1162_v59 = vld [vmem:[%s4304_s14] sm:$0xff]  ;;  %v1165_v62 = vld [vmem:[%s4304_s14 + $0x18] sm:$0xff] }
  0x42   : > { %3192 = vmatpush3.bf16.msra.mxu0 %v3364_v4  ;;  %v1163_v2 = vld [vmem:[%s4304_s14 + $0x8] sm:$0xff] }
  0x45   : > { %3194 = vmatmul.mubr.msk.bf16.vlgmr.msra.gmra.mxu0 %vm1117_vm2, %v1093_v7 }
 0x105   : > { %v1155_v9 = vpop.f32.mrf.mxu0 }
 0x106   : > { %v3750_v10 = vadd.f32 %v3058_v8, %v1155_v9 }
 0x107   : > { %v3195_v11 = vpop.f32.mrf.mxu0 }
 0x108   : > { %1180 = vrot.lane.b32.xlu1 %v3750_v10, %s3471_s1  ;;  %1228 = vrot.lane.b32.xlu0 %v3750_v10, %s3472_s26  ;;  %1176 = vst.msk [vmem:[#allocation3] sm:$0xff] %vm1175_vm3, %v3750_v10 }
 0x109   : > { %v1158_v12 = vpop.f32.mrf.mxu0 }
 0x10a   : > { %v3758_v13 = vadd.f32 %v3058_v8, %v1158_v12 }
 0x10b   : > { %v3196_v14 = vpop.f32.mrf.mxu0 }
 0x10c   : > { %1204 = vrot.lane.b32.xlu1 %v3750_v10, %s3473_s28  ;;  %1252 = vrot.lane.b32.xlu0 %v3750_v10, %s3474_s8  ;;  %1177 = vst.msk [vmem:[#allocation3 + $0x20] sm:$0xff] %vm1175_vm3, %v3758_v13  ;;  %v1168_v14 = vld [vmem:[%s4304_s14 + $0x30] sm:$0xff] }
 0x10f   : > { %v1268_v32 = vld [vmem:[#allocation3] sm:$0xff] }
 0x110   : > { %1196 = vrot.lane.b32.xlu0 %v3750_v10, %s3475_s9  ;;  %1230 = vrot.lane.b32.xlu1 %v3758_v13, %s3472_s26 }
 0x113   : > { %v1272_v44 = vld [vmem:[#allocation3 + $0x20] sm:$0xff] }
 0x114   : > { %1254 = vrot.lane.b32.xlu0 %v3758_v13, %s3474_s8  ;;  %1220 = vrot.lane.b32.xlu1 %v3750_v10, %s3476_s30 }
 0x118   : > { %1244 = vrot.lane.b32.xlu0 %v3750_v10, %s3477_s12  ;;  %1182 = vrot.lane.b32.xlu1 %v3758_v13, %s3471_s1 }
 0x11c   : > { %1206 = vrot.lane.b32.xlu0 %v3758_v13, %s3473_s28  ;;  %1198 = vrot.lane.b32.xlu1 %v3758_v13, %s3475_s9 }
 0x120   : > { %1222 = vrot.lane.b32.xlu0 %v3758_v13, %s3476_s30  ;;  %1246 = vrot.lane.b32.xlu1 %v3758_v13, %s3477_s12 }
 0x17a   : > { %v1181_v15 = vpop.permute.xlu1 %1180  ;;  %v1229_v16 = vpop.permute.xlu0 %1228 }
 0x17b   : > { %1186 = vst.msk [vmem:[#allocation4] sm:$0xff] %vm1175_vm3, %v1181_v15  ;;  %1234 = vst.msk [vmem:[#allocation4 + $0x10] sm:$0xff] %vm1175_vm3, %v1229_v16  ;;  %v1166_v16 = vld [vmem:[%s4304_s14 + $0x20] sm:$0xff] }
 0x17e   : > { %v1205_v17 = vpop.permute.xlu1 %1204  ;;  %v1253_v18 = vpop.permute.xlu0 %1252 }
 0x17f   : > { %1210 = vst.msk [vmem:[#allocation4 + $0x8] sm:$0xff] %vm1175_vm3, %v1205_v17  ;;  %1258 = vst.msk [vmem:[#allocation4 + $0x18] sm:$0xff] %vm1175_vm3, %v1253_v18 }
 0x182   : > { %v1197_v19 = vpop.permute.xlu0 %1196  ;;  %v1231_v20 = vpop.permute.xlu1 %1230  ;;  %v1282_v23 = vld [vmem:[#allocation4 + $0x10] sm:$0xff]  ;;  %v1280_v27 = vld [vmem:[#allocation4] sm:$0xff] }
 0x183   : > { %1202 = vst.msk [vmem:[#allocation3 + $0x8] sm:$0xff] %vm1175_vm3, %v1197_v19  ;;  %1235 = vst.msk [vmem:[#allocation4 + $0x30] sm:$0xff] %vm1175_vm3, %v1231_v20 }
 0x186   : > { %v1255_v21 = vpop.permute.xlu0 %1254  ;;  %v1221_v22 = vpop.permute.xlu1 %1220  ;;  %v1283_v24 = vld [vmem:[#allocation4 + $0x18] sm:$0xff]  ;;  %v1281_v25 = vld [vmem:[#allocation4 + $0x8] sm:$0xff] }
 0x187   : > { %1259 = vst.msk [vmem:[#allocation4 + $0x38] sm:$0xff] %vm1175_vm3, %v1255_v21  ;;  %1226 = vst.msk [vmem:[#allocation3 + $0x10] sm:$0xff] %vm1175_vm3, %v1221_v22  ;;  %v1289_v26 = vpack.c.bf16 %v1283_v24, %v1282_v23  ;;  %v1288_v29 = vpack.c.bf16 %v1281_v25, %v1280_v27  ;;  %v1167_v22 = vld [vmem:[%s4304_s14 + $0x28] sm:$0xff]  ;;  %v1169_v24 = vld [vmem:[%s4304_s14 + $0x38] sm:$0xff] }
 0x189   : > { %3329 = vmatprep.subr.msk.bf16.mxu1 %vm1175_vm3, %v1289_v26  ;;  %v1314_v28 = vsel %vm1175_vm3, %v1289_v26, 0  ;;  %v1311_v39 = vsel %vm1175_vm3, %v1288_v29, 0 }
 0x18a   : > { %3198 = vmatpush3.bf16.xpose.msra.mxu1 %v1314_v28  ;;  %v1245_v30 = vpop.permute.xlu0 %1244  ;;  %v1183_v31 = vpop.permute.xlu1 %1182  ;;  %v1269_v33 = vld [vmem:[#allocation3 + $0x8] sm:$0xff]  ;;  %v1286_v38 = vld [vmem:[#allocation4 + $0x30] sm:$0xff] }
 0x18b   : > { %1250 = vst.msk [vmem:[#allocation3 + $0x18] sm:$0xff] %vm1175_vm3, %v1245_v30  ;;  %1187 = vst.msk [vmem:[#allocation4 + $0x20] sm:$0xff] %vm1175_vm3, %v1183_v31  ;;  %3330 = vmatprep.subr.msk.bf16.mxu1 %vm1175_vm3, %v1288_v29  ;;  %v1276_v34 = vpack.c.bf16 %v1269_v33, %v1268_v32 }
 0x18d   : > { %3201 = vmatprep.mubr.msk.bf16.mxu1 %vm1175_vm3, %v1276_v34 }
 0x18e   : > { %v1207_v35 = vpop.permute.xlu0 %1206  ;;  %v1199_v36 = vpop.permute.xlu1 %1198  ;;  %v1287_v37 = vld [vmem:[#allocation4 + $0x38] sm:$0xff]  ;;  %v1270_v45 = vld [vmem:[#allocation3 + $0x10] sm:$0xff] }
 0x18f   : > { %1211 = vst.msk [vmem:[#allocation4 + $0x28] sm:$0xff] %vm1175_vm3, %v1207_v35  ;;  %1203 = vst.msk [vmem:[#allocation3 + $0x28] sm:$0xff] %vm1175_vm3, %v1199_v36  ;;  %v1291_v40 = vpack.c.bf16 %v1287_v37, %v1286_v38 }
 0x191   : > { %v1375_v51 = vsel %vm1175_vm3, %v1291_v40, 0 }
 0x192   : > { %3200 = vmatpush3.bf16.xpose.msra.mxu1 %v1311_v39  ;;  %v1223_v41 = vpop.permute.xlu0 %1222  ;;  %v1247_v42 = vpop.permute.xlu1 %1246  ;;  %v1271_v43 = vld [vmem:[#allocation3 + $0x18] sm:$0xff]  ;;  %v1284_v50 = vld [vmem:[#allocation4 + $0x20] sm:$0xff] }
 0x193   : > { %1227 = vst.msk [vmem:[#allocation3 + $0x30] sm:$0xff] %vm1175_vm3, %v1223_v41  ;;  %1251 = vst.msk [vmem:[#allocation3 + $0x38] sm:$0xff] %vm1175_vm3, %v1247_v42  ;;  %3331 = vmatprep.subr.msk.bf16.mxu1 %vm1175_vm3, %v1291_v40  ;;  %v1277_v48 = vpack.c.bf16 %v1271_v43, %v1270_v45 }
 0x196   : > { %v1273_v46 = vld [vmem:[#allocation3 + $0x28] sm:$0xff] }
 0x197   : > { %v1285_v47 = vld [vmem:[#allocation4 + $0x28] sm:$0xff]  ;;  %v1278_v49 = vpack.c.bf16 %v1273_v46, %v1272_v44 }
 0x198   : > { %v1290_v52 = vpack.c.bf16 %v1285_v47, %v1284_v50 }
 0x199   : > { %3202 = vmatmul.mubr.msk.bf16.vlgmr.msra.gmra.mxu1 %vm1175_vm3, %v1277_v48 }
 0x19a   : > { %3206 = vmatpush3.bf16.xpose.msra.mxu1 %v1375_v51  ;;  %3209 = vmatprep.mubr.msk.bf16.mxu1 %vm1175_vm3, %v1278_v49  ;;  %v1372_v53 = vsel %vm1175_vm3, %v1290_v52, 0  ;;  %v1274_v54 = vld [vmem:[#allocation3 + $0x30] sm:$0xff]  ;;  %v1275_v55 = vld [vmem:[#allocation3 + $0x38] sm:$0xff] }
 0x19b   : > { %3332 = vmatprep.subr.msk.bf16.mxu1 %vm1175_vm3, %v1290_v52  ;;  %v1279_v56 = vpack.c.bf16 %v1275_v55, %v1274_v54 }
 0x1a2   : > { %3208 = vmatpush3.bf16.xpose.msra.mxu1 %v1372_v53 }
 0x1a9   : > { %3210 = vmatmul.mubr.msk.bf16.vlgmr.msra.gmra.mxu1 %vm1175_vm3, %v1279_v56 }
 0x259   : > { %v3203_v58 = vpop.f32.mrf.mxu1 }
 0x25a   : > { %v1359_v60 = vadd.f32 %v3203_v58, %v1164_v57 }
 0x25b   : > { %v1350_v61 = vpop.f32.mrf.mxu1 }
 0x25c   : > { %v1351_v63 = vadd.f32 %v1350_v61, %v1162_v59  ;;  %v1432_v0 = vsel %vm1117_vm2, %v1359_v60, -inf }
 0x25d   : > { %1433 = vmax.xlane.f32.xlu1 %v1432_v0  ;;  %v3204_v1 = vpop.f32.mrf.mxu1 }
 0x25e   : > { %v1362_v4 = vadd.f32 %v3204_v1, %v1165_v62  ;;  %v1426_v7 = vsel %vm1117_vm2, %v1351_v63, -inf }
 0x25f   : > { %v1353_v8 = vpop.f32.mrf.mxu1  ;;  %1427 = vmax.xlane.f32.xlu0 %v1426_v7 }
 0x260   : > { %v1354_v9 = vadd.f32 %v1353_v8, %v1163_v2  ;;  %v1435_v12 = vsel %vm1117_vm2, %v1362_v4, -inf }
 0x262   : > { %v1429_v11 = vsel %vm1117_vm2, %v1354_v9, -inf }
 0x263   : > { %1430 = vmax.xlane.f32.xlu1 %v1429_v11  ;;  %1436 = vmax.xlane.f32.xlu0 %v1435_v12 }
 0x269   : > { %v3211_v15 = vpop.f32.mrf.mxu1 }
 0x26a   : > { %v1420_v17 = vadd.f32 %v3211_v15, %v1168_v14 }
 0x26b   : > { %v1411_v18 = vpop.f32.mrf.mxu1 }
 0x26c   : > { %v1412_v19 = vadd.f32 %v1411_v18, %v1166_v16  ;;  %v1444_v20 = vsel %vm1117_vm2, %v1420_v17, -inf }
 0x26d   : > { %1445 = vmax.xlane.f32.xlu1 %v1444_v20  ;;  %v3212_v21 = vpop.f32.mrf.mxu1 }
 0x26e   : > { %v1438_v23 = vsel %vm1117_vm2, %v1412_v19, -inf  ;;  %v1423_v27 = vadd.f32 %v3212_v21, %v1169_v24 }
 0x26f   : > { %v1414_v25 = vpop.f32.mrf.mxu1  ;;  %1439 = vmax.xlane.f32.xlu0 %v1438_v23 }
 0x270   : > { %v1415_v26 = vadd.f32 %v1414_v25, %v1167_v22  ;;  %v1447_v29 = vsel %vm1117_vm2, %v1423_v27, -inf }
 0x272   : > { %v1441_v28 = vsel %vm1117_vm2, %v1415_v26, -inf }
 0x273   : > { %1442 = vmax.xlane.f32.xlu0 %v1441_v28 }
 0x277   : > { %1448 = vmax.xlane.f32.xlu0 %v1447_v29 }
 0x27e   : > { %1236 = vrot.lane.b32.xlu1 %v3750_v10, %s3478_s18 }
 0x282   : > { %1260 = vrot.lane.b32.xlu1 %v3750_v10, %s3479_s5 }
 0x286   : > { %1262 = vrot.lane.b32.xlu1 %v3758_v13, %s3479_s5  ;;  %s4308_s5 = sld [smem:[#allocation14_spill]] }
 0x28a   : > { %1190 = vrot.lane.b32.xlu1 %v3758_v13, %s3480_s29 }
 0x28d   : > { %1238 = vrot.lane.b32.xlu0 %v3758_v13, %s3478_s18  ;;  %s4309_s18 = scalar_lea.vmem %s4236_s13, %s3634_s7 }
 0x291   : > { %1188 = vrot.lane.b32.xlu0 %v3750_v10, %s3480_s29  ;;  %s4306_s29 = sld [smem:[#allocation20_spill]] }
 0x2e6   : > { %v1434_v30 = vpop.xlane.xlu1 %1433 }
 0x2e7   : > { %v1452_v31 = vsub.f32 %v1359_v60, %v1434_v30 }
 0x2e8   : > { %v1428_v32 = vpop.xlane.xlu0 %1427 }
 0x2e9   : > { %v1462_v33 = vmul.f32 1.442695, %v1452_v31  ;;  %v1450_v34 = vsub.f32 %v1351_v63, %v1428_v32 }
 0x2eb   : > { %3383 = vpow2.f32 %v1462_v33  ;;  %v1458_v35 = vmul.f32 1.442695, %v1450_v34 }
 0x2ec   : > { %v1437_v36 = vpop.xlane.xlu0 %1436  ;;  %v1431_v37 = vpop.xlane.xlu1 %1430 }
 0x2ed   : > { %3385 = vpow2.f32 %v1458_v35  ;;  %v1453_v38 = vsub.f32 %v1362_v4, %v1437_v36  ;;  %v1451_v39 = vsub.f32 %v1354_v9, %v1431_v37 }
 0x2ef   : > { %v1464_v40 = vmul.f32 1.442695, %v1453_v38  ;;  %v1460_v41 = vmul.f32 1.442695, %v1451_v39 }
 0x2f1   : > { %3387 = vpow2.f32 %v1464_v40 }
 0x2f2   : > { %3389 = vpow2.f32 %v1460_v41 }
 0x2f6   : > { %v1446_v42 = vpop.xlane.xlu1 %1445 }
 0x2f7   : > { %v1456_v43 = vsub.f32 %v1420_v17, %v1446_v42 }
 0x2f8   : > { %v3850_v44 = vpop.eup %3383  ;;  %v1440_v45 = vpop.xlane.xlu0 %1439 }
 0x2f9   : > { %v1470_v46 = vmul.f32 1.442695, %v1456_v43  ;;  %v1454_v47 = vsub.f32 %v1412_v19, %v1440_v45  ;;  %v1480_v48 = vsel %vm1117_vm2, %v3850_v44, 0.0 }
 0x2fa   : > { %v3854_v49 = vpop.eup %3385  ;;  %1481 = vadd.xlane.f32.xlu1 %v1480_v48  ;;  %v1237_v50 = vpop.permute.xlu1 %1236 }
 0x2fb   : > { %3391 = vpow2.f32 %v1470_v46  ;;  %v1466_v51 = vmul.f32 1.442695, %v1454_v47  ;;  %1242 = vst.msk [vmem:[#allocation5 + $0x10] sm:$0xff] %vm1175_vm3, %v1237_v50  ;;  %v1474_v53 = vsel %vm1117_vm2, %v3854_v49, 0.0 }
 0x2fc   : > { %v1443_v52 = vpop.xlane.xlu0 %1442 }
 0x2fd   : > { %3393 = vpow2.f32 %v1466_v51  ;;  %v1455_v56 = vsub.f32 %v1415_v26, %v1443_v52 }
 0x2fe   : > { %v3859_v54 = vpop.eup %3387  ;;  %1475 = vadd.xlane.f32.xlu1 %v1474_v53  ;;  %v1261_v55 = vpop.permute.xlu1 %1260 }
 0x2ff   : > { %1266 = vst.msk [vmem:[#allocation5 + $0x18] sm:$0xff] %vm1175_vm3, %v1261_v55  ;;  %v1483_v57 = vsel %vm1117_vm2, %v3859_v54, 0.0  ;;  %v3390_v58 = vpop.eup %3389  ;;  %v1468_v62 = vmul.f32 1.442695, %v1455_v56 }
 0x300   : > { %1484 = vadd.xlane.f32.xlu0 %v1483_v57  ;;  %v1449_v59 = vpop.xlane.xlu0 %1448  ;;  %v1477_v0 = vsel %vm1117_vm2, %v3390_v58, 0.0 }
 0x301   : > { %v1457_v60 = vsub.f32 %v1423_v27, %v1449_v59 }
 0x302   : > { %v1263_v61 = vpop.permute.xlu1 %1262  ;;  %v1294_v4 = vld [vmem:[#allocation5 + $0x10] sm:$0xff] }
 0x303   : > { %v1472_v63 = vmul.f32 1.442695, %v1457_v60  ;;  %1267 = vst.msk [vmem:[#allocation5 + $0x38] sm:$0xff] %vm1175_vm3, %v1263_v61  ;;  %v3366_v60 = vld [vmem:[%s4305_s3] sm:$0xff]  }
 0x304   : > { %1478 = vadd.xlane.f32.xlu0 %v1477_v0  ;;  %v1239_v1 = vpop.permute.xlu0 %1238 }
 0x305   : > { %3395 = vpow2.f32 %v1472_v63  ;;  %1243 = vst.msk [vmem:[#allocation5 + $0x30] sm:$0xff] %vm1175_vm3, %v1239_v1 }
 0x306   : > { %v1191_v2 = vpop.permute.xlu1 %1190  ;;  %v1295_v7 = vld [vmem:[#allocation5 + $0x18] sm:$0xff]  ;;  %3397 = vpow2.f32 %v1468_v62 }
 0x307   : > { %1195 = vst.msk [vmem:[#allocation5 + $0x20] sm:$0xff] %vm1175_vm3, %v1191_v2  ;;  %v1301_v8 = vpack.c.bf16 %v1295_v7, %v1294_v4 }
 0x308   : > { %v3868_v9 = vpop.eup %3391  ;;  %v1189_v11 = vpop.permute.xlu0 %1188 }
 0x309   : > { %1194 = vst.msk [vmem:[#allocation5] sm:$0xff] %vm1175_vm3, %v1189_v11  ;;  %3213 = vmatprep.subr.bf16.mxu1 %v1301_v8  ;;  %v1492_v12 = vsel %vm1117_vm2, %v3868_v9, 0.0 }
 0x30a   : > { %v3873_v14 = vpop.eup %3393  ;;  %1493 = vadd.xlane.f32.xlu1 %v1492_v12  ;;  %3214 = vmatpush3.bf16.msra.mxu1 %v1301_v8  ;;  %v1299_v16 = vld [vmem:[#allocation5 + $0x38] sm:$0xff] }
 0x30b   : > { %v1486_v17 = vsel %vm1117_vm2, %v3873_v14, 0.0 }
 0x30c   : > { %v1298_v15 = vld [vmem:[#allocation5 + $0x30] sm:$0xff] }
 0x30d   : > { %v1303_v18 = vpack.c.bf16 %v1299_v16, %v1298_v15 }
 0x30e   : > { %1487 = vadd.xlane.f32.xlu1 %v1486_v17  ;;  %v1296_v35 = vld [vmem:[#allocation5 + $0x20] sm:$0xff] }
 0x30f   : > { %3221 = vmatprep.subr.bf16.mxu0 %v1303_v18 }
 0x310   : > { %3222 = vmatpush3.bf16.msra.mxu0 %v1303_v18  ;;  %v1292_v43 = vld [vmem:[#allocation5] sm:$0xff] }
 0x312   : > { %v3396_v19 = vpop.eup %3395 }
 0x313   : > { %v1495_v20 = vsel %vm1117_vm2, %v3396_v19, 0.0  ;;  %v3398_v21 = vpop.eup %3397 }
 0x314   : > { %1496 = vadd.xlane.f32.xlu0 %v1495_v20  ;;  %v1489_v22 = vsel %vm1117_vm2, %v3398_v21, 0.0 }
 0x318   : > { %1490 = vadd.xlane.f32.xlu0 %v1489_v22 }
 0x31f   : > { %1214 = vrot.lane.b32.xlu1 %v3758_v13, %s3481_s24 }
 0x32e   : > { %1212 = vrot.lane.b32.xlu0 %v3750_v10, %s3481_s24  ;;  %s4307_s24 = scalar_lea.vmem %s4306_s29, %s3634_s7  ;;  %s4321_s29 = scalar_lea.vmem %s4242_s19, %s3634_s7 }
 0x32f   : > { %v3070_v17 = vld [vmem:[%s4307_s24] ss:$0 sm:$0xff]  ;;  %s4310_s24 = sld [smem:[#allocation21_spill]] }
 0x383   : > { %v1482_v23 = vpop.xlane.xlu1 %1481 }
 0x387   : > { %v1476_v24 = vpop.xlane.xlu1 %1475 }
 0x388   : > { %3399 = vrcp.f32 %v1476_v24 }
 0x389   : > { %v1485_v25 = vpop.xlane.xlu0 %1484 }
 0x38d   : > { %v1479_v26 = vpop.xlane.xlu0 %1478 }
 0x38e   : > { %3401 = vrcp.f32 %v1479_v26 }
 0x38f   : > { %3403 = vrcp.f32 %v1482_v23 }
 0x390   : > { %3405 = vrcp.f32 %v1485_v25 }
 0x393   : > { %v1494_v27 = vpop.xlane.xlu1 %1493 }
 0x395   : > { %v3400_v29 = vpop.eup %3399 }
 0x396   : > { %v1506_v32 = vmul.f32 %v3400_v29, %v3854_v49  ;;  %v3368_v29 = vld [vmem:[%s3675_s23] sm:$0xff]  }
 0x397   : > { %v1488_v28 = vpop.xlane.xlu1 %1487 }
 0x39b   : > { %v3402_v30 = vpop.eup %3401  ;;  %v1215_v31 = vpop.permute.xlu1 %1214 }
 0x39c   : > { %1219 = vst.msk [vmem:[#allocation5 + $0x28] sm:$0xff] %vm1175_vm3, %v1215_v31  ;;  %v1507_v33 = vmul.f32 %v3402_v30, %v3390_v58  ;;  %v3404_v39 = vpop.eup %3403  ;;  %v1091_v30 = vld [vmem:[%s4308_s5] sm:$0xff] }
 0x39d   : > { %v1497_v13 = vpop.xlane.xlu0 %1496  ;;  %v3406_v40 = vpop.eup %3405  ;;  %v1508_v51 = vmul.f32 %v3404_v39, %v3850_v44  ;;  %v3365_v44 = vld [vmem:[%s4305_s3 + $0x8] sm:$0xff]  }
 0x39e   : > { %v1514_v10 = vpack.c.bf16 %v1507_v33, %v1506_v32  ;;  %3407 = vrcp.f32 %v1497_v13  ;;  %v1509_v48 = vmul.f32 %v3406_v40, %v3859_v54  ;;  %v3369_v39 = vld [vmem:[%s3666_s6 + $0x8] sm:$0xff]   ;;  %v3370_v40 = vld [vmem:[%s3666_s6] sm:$0xff]   ;;  %s4314_s6 = scalar_lea.vmem %s4234_s11, %s3634_s7 }
 0x39f   : > { %3409 = vrcp.f32 %v1488_v28  ;;  %v3367_v28 = vld [vmem:[%s3675_s23 + $0x8] sm:$0xff]   ;;  %s4311_s23 = scalar_lea.vmem %s4310_s24, %s3634_s7 }
 0x3a0   : > { %3217 = vmatprep.mubr.msk.bf16.mxu1 %vm1117_vm2, %v1514_v10  ;;  %3411 = vrcp.f32 %v1494_v27  ;;  %v1515_v56 = vpack.c.bf16 %v1509_v48, %v1508_v51 }
 0x3a1   : > { %v1491_v34 = vpop.xlane.xlu0 %1490 }
 0x3a2   : > { %3413 = vrcp.f32 %v1491_v34 }
 0x3a3   : > { %v1297_v36 = vld [vmem:[#allocation5 + $0x28] sm:$0xff] }
 0x3a4   : > { %v1302_v37 = vpack.c.bf16 %v1297_v36, %v1296_v35 }
 0x3a5   : > { %v1213_v38 = vpop.permute.xlu0 %1212 }
 0x3a6   : > { %1218 = vst.msk [vmem:[#allocation5 + $0x8] sm:$0xff] %vm1175_vm3, %v1213_v38  ;;  %3223 = vmatprep.subr.bf16.mxu0 %v1302_v37 }
 0x3a7   : > { %3224 = vmatpush3.bf16.msra.mxu0 %v1302_v37 }
 0x3a8   : > { %3237 = vmatprep.subr.bf16.mxu0 %v3469_v3 }
 0x3ab   : > { %v3408_v41 = vpop.eup %3407 }
 0x3ac   : > { %v3410_v42 = vpop.eup %3409  ;;  %v1513_v50 = vmul.f32 %v3408_v41, %v3396_v19  ;;  %v3080_v41 = vld [vmem:[%s4309_s18] ss:$0 sm:$0xff]  ;;  %s4319_s18 = scalar_lea.vmem %s4239_s16, %s3634_s7 }
 0x3ad   : > { %v1293_v45 = vld [vmem:[#allocation5 + $0x8] sm:$0xff]  ;;  %v3412_v46 = vpop.eup %3411  ;;  %v1510_v52 = vmul.f32 %v3410_v42, %v3873_v14 }
 0x3ae   : > { %v1300_v47 = vpack.c.bf16 %v1293_v45, %v1292_v43  ;;  %v1512_v55 = vmul.f32 %v3412_v46, %v3868_v9 }
 0x3af   : > { %v3414_v49 = vpop.eup %3413 }
 0x3b0   : > { %3215 = vmatprep.subr.bf16.mxu1 %v1300_v47  ;;  %v1511_v53 = vmul.f32 %v3414_v49, %v3398_v21  ;;  %v1517_v58 = vpack.c.bf16 %v1513_v50, %v1512_v55 }
 0x3b1   : > { %3216 = vmatpush3.bf16.msra.mxu1 %v1300_v47 }
 0x3b2   : > { %v1516_v57 = vpack.c.bf16 %v1511_v53, %v1510_v52  ;;  %3229 = vmatprep.subr.bf16.mxu1 %v3469_v3 }
 0x3b4   : > { %3218 = vmatmul.mubr.msk.bf16.vlgmr.msra.gmra.mxu1 %vm1117_vm2, %v1515_v56  ;;  %3225 = vmatprep.mubr.msk.bf16.mxu0 %vm1117_vm2, %v1516_v57 }
 0x3b5   : > { %3226 = vmatmul.mubr.msk.bf16.vlgmr.msra.gmra.mxu0 %vm1117_vm2, %v1517_v58  ;;  %3233 = vmatprep.mubr.msk.bf16.mxu1 %vm3470_vm1, %v3469_v3  ;;  %v3074_v58 = vld [vmem:[%s4311_s23] ss:$0 sm:$0xff] }
 0x3b6   : > { %3241 = vmatprep.mubr.msk.bf16.mxu0 %vm3470_vm1, %v3469_v3  ;;  %3230 = vmatpush3.bf16.msra.mxu1 %v3365_v44 }
 0x3b7   : > { %3231 = vmatprep.subr.bf16.mxu1 %v3469_v3  ;;  %3238 = vmatpush3.bf16.msra.mxu0 %v3369_v39 }
 0x3b8   : > { %3239 = vmatprep.subr.bf16.mxu0 %v3469_v3 }
 0x3ba   : > { %3232 = vmatpush3.bf16.msra.mxu1 %v3366_v60 }
 0x3bb   : > { %3245 = vmatprep.subr.bf16.mxu1 %v3469_v3  ;;  %3240 = vmatpush3.bf16.msra.mxu0 %v3370_v40 }
 0x474   : > { %v3219_v54 = vpop.f32.mrf.mxu1 }
 0x475   : > { %1643 = vrot.lane.b32.xlu0 %v3219_v54, %s3482_s25  ;;  %v3227_v59 = vpop.f32.mrf.mxu0 }
 0x476   : > { %v1558_v61 = vpop.f32.mrf.mxu1  ;;  %1645 = vrot.lane.b32.xlu1 %v3227_v59, %s3482_s25 }
 0x477   : > { %1628 = vst.msk [vmem:[#allocation8] sm:$0xff] %vm1175_vm3, %v1558_v61  ;;  %v1613_v62 = vpop.f32.mrf.mxu0 }
 0x478   : > { %1629 = vst.msk [vmem:[#allocation8 + $0x8] sm:$0xff] %vm1175_vm3, %v1613_v62  ;;  %v3220_v63 = vpop.f32.mrf.mxu1 }
 0x479   : > { %v3228_v0 = vpop.f32.mrf.mxu0 }
 0x47a   : > { %v1561_v1 = vpop.f32.mrf.mxu1 }
 0x47b   : > { %1632 = vrot.lane.b32.xlu0 %v1561_v1, %s4262_s0  ;;  %v1616_v2 = vpop.f32.mrf.mxu0 }
 0x47c   : > { %1634 = vrot.lane.b32.xlu1 %v1616_v2, %s4262_s0 }
 0x47f   : > { %1654 = vrot.lane.b32.xlu0 %v3220_v63, %s4260_s27 }
 0x480   : > { %1656 = vrot.lane.b32.xlu1 %v3228_v0, %s4260_s27  ;;  %s4312_s27 = sld [smem:[#allocation22_spill]] }
 0x486   : > { %s4313_s0 = scalar_lea.vmem %s4312_s27, %s3634_s7 }
 0x487   : > { %v3075_v60 = vld [vmem:[%s4313_s0] ss:$0 sm:$0xff] }
 0x4e7   : > { %v1644_v4 = vpop.permute.xlu0 %1643 }
 0x4e8   : > { %v1646_v7 = vpop.permute.xlu1 %1645 }
 0x4ed   : > { %v1633_v8 = vpop.permute.xlu0 %1632 }
 0x4ee   : > { %1639 = vst.msk [vmem:[#allocation8] sm:$0xff] %vm1638_vm4, %v1633_v8  ;;  %v1635_v9 = vpop.permute.xlu1 %1634 }
 0x4ef   : > { %1640 = vst.msk [vmem:[#allocation8 + $0x8] sm:$0xff] %vm1638_vm4, %v1635_v9 }
 0x4f0   : > { %1650 = vst.msk [vmem:[#allocation8] sm:$0xff] %vm1649_vm5, %v1644_v4  ;;  %1651 = vst.msk [vmem:[#allocation8 + $0x8] sm:$0xff] %vm1649_vm5, %v1646_v7 }
 0x4f1   : > { %v1655_v11 = vpop.permute.xlu0 %1654 }
 0x4f2   : > { %1661 = vst.msk [vmem:[#allocation8] sm:$0xff] %vm1660_vm6, %v1655_v11  ;;  %v1657_v12 = vpop.permute.xlu1 %1656 }
 0x4f3   : > { %1662 = vst.msk [vmem:[#allocation8 + $0x8] sm:$0xff] %vm1660_vm6, %v1657_v12 }
 0x4f9   : > { %v1663_v14 = vld [vmem:[#allocation8] sm:$0xff] }
 0x4fa   : > { %v1664_v15 = vld [vmem:[#allocation8 + $0x8] sm:$0xff] }
 0x4fb   : > { %v1665_v16 = vpack.c.bf16 %v1664_v15, %v1663_v14 }
 0x4fd   : > { %3234 = vmatmul.mubr.msk.bf16.vlgmr.msra.gmra.mxu1 %vm1117_vm2, %v1665_v16 }
 0x4fe   : > { %3249 = vmatprep.mubr.msk.bf16.mxu1 %vm3470_vm1, %v3469_v3  ;;  %3246 = vmatpush3.bf16.msra.mxu1 %v3367_v28  ;;  %v3076_v28 = vld [vmem:[%s4314_s6] ss:$0 sm:$0xff]  ;;  %s4320_s6 = scalar_lea.vmem %s4240_s17, %s3634_s7 }
 0x4ff   : > { %3247 = vmatprep.subr.bf16.mxu1 %v3469_v3 }
 0x502   : > { %3248 = vmatpush3.bf16.msra.mxu1 %v3368_v29 }
 0x5bd   : > { %v1721_v18 = vpop.f32.mrf.mxu1 }
 0x5be   : > { %v1722_v19 = vadd.f32 %v3070_v17, %v1721_v18 }
 0x5bf   : > { %v3235_v20 = vpop.f32.mrf.mxu1 }
 0x5c0   : > { %v1728_v21 = vadd.f32 %v1722_v19, %v3737_v5  ;;  %v1092_v5 = vld [vmem:[%s4308_s5 + $0x8] sm:$0xff] }
 0x5c1   : > { %v1724_v22 = vpop.f32.mrf.mxu1  ;;  %v1843_v31 = vpack.c.bf16 %v1092_v5, %v1091_v30 }
 0x5c2   : > { %v1725_v23 = vadd.f32 %v3070_v17, %v1724_v22  ;;  %v1732_v24 = vsel %vm1117_vm2, %v1728_v21, 0.0 }
 0x5c3   : > { %1733 = vadd.xlane.f32.xlu0 %v1732_v24  ;;  %v3236_v25 = vpop.f32.mrf.mxu1  ;;  %3250 = vmatmul.mubr.msk.bf16.vlgmr.msra.gmra.mxu1 %vm1117_vm2, %v1843_v31 }
 0x5c4   : > { %v1729_v26 = vadd.f32 %v1725_v23, %v3739_v6 }
 0x5c6   : > { %v1735_v27 = vsel %vm1117_vm2, %v1729_v26, 0.0 }
 0x5c7   : > { %1736 = vadd.xlane.f32.xlu1 %v1735_v27 }
 0x64c   : > { %v1734_v6 = vpop.xlane.xlu0 %1733 }
 0x64d   : > { %v1739_v32 = vmul.f32 0.03125, %v1734_v6 }
 0x64f   : > { %v1741_v33 = vsub.f32 %v1728_v21, %v1739_v32 }
 0x650   : > { %v1737_v13 = vpop.xlane.xlu1 %1736 }
 0x651   : > { %v1740_v10 = vmul.f32 0.03125, %v1737_v13  ;;  %v1743_v34 = vmul.f32 %v1741_v33, %v1741_v33 }
 0x653   : > { %v1742_v35 = vsub.f32 %v1729_v26, %v1740_v10  ;;  %v1745_v36 = vsel %vm1117_vm2, %v1743_v34, 0.0 }
 0x654   : > { %1746 = vadd.xlane.f32.xlu0 %v1745_v36 }
 0x655   : > { %v1744_v37 = vmul.f32 %v1742_v35, %v1742_v35 }
 0x657   : > { %v1748_v38 = vsel %vm1117_vm2, %v1744_v37, 0.0 }
 0x658   : > { %1749 = vadd.xlane.f32.xlu0 %v1748_v38 }
 0x683   : > { %v1904_v42 = vpop.f32.mrf.mxu1 }
 0x684   : > { %v3948_v43 = vadd.f32 %v3080_v41, %v1904_v42 }
 0x685   : > { %v3251_v45 = vpop.f32.mrf.mxu1 }
 0x686   : > { %1926 = vst.msk [vmem:[#allocation6] sm:$0xff] %vm1175_vm3, %v3948_v43  ;;  %1972 = vrot.lane.b32.xlu1 %v3948_v43, %s3476_s30 }
 0x687   : > { %v1907_v46 = vpop.f32.mrf.mxu1 }
 0x688   : > { %v3954_v47 = vadd.f32 %v3080_v41, %v1907_v46 }
 0x689   : > { %v3252_v48 = vpop.f32.mrf.mxu1 }
 0x68a   : > { %1996 = vrot.lane.b32.xlu1 %v3948_v43, %s3477_s12  ;;  %1927 = vst.msk [vmem:[#allocation6 + $0x20] sm:$0xff] %vm1175_vm3, %v3954_v47  ;;  %1974 = vrot.lane.b32.xlu0 %v3954_v47, %s3476_s30 }
 0x68d   : > { %v2024_v20 = vld [vmem:[#allocation6] sm:$0xff] }
 0x68e   : > { %1998 = vrot.lane.b32.xlu1 %v3954_v47, %s3477_s12  ;;  %1948 = vrot.lane.b32.xlu0 %v3948_v43, %s3475_s9 }
 0x691   : > { %v2028_v22 = vld [vmem:[#allocation6 + $0x20] sm:$0xff] }
 0x692   : > { %1950 = vrot.lane.b32.xlu1 %v3954_v47, %s3475_s9 }
 0x6dd   : > { %v1747_v49 = vpop.xlane.xlu0 %1746 }
 0x6de   : > { %v1751_v50 = vmul.f32 0.03125, %v1747_v49 }
 0x6e0   : > { %v1753_v51 = vadd.f32 1e-05, %v1751_v50 }
 0x6e1   : > { %v1750_v52 = vpop.xlane.xlu0 %1749 }
 0x6e2   : > { %3415 = vrsqrt.f32 %v1753_v51  ;;  %v1752_v53 = vmul.f32 0.03125, %v1750_v52 }
 0x6e4   : > { %v1754_v55 = vadd.f32 1e-05, %v1752_v53 }
 0x6e6   : > { %3417 = vrsqrt.f32 %v1754_v55 }
 0x6ef   : > { %v3416_v56 = vpop.eup %3415 }
 0x6f0   : > { %v1757_v57 = vmul.f32 %v3416_v56, %v1741_v33 }
 0x6f2   : > { %v1765_v59 = vmul.f32 %v3074_v58, %v1757_v57 }
 0x6f3   : > { %v3418_v44 = vpop.eup %3417 }
 0x6f4   : > { %v1758_v54 = vmul.f32 %v3418_v44, %v1742_v35  ;;  %v3978_v62 = vadd.f32 %v3075_v60, %v1765_v59 }
 0x6f6   : > { %v1766_v61 = vmul.f32 %v3074_v58, %v1758_v54 }
 0x6f8   : > { %v3980_v63 = vadd.f32 %v3075_v60, %v1766_v61  ;;  %v1973_v1 = vpop.permute.xlu1 %1972 }
 0x6f9   : > { %1978 = vst.msk [vmem:[#allocation6 + $0x10] sm:$0xff] %vm1175_vm3, %v1973_v1 }
 0x6fa   : > { %v1775_v0 = vpack.c.bf16 %v3980_v63, %v3978_v62 }
 0x6fc   : > { %3242 = vmatmul.mubr.msk.bf16.vlgmr.msra.gmra.mxu0 %vm1117_vm2, %v1775_v0  ;;  %v1997_v2 = vpop.permute.xlu1 %1996  ;;  %v1975_v4 = vpop.permute.xlu0 %1974 }
 0x6fd   : > { %2002 = vst.msk [vmem:[#allocation6 + $0x18] sm:$0xff] %vm1175_vm3, %v1997_v2  ;;  %1979 = vst.msk [vmem:[#allocation6 + $0x30] sm:$0xff] %vm1175_vm3, %v1975_v4 }
 0x700   : > { %v1999_v7 = vpop.permute.xlu1 %1998  ;;  %v1949_v8 = vpop.permute.xlu0 %1948  ;;  %v2026_v9 = vld [vmem:[#allocation6 + $0x10] sm:$0xff] }
 0x701   : > { %2003 = vst.msk [vmem:[#allocation6 + $0x38] sm:$0xff] %vm1175_vm3, %v1999_v7  ;;  %1954 = vst.msk [vmem:[#allocation6 + $0x8] sm:$0xff] %vm1175_vm3, %v1949_v8 }
 0x704   : > { %v1951_v11 = vpop.permute.xlu1 %1950  ;;  %v2027_v12 = vld [vmem:[#allocation6 + $0x18] sm:$0xff]  ;;  %v2030_v15 = vld [vmem:[#allocation6 + $0x30] sm:$0xff] }
 0x705   : > { %1955 = vst.msk [vmem:[#allocation6 + $0x28] sm:$0xff] %vm1175_vm3, %v1951_v11  ;;  %v2033_v14 = vpack.c.bf16 %v2027_v12, %v2026_v9 }
 0x707   : > { %3333 = vmatprep.subr.msk.bf16.mxu0 %vm1175_vm3, %v2033_v14  ;;  %v2058_v16 = vsel %vm1175_vm3, %v2033_v14, 0 }
 0x708   : > { %v2031_v17 = vld [vmem:[#allocation6 + $0x38] sm:$0xff]  ;;  %3254 = vmatpush3.bf16.xpose.msra.mxu0 %v2058_v16  ;;  %v2025_v21 = vld [vmem:[#allocation6 + $0x8] sm:$0xff] }
 0x709   : > { %v2035_v18 = vpack.c.bf16 %v2031_v17, %v2030_v15  ;;  %v2032_v23 = vpack.c.bf16 %v2025_v21, %v2024_v20 }
 0x70b   : > { %3335 = vmatprep.subr.msk.bf16.mxu1 %vm1175_vm3, %v2035_v18  ;;  %v2119_v19 = vsel %vm1175_vm3, %v2035_v18, 0  ;;  %3334 = vmatprep.subr.msk.bf16.mxu0 %vm1175_vm3, %v2032_v23  ;;  %v2055_v26 = vsel %vm1175_vm3, %v2032_v23, 0 }
 0x70c   : > { %3262 = vmatpush3.bf16.xpose.msra.mxu1 %v2119_v19  ;;  %v2029_v24 = vld [vmem:[#allocation6 + $0x28] sm:$0xff] }
 0x70d   : > { %v2034_v25 = vpack.c.bf16 %v2029_v24, %v2028_v22 }
 0x70f   : > { %3336 = vmatprep.subr.msk.bf16.mxu1 %vm1175_vm3, %v2034_v25  ;;  %v2116_v27 = vsel %vm1175_vm3, %v2034_v25, 0 }
 0x710   : > { %3256 = vmatpush3.bf16.xpose.msra.mxu0 %v2055_v26 }
 0x714   : > { %3264 = vmatpush3.bf16.xpose.msra.mxu1 %v2116_v27 }
 0x7bc   : > { %v1836_v29 = vpop.f32.mrf.mxu0 }
 0x7bd   : > { %v1837_v30 = vadd.f32 %v3076_v28, %v1836_v29 }
 0x7be   : > { %v3243_v5 = vpop.f32.mrf.mxu0 }
 0x7bf   : > { %1924 = vst.msk [vmem:[#allocation3] sm:$0xff] %vm1175_vm3, %v1837_v30  ;;  %1940 = vrot.lane.b32.xlu0 %v1837_v30, %s3475_s9 }
 0x7c0   : > { %v1839_v31 = vpop.f32.mrf.mxu0 }
 0x7c1   : > { %v1840_v6 = vadd.f32 %v3076_v28, %v1839_v31 }
 0x7c2   : > { %v3244_v32 = vpop.f32.mrf.mxu0 }
 0x7c3   : > { %1925 = vst.msk [vmem:[#allocation3 + $0x20] sm:$0xff] %vm1175_vm3, %v1840_v6  ;;  %1942 = vrot.lane.b32.xlu1 %v1840_v6, %s3475_s9  ;;  %1964 = vrot.lane.b32.xlu0 %v1837_v30, %s3476_s30 }
 0x7c6   : > { %v2012_v36 = vld [vmem:[#allocation3] sm:$0xff] }
 0x7c7   : > { %1966 = vrot.lane.b32.xlu1 %v1840_v6, %s3476_s30  ;;  %1988 = vrot.lane.b32.xlu0 %v1837_v30, %s3477_s12 }
 0x7ca   : > { %v2016_v40 = vld [vmem:[#allocation3 + $0x20] sm:$0xff] }
 0x7cb   : > { %1990 = vrot.lane.b32.xlu1 %v1840_v6, %s3477_s12  ;;  %s4315_s12 = sld [smem:[#allocation16_spill]] }
 0x7d1   : > { %v1913_v52 = vld [vmem:[%s4315_s12 + $0x10] sm:$0xff]  ;;  %v1911_v55 = vld [vmem:[%s4315_s12] sm:$0xff]  ;;  %v1914_v58 = vld [vmem:[%s4315_s12 + $0x18] sm:$0xff] }
 0x7d2   : > { %v1917_v44 = vld [vmem:[%s4315_s12 + $0x30] sm:$0xff]  ;;  %v1912_v0 = vld [vmem:[%s4315_s12 + $0x8] sm:$0xff]  ;;  %v1915_v9 = vld [vmem:[%s4315_s12 + $0x20] sm:$0xff] }
 0x7d3   : > { %v1916_v18 = vld [vmem:[%s4315_s12 + $0x28] sm:$0xff]  ;;  %v1918_v22 = vld [vmem:[%s4315_s12 + $0x38] sm:$0xff] }
 0x831   : > { %v1941_v33 = vpop.permute.xlu0 %1940 }
 0x832   : > { %1946 = vst.msk [vmem:[#allocation3 + $0x8] sm:$0xff] %vm1175_vm3, %v1941_v33 }
 0x835   : > { %v1943_v13 = vpop.permute.xlu1 %1942  ;;  %v1965_v10 = vpop.permute.xlu0 %1964 }
 0x836   : > { %1947 = vst.msk [vmem:[#allocation3 + $0x28] sm:$0xff] %vm1175_vm3, %v1943_v13  ;;  %1970 = vst.msk [vmem:[#allocation3 + $0x10] sm:$0xff] %vm1175_vm3, %v1965_v10 }
 0x839   : > { %v1967_v34 = vpop.permute.xlu1 %1966  ;;  %v1989_v35 = vpop.permute.xlu0 %1988  ;;  %v2013_v37 = vld [vmem:[#allocation3 + $0x8] sm:$0xff] }
 0x83a   : > { %1971 = vst.msk [vmem:[#allocation3 + $0x30] sm:$0xff] %vm1175_vm3, %v1967_v34  ;;  %1994 = vst.msk [vmem:[#allocation3 + $0x18] sm:$0xff] %vm1175_vm3, %v1989_v35  ;;  %v2020_v38 = vpack.c.bf16 %v2013_v37, %v2012_v36 }
 0x83c   : > { %3257 = vmatprep.mubr.msk.bf16.mxu0 %vm1175_vm3, %v2020_v38 }
 0x83d   : > { %v1991_v39 = vpop.permute.xlu1 %1990  ;;  %v2017_v41 = vld [vmem:[#allocation3 + $0x28] sm:$0xff]  ;;  %v2014_v45 = vld [vmem:[#allocation3 + $0x10] sm:$0xff] }
 0x83e   : > { %1995 = vst.msk [vmem:[#allocation3 + $0x38] sm:$0xff] %vm1175_vm3, %v1991_v39  ;;  %v2022_v42 = vpack.c.bf16 %v2017_v41, %v2016_v40 }
 0x840   : > { %3265 = vmatprep.mubr.msk.bf16.mxu1 %vm1175_vm3, %v2022_v42 }
 0x841   : > { %v2015_v46 = vld [vmem:[#allocation3 + $0x18] sm:$0xff]  ;;  %v2018_v49 = vld [vmem:[#allocation3 + $0x30] sm:$0xff] }
 0x842   : > { %v2021_v48 = vpack.c.bf16 %v2015_v46, %v2014_v45 }
 0x844   : > { %3258 = vmatmul.mubr.msk.bf16.vlgmr.msra.gmra.mxu0 %vm1175_vm3, %v2021_v48 }
 0x845   : > { %v2019_v50 = vld [vmem:[#allocation3 + $0x38] sm:$0xff] }
 0x846   : > { %v2023_v51 = vpack.c.bf16 %v2019_v50, %v2018_v49 }
 0x848   : > { %3266 = vmatmul.mubr.msk.bf16.vlgmr.msra.gmra.mxu1 %vm1175_vm3, %v2023_v51 }
 0x904   : > { %v3259_v53 = vpop.f32.mrf.mxu0 }
 0x905   : > { %v2103_v56 = vadd.f32 %v3259_v53, %v1913_v52 }
 0x906   : > { %v2094_v57 = vpop.f32.mrf.mxu0 }
 0x907   : > { %v2095_v54 = vadd.f32 %v2094_v57, %v1911_v55  ;;  %v2176_v59 = vsel %vm1117_vm2, %v2103_v56, -inf }
 0x908   : > { %2177 = vmax.xlane.f32.xlu1 %v2176_v59  ;;  %v3260_v60 = vpop.f32.mrf.mxu0  ;;  %v3267_v61 = vpop.f32.mrf.mxu1 }
 0x909   : > { %v2106_v1 = vadd.f32 %v3260_v60, %v1914_v58  ;;  %v2164_v2 = vadd.f32 %v3267_v61, %v1917_v44  ;;  %v2170_v4 = vsel %vm1117_vm2, %v2095_v54, -inf }
 0x90a   : > { %v2097_v7 = vpop.f32.mrf.mxu0  ;;  %2171 = vmax.xlane.f32.xlu0 %v2170_v4  ;;  %v2155_v8 = vpop.f32.mrf.mxu1 }
 0x90b   : > { %v2098_v11 = vadd.f32 %v2097_v7, %v1912_v0  ;;  %v2188_v12 = vsel %vm1117_vm2, %v2164_v2, -inf  ;;  %v2156_v15 = vadd.f32 %v2155_v8, %v1915_v9  ;;  %v2179_v16 = vsel %vm1117_vm2, %v2106_v1, -inf }
 0x90c   : > { %2189 = vmax.xlane.f32.xlu1 %v2188_v12  ;;  %v3268_v14 = vpop.f32.mrf.mxu1 }
 0x90d   : > { %v2173_v19 = vsel %vm1117_vm2, %v2098_v11, -inf  ;;  %v2182_v21 = vsel %vm1117_vm2, %v2156_v15, -inf  ;;  %v2167_v23 = vadd.f32 %v3268_v14, %v1918_v22 }
 0x90e   : > { %2180 = vmax.xlane.f32.xlu0 %v2179_v16  ;;  %v2158_v17 = vpop.f32.mrf.mxu1 }
 0x90f   : > { %v2159_v20 = vadd.f32 %v2158_v17, %v1916_v18  ;;  %v2191_v25 = vsel %vm1117_vm2, %v2167_v23, -inf }
 0x910   : > { %2174 = vmax.xlane.f32.xlu1 %v2173_v19 }
 0x911   : > { %v2185_v24 = vsel %vm1117_vm2, %v2159_v20, -inf }
 0x912   : > { %2183 = vmax.xlane.f32.xlu0 %v2182_v21 }
 0x916   : > { %2186 = vmax.xlane.f32.xlu0 %v2185_v24 }
 0x91a   : > { %2192 = vmax.xlane.f32.xlu0 %v2191_v25 }
 0x921   : > { %1980 = vrot.lane.b32.xlu1 %v3948_v43, %s3472_s26 }
 0x925   : > { %2004 = vrot.lane.b32.xlu1 %v3948_v43, %s3474_s8 }
 0x929   : > { %2006 = vrot.lane.b32.xlu1 %v3954_v47, %s3474_s8  ;;  %s4318_s8 = scalar_lea.vmem %s4238_s15, %s3634_s7 }
 0x92d   : > { %1932 = vrot.lane.b32.xlu1 %v3954_v47, %s3471_s1 }
 0x930   : > { %1982 = vrot.lane.b32.xlu0 %v3954_v47, %s3472_s26 }
 0x934   : > { %1930 = vrot.lane.b32.xlu0 %v3948_v43, %s3471_s1  ;;  %s4316_s1 = smov 8  }
 0x991   : > { %v2178_v26 = vpop.xlane.xlu1 %2177 }
 0x992   : > { %v2196_v27 = vsub.f32 %v2103_v56, %v2178_v26 }
 0x993   : > { %v2172_v28 = vpop.xlane.xlu0 %2171 }
 0x994   : > { %v2206_v29 = vmul.f32 1.442695, %v2196_v27  ;;  %v2194_v30 = vsub.f32 %v2095_v54, %v2172_v28 }
 0x995   : > { %v2190_v5 = vpop.xlane.xlu1 %2189 }
 0x996   : > { %3419 = vpow2.f32 %v2206_v29  ;;  %v2202_v31 = vmul.f32 1.442695, %v2194_v30  ;;  %v2200_v6 = vsub.f32 %v2164_v2, %v2190_v5 }
 0x997   : > { %v2181_v32 = vpop.xlane.xlu0 %2180 }
 0x998   : > { %3421 = vpow2.f32 %v2202_v31  ;;  %v2214_v33 = vmul.f32 1.442695, %v2200_v6  ;;  %v2197_v13 = vsub.f32 %v2106_v1, %v2181_v32 }
 0x999   : > { %v2175_v10 = vpop.xlane.xlu1 %2174 }
 0x99a   : > { %v2208_v34 = vmul.f32 1.442695, %v2197_v13  ;;  %v2195_v35 = vsub.f32 %v2098_v11, %v2175_v10  ;;  %3423 = vpow2.f32 %v2214_v33 }
 0x99b   : > { %v2184_v36 = vpop.xlane.xlu0 %2183 }
 0x99c   : > { %3425 = vpow2.f32 %v2208_v34  ;;  %v2204_v37 = vmul.f32 1.442695, %v2195_v35  ;;  %v2198_v38 = vsub.f32 %v2156_v15, %v2184_v36 }
 0x99d   : > { %v1981_v39 = vpop.permute.xlu1 %1980 }
 0x99e   : > { %3427 = vpow2.f32 %v2204_v37  ;;  %v2210_v40 = vmul.f32 1.442695, %v2198_v38  ;;  %1986 = vst.msk [vmem:[#allocation7 + $0x10] sm:$0xff] %vm1175_vm3, %v1981_v39 }
 0x99f   : > { %v2187_v41 = vpop.xlane.xlu0 %2186 }
 0x9a0   : > { %3429 = vpow2.f32 %v2210_v40  ;;  %v2199_v45 = vsub.f32 %v2159_v20, %v2187_v41 }
 0x9a1   : > { %v2005_v42 = vpop.permute.xlu1 %2004 }
 0x9a2   : > { %2010 = vst.msk [vmem:[#allocation7 + $0x18] sm:$0xff] %vm1175_vm3, %v2005_v42  ;;  %v2212_v53 = vmul.f32 1.442695, %v2199_v45 }
 0x9a3   : > { %v4068_v46 = vpop.eup %3419  ;;  %v2193_v48 = vpop.xlane.xlu0 %2192 }
 0x9a4   : > { %v2201_v49 = vsub.f32 %v2167_v23, %v2193_v48  ;;  %v2224_v50 = vsel %vm1117_vm2, %v4068_v46, 0.0 }
 0x9a5   : > { %v4072_v51 = vpop.eup %3421  ;;  %2225 = vadd.xlane.f32.xlu1 %v2224_v50  ;;  %v2007_v52 = vpop.permute.xlu1 %2006  ;;  %v2038_v59 = vld [vmem:[#allocation7 + $0x10] sm:$0xff] }
 0x9a6   : > { %v2216_v55 = vmul.f32 1.442695, %v2201_v49  ;;  %2011 = vst.msk [vmem:[#allocation7 + $0x38] sm:$0xff] %vm1175_vm3, %v2007_v52  ;;  %v2218_v58 = vsel %vm1117_vm2, %v4072_v51, 0.0 }
 0x9a7   : > { %v1983_v56 = vpop.permute.xlu0 %1982  ;;  %v4075_v57 = vpop.eup %3423 }
 0x9a8   : > { %3431 = vpow2.f32 %v2216_v55  ;;  %1987 = vst.msk [vmem:[#allocation7 + $0x30] sm:$0xff] %vm1175_vm3, %v1983_v56  ;;  %v2236_v4 = vsel %vm1117_vm2, %v4075_v57, 0.0  ;;  %v3372_v56 = vld [vmem:[%s3684_s2] sm:$0xff]  }
 0x9a9   : > { %v4080_v44 = vpop.eup %3425  ;;  %2219 = vadd.xlane.f32.xlu1 %v2218_v58  ;;  %v1933_v54 = vpop.permute.xlu1 %1932  ;;  %v2039_v60 = vld [vmem:[#allocation7 + $0x18] sm:$0xff]  ;;  %3433 = vpow2.f32 %v2212_v53 }
 0x9aa   : > { %1937 = vst.msk [vmem:[#allocation7 + $0x20] sm:$0xff] %vm1175_vm3, %v1933_v54  ;;  %v2227_v61 = vsel %vm1117_vm2, %v4080_v44, 0.0  ;;  %v2045_v0 = vpack.c.bf16 %v2039_v60, %v2038_v59 }
 0x9ab   : > { %v3428_v1 = vpop.eup %3427  ;;  %2228 = vadd.xlane.f32.xlu0 %v2227_v61  ;;  %v1931_v2 = vpop.permute.xlu0 %1930 }
 0x9ac   : > { %1936 = vst.msk [vmem:[#allocation7] sm:$0xff] %vm1175_vm3, %v1931_v2  ;;  %3269 = vmatprep.subr.bf16.mxu0 %v2045_v0  ;;  %v2221_v8 = vsel %vm1117_vm2, %v3428_v1, 0.0 }
 0x9ad   : > { %v4088_v7 = vpop.eup %3429  ;;  %2237 = vadd.xlane.f32.xlu1 %v2236_v4  ;;  %3270 = vmatpush3.bf16.msra.mxu0 %v2045_v0  ;;  %v2043_v11 = vld [vmem:[#allocation7 + $0x38] sm:$0xff] }
 0x9ae   : > { %v2230_v12 = vsel %vm1117_vm2, %v4088_v7, 0.0 }
 0x9af   : > { %2222 = vadd.xlane.f32.xlu0 %v2221_v8  ;;  %v2042_v9 = vld [vmem:[#allocation7 + $0x30] sm:$0xff] }
 0x9b0   : > { %v2047_v14 = vpack.c.bf16 %v2043_v11, %v2042_v9 }
 0x9b1   : > { %2231 = vadd.xlane.f32.xlu1 %v2230_v12  ;;  %v2040_v28 = vld [vmem:[#allocation7 + $0x20] sm:$0xff]  ;;  %v3092_v12 = vld [vmem:[%s4318_s8] ss:$0 sm:$0xff] }
 0x9b2   : > { %3277 = vmatprep.subr.bf16.mxu1 %v2047_v14 }
 0x9b3   : > { %3278 = vmatpush3.bf16.msra.mxu1 %v2047_v14  ;;  %v2036_v35 = vld [vmem:[#allocation7] sm:$0xff] }
 0x9b5   : > { %v3432_v15 = vpop.eup %3431 }
 0x9b6   : > { %v2239_v16 = vsel %vm1117_vm2, %v3432_v15, 0.0  ;;  %v3434_v17 = vpop.eup %3433 }
 0x9b7   : > { %2240 = vadd.xlane.f32.xlu0 %v2239_v16  ;;  %v2233_v18 = vsel %vm1117_vm2, %v3434_v17, 0.0 }
 0x9bb   : > { %2234 = vadd.xlane.f32.xlu0 %v2233_v18 }
 0x9c2   : > { %1958 = vrot.lane.b32.xlu1 %v3954_v47, %s3473_s28 }
 0x9d1   : > { %1956 = vrot.lane.b32.xlu0 %v3948_v43, %s3473_s28 }
 0xa2e   : > { %v2226_v19 = vpop.xlane.xlu1 %2225 }
 0xa32   : > { %v2220_v20 = vpop.xlane.xlu1 %2219 }
 0xa33   : > { %3435 = vrcp.f32 %v2220_v20 }
 0xa34   : > { %v2229_v21 = vpop.xlane.xlu0 %2228 }
 0xa36   : > { %v2238_v22 = vpop.xlane.xlu1 %2237 }
 0xa38   : > { %v2223_v23 = vpop.xlane.xlu0 %2222 }
 0xa39   : > { %3437 = vrcp.f32 %v2223_v23 }
 0xa3a   : > { %v2232_v24 = vpop.xlane.xlu1 %2231  ;;  %3439 = vrcp.f32 %v2226_v19 }
 0xa3b   : > { %3441 = vrcp.f32 %v2229_v21 }
 0xa3e   : > { %v1959_v25 = vpop.permute.xlu1 %1958 }
 0xa3f   : > { %1963 = vst.msk [vmem:[#allocation7 + $0x28] sm:$0xff] %vm1175_vm3, %v1959_v25 }
 0xa40   : > { %v2241_v26 = vpop.xlane.xlu0 %2240  ;;  %v3436_v47 = vpop.eup %3435 }
 0xa41   : > { %3443 = vrcp.f32 %v2241_v26  ;;  %v2250_v5 = vmul.f32 %v3436_v47, %v4072_v51 }
 0xa42   : > { %3445 = vrcp.f32 %v2232_v24 }
 0xa43   : > { %3447 = vrcp.f32 %v2238_v22 }
 0xa44   : > { %v2235_v27 = vpop.xlane.xlu0 %2234 }
 0xa45   : > { %3449 = vrcp.f32 %v2235_v27 }
 0xa46   : > { %v3438_v43 = vpop.eup %3437  ;;  %v2041_v29 = vld [vmem:[#allocation7 + $0x28] sm:$0xff] }
 0xa47   : > { %v2046_v30 = vpack.c.bf16 %v2041_v29, %v2040_v28  ;;  %v2251_v31 = vmul.f32 %v3438_v43, %v3428_v1  ;;  %v3440_v33 = vpop.eup %3439 }
 0xa48   : > { %v1957_v6 = vpop.permute.xlu0 %1956  ;;  %v3442_v13 = vpop.eup %3441  ;;  %v2252_v42 = vmul.f32 %v3440_v33, %v4068_v46  ;;  %v3371_v46 = vld [vmem:[%s3684_s2 + $0x8] sm:$0xff]   ;;  %s4317_s2 = smov 24   ;;  %v3378_v33 = vld [vmem:[%s3711_s10 + $0x20] sm:$0xff]  }
 0xa49   : > { %1962 = vst.msk [vmem:[#allocation7 + $0x8] sm:$0xff] %vm1175_vm3, %v1957_v6  ;;  %3279 = vmatprep.subr.bf16.mxu1 %v2046_v30  ;;  %v2258_v32 = vpack.c.bf16 %v2251_v31, %v2250_v5  ;;  %v2253_v39 = vmul.f32 %v3442_v13, %v4080_v44  ;;  %v3374_v5 = vld [vmem:[%s3701_s4] sm:$0xff]   ;;  %v3375_v31 = vld [vmem:[%s3711_s10 + $0x38] sm:$0xff]   ;;  %v3376_v6 = vld [vmem:[%s3711_s10 + $0x30] sm:$0xff]  }
 0xa4a   : > { %3280 = vmatpush3.bf16.msra.mxu1 %v2046_v30  ;;  %v3373_v30 = vld [vmem:[%s3701_s4 + $0x8] sm:$0xff]   ;;  %v3379_v13 = vld [vmem:[%s3711_s10 + $0x18] sm:$0xff]   ;;  %s4325_s4 = sld [smem:[#allocation28_spill]] }
 0xa4b   : > { %3273 = vmatprep.mubr.msk.bf16.mxu0 %vm1117_vm2, %v2258_v32  ;;  %3293 = vmatprep.subr.bf16.mxu1 %v3469_v3  ;;  %v2259_v50 = vpack.c.bf16 %v2253_v39, %v2252_v42  ;;  %v3377_v32 = vld [vmem:[%s3711_s10 + $0x28] sm:$0xff]  }
 0xa4e   : > { %v3444_v10 = vpop.eup %3443 }
 0xa4f   : > { %v3446_v34 = vpop.eup %3445  ;;  %v2257_v41 = vmul.f32 %v3444_v10, %v3432_v15 }
 0xa50   : > { %v2037_v36 = vld [vmem:[#allocation7 + $0x8] sm:$0xff]  ;;  %v3448_v37 = vpop.eup %3447  ;;  %v2254_v45 = vmul.f32 %v3446_v34, %v4088_v7 }
 0xa51   : > { %v2044_v38 = vpack.c.bf16 %v2037_v36, %v2036_v35  ;;  %v2256_v49 = vmul.f32 %v3448_v37, %v4075_v57 }
 0xa52   : > { %v3450_v40 = vpop.eup %3449 }
 0xa53   : > { %3271 = vmatprep.subr.bf16.mxu0 %v2044_v38  ;;  %v2255_v48 = vmul.f32 %v3450_v40, %v3434_v17  ;;  %v2261_v52 = vpack.c.bf16 %v2257_v41, %v2256_v49  ;;  %v3096_v41 = vld [vmem:[%s4319_s18] ss:$0 sm:$0xff]  ;;  %s4327_s18 = sld [smem:[#allocation10_spill]] }
 0xa54   : > { %3272 = vmatpush3.bf16.msra.mxu0 %v2044_v38  ;;  %v3097_v49 = vld [vmem:[%s4320_s6] ss:$0 sm:$0xff] }
 0xa55   : > { %v2260_v51 = vpack.c.bf16 %v2255_v48, %v2254_v45  ;;  %3285 = vmatprep.subr.bf16.mxu0 %v3469_v3 }
 0xa57   : > { %3274 = vmatmul.mubr.msk.bf16.vlgmr.msra.gmra.mxu0 %vm1117_vm2, %v2259_v50  ;;  %3281 = vmatprep.mubr.msk.bf16.mxu1 %vm1117_vm2, %v2260_v51 }
 0xa58   : > { %3282 = vmatmul.mubr.msk.bf16.vlgmr.msra.gmra.mxu1 %vm1117_vm2, %v2261_v52  ;;  %3289 = vmatprep.mubr.msk.bf16.mxu0 %vm3470_vm1, %v3469_v3 }
 0xa59   : > { %3297 = vmatprep.mubr.msk.bf16.mxu1 %vm3470_vm1, %v3469_v3  ;;  %3286 = vmatpush3.bf16.msra.mxu0 %v3371_v46  ;;  %p3113_p5 = scmp.ne.s32.totalorder %s4327_s18, 1 }
 0xa5a   : > { %3287 = vmatprep.subr.bf16.mxu0 %v3469_v3  ;;  %3294 = vmatpush3.bf16.msra.mxu1 %v3373_v30  ;;  %s4328_s6 = sld [smem:[#allocation29_spill]] (!%p3113_p5) }
 0xa5b   : > { %3295 = vmatprep.subr.bf16.mxu1 %v3469_v3  ;;  %s4329_s24 = sld [smem:[#allocation30_spill]] (!%p3113_p5) }
 0xa5c   : > { %s4330_s3 = sld [smem:[#allocation31_spill]] (!%p3113_p5) }
 0xa5d   : > { %3288 = vmatpush3.bf16.msra.mxu0 %v3372_v56  ;;  %v3382_v56 = vld [vmem:[%s3711_s10] sm:$0xff]  }
 0xa5e   : > { %3301 = vmatprep.subr.bf16.mxu0 %v3469_v3  ;;  %3296 = vmatpush3.bf16.msra.mxu1 %v3374_v5 }
 0xb17   : > { %v3275_v53 = vpop.f32.mrf.mxu0 }
 0xb18   : > { %v3283_v55 = vpop.f32.mrf.mxu1  ;;  %2386 = vrot.lane.b32.xlu0 %v3275_v53, %s3482_s25  ;;  %v3380_v53 = vld [vmem:[%s3711_s10 + $0x10] sm:$0xff]  }
 0xb19   : > { %2388 = vrot.lane.b32.xlu1 %v3283_v55, %s3482_s25  ;;  %v2302_v57 = vpop.f32.mrf.mxu0  ;;  %v3381_v55 = vld [vmem:[%s3711_s10 + $0x8] sm:$0xff]   ;;  %s4322_s10 = scalar_lea.vmem %s4244_s21, %s3634_s7  ;;  %s4326_s25 = scalar_lea.vmem %s4325_s4, %s3634_s7 }
 0xb1a   : > { %2372 = vst.msk [vmem:[#allocation8] sm:$0xff] %vm1175_vm3, %v2302_v57  ;;  %v2357_v58 = vpop.f32.mrf.mxu1  ;;  %v3098_v57 = vld [vmem:[%s4321_s29] ss:$0 sm:$0xff] }
 0xb1b   : > { %2373 = vst.msk [vmem:[#allocation8 + $0x8] sm:$0xff] %vm1175_vm3, %v2357_v58  ;;  %v3276_v44 = vpop.f32.mrf.mxu0 }
 0xb1c   : > { %v3284_v54 = vpop.f32.mrf.mxu1 }
 0xb1d   : > { %v2305_v59 = vpop.f32.mrf.mxu0 }
 0xb1e   : > { %v2360_v60 = vpop.f32.mrf.mxu1  ;;  %2376 = vrot.lane.b32.xlu0 %v2305_v59, %s4316_s1 }
 0xb1f   : > { %2378 = vrot.lane.b32.xlu1 %v2360_v60, %s4316_s1 }
 0xb22   : > { %2396 = vrot.lane.b32.xlu0 %v3276_v44, %s4317_s2 }
 0xb23   : > { %2398 = vrot.lane.b32.xlu1 %v3284_v54, %s4317_s2  ;;  %s4323_s2 = sld [smem:[#allocation27_spill]] }
 0xb29   : > { %s4324_s26 = scalar_lea.vmem %s4323_s2, %s3634_s7 }
 0xb2a   : > { %v3111_v5 = vld [vmem:[%s4324_s26] ss:$0 sm:$0xff] }
 0xb8a   : > { %v2387_v61 = vpop.permute.xlu0 %2386 }
 0xb8b   : > { %v2389_v0 = vpop.permute.xlu1 %2388 }
 0xb90   : > { %v2377_v1 = vpop.permute.xlu0 %2376 }
 0xb91   : > { %2382 = vst.msk [vmem:[#allocation8] sm:$0xff] %vm1638_vm4, %v2377_v1  ;;  %v2379_v2 = vpop.permute.xlu1 %2378 }
 0xb92   : > { %2392 = vst.msk [vmem:[#allocation8] sm:$0xff] %vm1649_vm5, %v2387_v61 }
 0xb93   : > { %2383 = vst.msk [vmem:[#allocation8 + $0x8] sm:$0xff] %vm1638_vm4, %v2379_v2 }
 0xb94   : > { %2393 = vst.msk [vmem:[#allocation8 + $0x8] sm:$0xff] %vm1649_vm5, %v2389_v0  ;;  %v2397_v4 = vpop.permute.xlu0 %2396 }
 0xb95   : > { %2402 = vst.msk [vmem:[#allocation8] sm:$0xff] %vm1660_vm6, %v2397_v4  ;;  %v2399_v7 = vpop.permute.xlu1 %2398 }
 0xb96   : > { %2403 = vst.msk [vmem:[#allocation8 + $0x8] sm:$0xff] %vm1660_vm6, %v2399_v7 }
 0xb9c   : > { %v2404_v8 = vld [vmem:[#allocation8] sm:$0xff] }
 0xb9d   : > { %v2405_v9 = vld [vmem:[#allocation8 + $0x8] sm:$0xff] }
 0xb9e   : > { %v2406_v11 = vpack.c.bf16 %v2405_v9, %v2404_v8 }
 0xba0   : > { %3290 = vmatmul.mubr.msk.bf16.vlgmr.msra.gmra.mxu0 %vm1117_vm2, %v2406_v11 }
 0xba1   : > { %3317 = vmatprep.mubr.msk.bf16.mxu0 %vm3470_vm1, %v3469_v3  ;;  %3302 = vmatpush3.bf16.msra.mxu0 %v3375_v31 }
 0xba2   : > { %3303 = vmatprep.subr.bf16.mxu0 %v3469_v3 }
 0xba5   : > { %3304 = vmatpush3.bf16.msra.mxu0 %v3376_v6  ;;  %v3112_v6 = vld [vmem:[%s4326_s25] ss:$0 sm:$0xff] }
 0xba6   : > { %3305 = vmatprep.subr.bf16.mxu0 %v3469_v3 }
 0xba9   : > { %3306 = vmatpush3.bf16.msra.mxu0 %v3377_v32 }
 0xbaa   : > { %3307 = vmatprep.subr.bf16.mxu0 %v3469_v3 }
 0xbad   : > { %3308 = vmatpush3.bf16.msra.mxu0 %v3378_v33 }
 0xbae   : > { %3309 = vmatprep.subr.bf16.mxu0 %v3469_v3 }
 0xbb1   : > { %3310 = vmatpush3.bf16.msra.mxu0 %v3379_v13 }
 0xbb2   : > { %3311 = vmatprep.subr.bf16.mxu0 %v3469_v3 }
 0xbb5   : > { %3312 = vmatpush3.bf16.msra.mxu0 %v3380_v53 }
 0xbb6   : > { %3313 = vmatprep.subr.bf16.mxu0 %v3469_v3 }
 0xbb9   : > { %3314 = vmatpush3.bf16.msra.mxu0 %v3381_v55 }
 0xbba   : > { %3315 = vmatprep.subr.bf16.mxu0 %v3469_v3  ;;  %v3102_v3 = vld [vmem:[%s4322_s10] ss:$0 sm:$0xff] }
 0xbbd   : > { %3316 = vmatpush3.bf16.msra.mxu0 %v3382_v56 }
 0xc60   : > { %v2462_v14 = vpop.f32.mrf.mxu0 }
 0xc61   : > { %v2463_v15 = vadd.f32 %v3092_v12, %v2462_v14 }
 0xc62   : > { %v3291_v16 = vpop.f32.mrf.mxu0 }
 0xc63   : > { %v2469_v17 = vadd.f32 %v2463_v15, %v3978_v62 }
 0xc64   : > { %v2465_v18 = vpop.f32.mrf.mxu0 }
 0xc65   : > { %v2466_v19 = vadd.f32 %v3092_v12, %v2465_v18  ;;  %v2473_v20 = vsel %vm1117_vm2, %v2469_v17, 0.0 }
 0xc66   : > { %2474 = vadd.xlane.f32.xlu0 %v2473_v20  ;;  %v3292_v21 = vpop.f32.mrf.mxu0 }
 0xc67   : > { %v2470_v22 = vadd.f32 %v2466_v19, %v3980_v63 }
 0xc69   : > { %v2476_v23 = vsel %vm1117_vm2, %v2470_v22, 0.0 }
 0xc6a   : > { %2477 = vadd.xlane.f32.xlu1 %v2476_v23 }
 0xcef   : > { %v2475_v24 = vpop.xlane.xlu0 %2474 }
 0xcf0   : > { %v2479_v25 = vmul.f32 0.03125, %v2475_v24 }
 0xcf2   : > { %v2481_v26 = vsub.f32 %v2469_v17, %v2479_v25 }
 0xcf3   : > { %v2478_v47 = vpop.xlane.xlu1 %2477 }
 0xcf4   : > { %v2480_v62 = vmul.f32 0.03125, %v2478_v47  ;;  %v2483_v27 = vmul.f32 %v2481_v26, %v2481_v26 }
 0xcf6   : > { %v2482_v43 = vsub.f32 %v2470_v22, %v2480_v62  ;;  %v2485_v28 = vsel %vm1117_vm2, %v2483_v27, 0.0 }
 0xcf7   : > { %2486 = vadd.xlane.f32.xlu0 %v2485_v28 }
 0xcf8   : > { %v2484_v29 = vmul.f32 %v2482_v43, %v2482_v43 }
 0xcfa   : > { %v2488_v63 = vsel %vm1117_vm2, %v2484_v29, 0.0 }
 0xcfb   : > { %2489 = vadd.xlane.f32.xlu0 %v2488_v63 }
 0xd80   : > { %v2487_v10 = vpop.xlane.xlu0 %2486 }
 0xd81   : > { %v2491_v34 = vmul.f32 0.03125, %v2487_v10 }
 0xd83   : > { %v2493_v35 = vadd.f32 1e-05, %v2491_v34 }
 0xd84   : > { %v2490_v36 = vpop.xlane.xlu0 %2489 }
 0xd85   : > { %3451 = vrsqrt.f32 %v2493_v35  ;;  %v2492_v37 = vmul.f32 0.03125, %v2490_v36 }
 0xd87   : > { %v2494_v38 = vadd.f32 1e-05, %v2492_v37 }
 0xd89   : > { %3453 = vrsqrt.f32 %v2494_v38 }
 0xd92   : > { %v3452_v39 = vpop.eup %3451 }
 0xd93   : > { %v2497_v40 = vmul.f32 %v3452_v39, %v2481_v26 }
 0xd95   : > { %v2505_v48 = vmul.f32 %v3096_v41, %v2497_v40 }
 0xd96   : > { %v3454_v42 = vpop.eup %3453 }
 0xd97   : > { %v2498_v45 = vmul.f32 %v3454_v42, %v2482_v43  ;;  %v2513_v51 = vadd.f32 %v3097_v49, %v2505_v48 }
 0xd99   : > { %v2506_v50 = vmul.f32 %v3096_v41, %v2498_v45 }
 0xd9b   : > { %v2514_v52 = vadd.f32 %v3097_v49, %v2506_v50 }
 0xd9d   : > { %v2515_v46 = vpack.c.bf16 %v2514_v52, %v2513_v51 }
 0xd9f   : > { %3298 = vmatmul.mubr.msk.bf16.vlgmr.msra.gmra.mxu1 %vm1117_vm2, %v2515_v46 }
 0xe5f   : > { %v2576_v58 = vpop.f32.mrf.mxu1 }
 0xe60   : > { %v2577_v54 = vadd.f32 %v3098_v57, %v2576_v58 }
 0xe61   : > { %v3299_v44 = vpop.f32.mrf.mxu1 }
 0xe62   : > { %v2583_v0 = vmax.f32 %v2577_v54, 0.0 }
 0xe63   : > { %v2579_v59 = vpop.f32.mrf.mxu1 }
 0xe64   : > { %v2580_v60 = vadd.f32 %v3098_v57, %v2579_v59 }
 0xe65   : > { %v3300_v61 = vpop.f32.mrf.mxu1 }
 0xe66   : > { %v2584_v1 = vmax.f32 %v2580_v60, 0.0 }
 0xe68   : > { %v2585_v2 = vpack.c.bf16 %v2584_v1, %v2583_v0 }
 0xe6a   : > { %3318 = vmatmul.mubr.bf16.vlgmr.msra.gmra.mxu0 %v2585_v2 }
 0xf2a   : > { %v2691_v4 = vpop.f32.mrf.mxu0 }
 0xf2b   : > { %v2692_v7 = vadd.f32 %v3102_v3, %v2691_v4 }
 0xf2c   : > { %v3319_v8 = vpop.f32.mrf.mxu0 }
 0xf2d   : > { %v2698_v9 = vadd.f32 %v2692_v7, %v2513_v51 }
 0xf2e   : > { %v2694_v11 = vpop.f32.mrf.mxu0 }
 0xf2f   : > { %v2695_v12 = vadd.f32 %v3102_v3, %v2694_v11  ;;  %v2702_v14 = vsel %vm1117_vm2, %v2698_v9, 0.0 }
 0xf30   : > { %2703 = vadd.xlane.f32.xlu1 %v2702_v14  ;;  %v3320_v15 = vpop.f32.mrf.mxu0 }
 0xf31   : > { %v2699_v16 = vadd.f32 %v2695_v12, %v2514_v52 }
 0xf33   : > { %v2705_v17 = vsel %vm1117_vm2, %v2699_v16, 0.0 }
 0xf34   : > { %2706 = vadd.xlane.f32.xlu0 %v2705_v17 }
 0xfb9   : > { %v2704_v18 = vpop.xlane.xlu1 %2703 }
 0xfba   : > { %v2708_v19 = vmul.f32 0.03125, %v2704_v18 }
 0xfbc   : > { %v2710_v20 = vsub.f32 %v2698_v9, %v2708_v19 }
 0xfbd   : > { %v2707_v21 = vpop.xlane.xlu0 %2706 }
 0xfbe   : > { %v2709_v22 = vmul.f32 0.03125, %v2707_v21  ;;  %v2712_v23 = vmul.f32 %v2710_v20, %v2710_v20 }
 0xfc0   : > { %v2711_v24 = vsub.f32 %v2699_v16, %v2709_v22  ;;  %v2714_v25 = vsel %vm1117_vm2, %v2712_v23, 0.0 }
 0xfc1   : > { %2715 = vadd.xlane.f32.xlu1 %v2714_v25 }
 0xfc2   : > { %v2713_v26 = vmul.f32 %v2711_v24, %v2711_v24 }
 0xfc4   : > { %v2717_v47 = vsel %vm1117_vm2, %v2713_v26, 0.0 }
 0xfc5   : > { %2718 = vadd.xlane.f32.xlu0 %v2717_v47 }
0x104a   : > { %v2716_v62 = vpop.xlane.xlu1 %2715 }
0x104b   : > { %v2720_v27 = vmul.f32 0.03125, %v2716_v62 }
0x104d   : > { %v2722_v43 = vadd.f32 1e-05, %v2720_v27 }
0x104e   : > { %v2719_v28 = vpop.xlane.xlu0 %2718 }
0x104f   : > { %3455 = vrsqrt.f32 %v2722_v43  ;;  %v2721_v29 = vmul.f32 0.03125, %v2719_v28 }
0x1051   : > { %v2723_v63 = vadd.f32 1e-05, %v2721_v29 }
0x1053   : > { %3457 = vrsqrt.f32 %v2723_v63 }
0x105c   : > { %v3456_v30 = vpop.eup %3455 }
0x105d   : > { %v2726_v31 = vmul.f32 %v3456_v30, %v2710_v20 }
0x105f   : > { %v2734_v32 = vmul.f32 %v3111_v5, %v2726_v31 }
0x1060   : > { %v3458_v33 = vpop.eup %3457 }
0x1061   : > { %v2742_v13 = vadd.f32 %v3112_v6, %v2734_v32  ;;  %v2727_v10 = vmul.f32 %v3458_v33, %v2711_v24 }
0x1063   : > { %2744 = vst.msk [vmem:[#allocation2] sm:$0xff] %vm1117_vm2, %v2742_v13  ;;  %v2735_v34 = vmul.f32 %v3111_v5, %v2727_v10  ;;  %2749 = sbr.rel (%p3113_p5) target bundleno = 4409 (0x1139), region = 132 }
0x1065   : > { %v2743_v35 = vadd.f32 %v3112_v6, %v2735_v34 }
0x1067   : > { %2745 = vst.msk [vmem:[#allocation2 + $0x8] sm:$0xff] %vm1117_vm2, %v2743_v35 }
0x1068   : > { %v3459_v36 = vld [vmem:[%s4328_s6 + $0x8] sm:$0xff]   ;;  %v3485_v37 = vmov 0.0   ;;  %v3460_v38 = vld [vmem:[%s4328_s6] sm:$0xff]   ;;  %vm3486_vm7 = vmmov 0  }
0x1069   : > { %3321 = vmatprep.subr.bf16.mxu0 %v3485_v37  ;;  %3325 = vmatprep.mubr.msk.bf16.mxu0 %vm3486_vm7, %v3485_v37  ;;  %v3114_v42 = vld [vmem:[%s4329_s24] ss:$0 sm:$0xff] }
0x106a   : > { %3322 = vmatpush3.bf16.msra.mxu0 %v3459_v36  ;;  %v2750_v39 = vld [vmem:[#allocation2] sm:$0xff] }
0x106b   : > { %3323 = vmatprep.subr.bf16.mxu0 %v3485_v37 }
0x106e   : > { %v2751_v40 = vld [vmem:[#allocation2 + $0x8] sm:$0xff]  ;;  %3324 = vmatpush3.bf16.msra.mxu0 %v3460_v38 }
0x106f   : > { %v2752_v41 = vpack.c.bf16 %v2751_v40, %v2750_v39 }
0x1071   : > { %3326 = vmatmul.mubr.msk.bf16.vlgmr.msra.gmra.mxu0 %vm1117_vm2, %v2752_v41 }
0x1131   : > { %v2813_v45 = vpop.f32.mrf.mxu0 }
0x1132   : > { %v2814_v48 = vadd.f32 %v3114_v42, %v2813_v45 }
0x1133   : > { %v3327_v49 = vpop.f32.mrf.mxu0 }
0x1134   : > { %2820 = vst [vmem:[%s4330_s3] sm:$0xff] %v2814_v48 }
0x1135   : > { %v2816_v50 = vpop.f32.mrf.mxu0 }
0x1136   : > { %v2817_v51 = vadd.f32 %v3114_v42, %v2816_v50 }
0x1137   : > { %v3328_v52 = vpop.f32.mrf.mxu0 }
0x1138   : > { %2821 = vst [vmem:[%s4330_s3 + $0x8] sm:$0xff] %v2817_v51 }
0x1139 PF: > { %s4331_s26 = sld [smem:[#allocation9_spill]] }
0x113f   : > { %s36_s27 = sadd.s32 1, %s4331_s26  }
0x1140   : > { %p33_p6 = scmp.ge.s32.totalorder %s36_s27, 4  }
0x1142   :  { %35 = sbr.rel (!%p33_p6) target bundleno = 20 (0x14), region = 215 }

</bundles_post_ra>
